<compile_context>
chip_gen: v7x
topology: tpu7x:2x2x1
jax: 0.10.0
libtpu: 0.0.40
codegen_flags: <defaults>
</compile_context>

<pallas_src>
import jax
import jax.numpy as jnp
from jax.experimental import pallas as pl
from jax.experimental.pallas import tpu as pltpu

HIDDEN = 500              # fixed by the module definition
HIDDEN_PAD = 512          # 4 x 128 lanes
LANE = 128
BN_EPS = 2e-5             # nn.BatchNorm1d(500, eps=2e-05)


def _softplus(x):
    # PyTorch Softplus (beta=1, threshold=20): x if x > 20 else log1p(exp(x))
    return jnp.where(x > 20.0, x, jnp.log1p(jnp.exp(jnp.minimum(x, 20.0))))


def generator_kernel(x_ref, w1_ref, b1_ref, gamma_ref, beta_ref,
                     w2_ref, b2_ref, wo_ref, bo_ref, y_ref):
    # fc1: bf16 operands on the MXU, f32 accumulation; softplus in f32
    h = jnp.dot(x_ref[...].astype(jnp.bfloat16), w1_ref[...],
                preferred_element_type=jnp.float32) + b1_ref[...]
    h = _softplus(h)

    # BatchNorm1d, training mode (biased batch stats), single reduction pass
    inv_b = 1.0 / h.shape[0]
    s1 = jnp.sum(h, axis=0, keepdims=True)
    s2 = jnp.sum(h * h, axis=0, keepdims=True)
    mean = s1 * inv_b
    var = jnp.maximum(s2 * inv_b - mean * mean, 0.0)
    h = (h - mean) * jax.lax.rsqrt(var + BN_EPS)
    h = h * gamma_ref[...] + beta_ref[...]     # padded lanes: gamma=0, beta=0 -> stay 0

    # fc2 + softplus
    h = jnp.dot(h.astype(jnp.bfloat16), w2_ref[...],
                preferred_element_type=jnp.float32) + b2_ref[...]
    h = _softplus(h)

    # out + tanh (padded output lanes are exactly tanh(0)=0, sliced off outside)
    y = jnp.dot(h.astype(jnp.bfloat16), wo_ref[...],
                preferred_element_type=jnp.float32) + bo_ref[...]
    y_ref[...] = jnp.tanh(y).astype(y_ref.dtype)


def generator_forward(x, packed, out_dim):
    """x: (B, input_shape) f32. packed: padded/bf16 kernel params. Returns (B, out_dim) f32."""
    B = x.shape[0]
    out_pad = packed["wo"].shape[1]

    vmem = pl.BlockSpec(memory_space=pltpu.MemorySpace.VMEM)
    args = (x, packed["w1"], packed["b1"], packed["gamma"], packed["beta"],
            packed["w2"], packed["b2"], packed["wo"], packed["bo"])

    y = pl.pallas_call(
        generator_kernel,
        out_shape=jax.ShapeDtypeStruct((B, out_pad), jnp.float32),
        in_specs=[vmem] * len(args),
        out_specs=vmem,
        compiler_params=pltpu.CompilerParams(vmem_limit_bytes=32 * 1024 * 1024),
    )(*args)
    return y[:, :out_dim]


def init_params(key, input_shape, output_shape):
    """Unpadded f32 'master' params (shapes match the PyTorch module, weights pre-transposed)."""
    ks = jax.random.split(key, 6)

    def lin(kw, kb, fan_in, fan_out):
        bound = 1.0 / jnp.sqrt(fan_in)
        w = jax.random.uniform(kw, (fan_in, fan_out), jnp.float32, -bound, bound)
        b = jax.random.uniform(kb, (1, fan_out), jnp.float32, -bound, bound)
        return w, b

    w1, b1 = lin(ks[0], ks[1], input_shape, HIDDEN)
    w2, b2 = lin(ks[2], ks[3], HIDDEN, HIDDEN)
    wo, bo = lin(ks[4], ks[5], HIDDEN, output_shape)
    gamma = jnp.ones((1, HIDDEN), jnp.float32)
    beta = jnp.zeros((1, HIDDEN), jnp.float32)
    return dict(w1=w1, b1=b1, gamma=gamma, beta=beta,
                w2=w2, b2=b2, wo=wo, bo=bo)


def _pad_to(a, shape):
    return jnp.pad(a, [(0, t - s) for s, t in zip(a.shape, shape)])


def pack_params(p):
    """Zero-pad HIDDEN 500->512 and output lanes ->mult of 128; weights -> bf16."""
    in_dim = p["w1"].shape[0]
    out_dim = p["wo"].shape[1]
    out_pad = ((out_dim + LANE - 1) // LANE) * LANE
    return dict(
        w1=_pad_to(p["w1"], (in_dim, HIDDEN_PAD)).astype(jnp.bfloat16),
        b1=_pad_to(p["b1"], (1, HIDDEN_PAD)),
        gamma=_pad_to(p["gamma"], (1, HIDDEN_PAD)),   # pad lanes get gamma=0 (no leakage)
        beta=_pad_to(p["beta"], (1, HIDDEN_PAD)),
        w2=_pad_to(p["w2"], (HIDDEN_PAD, HIDDEN_PAD)).astype(jnp.bfloat16),
        b2=_pad_to(p["b2"], (1, HIDDEN_PAD)),
        wo=_pad_to(p["wo"], (HIDDEN_PAD, out_pad)).astype(jnp.bfloat16),
        bo=_pad_to(p["bo"], (1, out_pad)),
    )


def reference_forward(x, p):
    """Pure-JAX f32 reference of the PyTorch module forward (train-mode BN)."""
    h = x @ p["w1"] + p["b1"]
    h = jax.nn.softplus(h)
    m = jnp.mean(h, axis=0, keepdims=True)
    v = jnp.mean((h - m) ** 2, axis=0, keepdims=True)
    h = (h - m) / jnp.sqrt(v + BN_EPS) * p["gamma"] + p["beta"]
    h = jax.nn.softplus(h @ p["w2"] + p["b2"])
    return jnp.tanh(h @ p["wo"] + p["bo"])


if __name__ == "__main__":
    key = jax.random.PRNGKey(0)
    k_param, k_x = jax.random.split(key)

    batch, input_shape, output_shape = 128, 32, 16
    params = init_params(k_param, input_shape, output_shape)
    packed = pack_params(params)
    x = jax.random.normal(k_x, (batch, input_shape), jnp.float32)

    y = generator_forward(x, packed, output_shape)
    jax.block_until_ready(y)

    y_ref = reference_forward(x, params)
    assert y.shape == (batch, output_shape)
    # bf16 matmul operands (f32 accumulation) -> slightly looser tolerance than pure f32
    assert jnp.allclose(y, y_ref, atol=3e-2, rtol=3e-2), (
        "mismatch vs pure-JAX reference; max abs diff = "
        f"{float(jnp.max(jnp.abs(y - y_ref)))}")

    print("KERNEL_OK")
</pallas_src>

<mosaic_0001>
module attributes {stable_mosaic.version = 11 : i64} {
  func.func @generator_kernel(%arg0: memref<128x32xf32, #tpu.memory_space<vmem>>, %arg1: memref<32x512xbf16, #tpu.memory_space<vmem>>, %arg2: memref<1x512xf32, #tpu.memory_space<vmem>>, %arg3: memref<1x512xf32, #tpu.memory_space<vmem>>, %arg4: memref<1x512xf32, #tpu.memory_space<vmem>>, %arg5: memref<512x512xbf16, #tpu.memory_space<vmem>>, %arg6: memref<1x512xf32, #tpu.memory_space<vmem>>, %arg7: memref<512x128xbf16, #tpu.memory_space<vmem>>, %arg8: memref<1x128xf32, #tpu.memory_space<vmem>>, %arg9: memref<128x128xf32, #tpu.memory_space<vmem>>) attributes {dimension_semantics = [], scalar_prefetch = 0 : i64, scratch_operands = 0 : i64, tpu.core_type = #tpu.core_type<tc>} {
    %c0 = arith.constant 0 : index
    %c0_0 = arith.constant 0 : index
    %0 = vector.load %arg0[%c0, %c0_0] : memref<128x32xf32, #tpu.memory_space<vmem>>, vector<128x32xf32>
    %1 = arith.truncf %0 : vector<128x32xf32> to vector<128x32xbf16>
    %c0_1 = arith.constant 0 : index
    %c0_2 = arith.constant 0 : index
    %2 = vector.load %arg1[%c0_1, %c0_2] : memref<32x512xbf16, #tpu.memory_space<vmem>>, vector<32x512xbf16>
    %cst = arith.constant dense<0.000000e+00> : vector<128x512xf32>
    %3 = tpu.matmul %1, %2, %cst {dimension_numbers = #tpu.dot_dimension_numbers<[1], [0], [0], [1], [0, 0, 1, 1], [], []>} : vector<128x32xbf16>, vector<32x512xbf16>, vector<128x512xf32> -> vector<128x512xf32>
    %c0_3 = arith.constant 0 : index
    %c0_4 = arith.constant 0 : index
    %4 = vector.load %arg2[%c0_3, %c0_4] : memref<1x512xf32, #tpu.memory_space<vmem>>, vector<1x512xf32>
    %5 = vector.broadcast %4 : vector<1x512xf32> to vector<128x512xf32>
    %6 = arith.addf %3, %5 : vector<128x512xf32>
    %cst_5 = arith.constant 2.000000e+01 : f32
    %7 = vector.broadcast %cst_5 : f32 to vector<128x512xf32>
    %8 = arith.cmpf ogt, %6, %7 : vector<128x512xf32>
    %cst_6 = arith.constant 2.000000e+01 : f32
    %9 = vector.broadcast %cst_6 : f32 to vector<128x512xf32>
    %10 = arith.minimumf %6, %9 : vector<128x512xf32>
    %11 = math.exp %10 : vector<128x512xf32>
    %12 = math.log1p %11 : vector<128x512xf32>
    %13 = arith.select %8, %6, %12 : vector<128x512xi1>, vector<128x512xf32>
    %cst_7 = arith.constant dense<0.000000e+00> : vector<512xf32>
    %14 = vector.multi_reduction <add>, %13, %cst_7 [0] : vector<128x512xf32> to vector<512xf32>
    %15 = vector.shape_cast %14 : vector<512xf32> to vector<1x512xf32>
    %16 = arith.mulf %13, %13 : vector<128x512xf32>
    %cst_8 = arith.constant dense<0.000000e+00> : vector<512xf32>
    %17 = vector.multi_reduction <add>, %16, %cst_8 [0] : vector<128x512xf32> to vector<512xf32>
    %18 = vector.shape_cast %17 : vector<512xf32> to vector<1x512xf32>
    %cst_9 = arith.constant 7.812500e-03 : f32
    %19 = vector.broadcast %cst_9 : f32 to vector<1x512xf32>
    %20 = arith.mulf %15, %19 : vector<1x512xf32>
    %cst_10 = arith.constant 7.812500e-03 : f32
    %21 = vector.broadcast %cst_10 : f32 to vector<1x512xf32>
    %22 = arith.mulf %18, %21 : vector<1x512xf32>
    %23 = arith.mulf %20, %20 : vector<1x512xf32>
    %24 = arith.subf %22, %23 : vector<1x512xf32>
    %cst_11 = arith.constant 0.000000e+00 : f32
    %25 = vector.broadcast %cst_11 : f32 to vector<1x512xf32>
    %26 = arith.maximumf %24, %25 : vector<1x512xf32>
    %27 = vector.broadcast %20 : vector<1x512xf32> to vector<128x512xf32>
    %28 = arith.subf %13, %27 : vector<128x512xf32>
    %cst_12 = arith.constant 2.000000e-05 : f32
    %29 = vector.broadcast %cst_12 : f32 to vector<1x512xf32>
    %30 = arith.addf %26, %29 : vector<1x512xf32>
    %31 = math.rsqrt %30 : vector<1x512xf32>
    %32 = vector.broadcast %31 : vector<1x512xf32> to vector<128x512xf32>
    %33 = arith.mulf %28, %32 : vector<128x512xf32>
    %c0_13 = arith.constant 0 : index
    %c0_14 = arith.constant 0 : index
    %34 = vector.load %arg3[%c0_13, %c0_14] : memref<1x512xf32, #tpu.memory_space<vmem>>, vector<1x512xf32>
    %35 = vector.broadcast %34 : vector<1x512xf32> to vector<128x512xf32>
    %36 = arith.mulf %33, %35 : vector<128x512xf32>
    %c0_15 = arith.constant 0 : index
    %c0_16 = arith.constant 0 : index
    %37 = vector.load %arg4[%c0_15, %c0_16] : memref<1x512xf32, #tpu.memory_space<vmem>>, vector<1x512xf32>
    %38 = vector.broadcast %37 : vector<1x512xf32> to vector<128x512xf32>
    %39 = arith.addf %36, %38 : vector<128x512xf32>
    %40 = arith.truncf %39 : vector<128x512xf32> to vector<128x512xbf16>
    %c0_17 = arith.constant 0 : index
    %c0_18 = arith.constant 0 : index
    %41 = vector.load %arg5[%c0_17, %c0_18] : memref<512x512xbf16, #tpu.memory_space<vmem>>, vector<512x512xbf16>
    %cst_19 = arith.constant dense<0.000000e+00> : vector<128x512xf32>
    %42 = tpu.matmul %40, %41, %cst_19 {dimension_numbers = #tpu.dot_dimension_numbers<[1], [0], [0], [1], [0, 0, 1, 1], [], []>} : vector<128x512xbf16>, vector<512x512xbf16>, vector<128x512xf32> -> vector<128x512xf32>
    %c0_20 = arith.constant 0 : index
    %c0_21 = arith.constant 0 : index
    %43 = vector.load %arg6[%c0_20, %c0_21] : memref<1x512xf32, #tpu.memory_space<vmem>>, vector<1x512xf32>
    %44 = vector.broadcast %43 : vector<1x512xf32> to vector<128x512xf32>
    %45 = arith.addf %42, %44 : vector<128x512xf32>
    %cst_22 = arith.constant 2.000000e+01 : f32
    %46 = vector.broadcast %cst_22 : f32 to vector<128x512xf32>
    %47 = arith.cmpf ogt, %45, %46 : vector<128x512xf32>
    %cst_23 = arith.constant 2.000000e+01 : f32
    %48 = vector.broadcast %cst_23 : f32 to vector<128x512xf32>
    %49 = arith.minimumf %45, %48 : vector<128x512xf32>
    %50 = math.exp %49 : vector<128x512xf32>
    %51 = math.log1p %50 : vector<128x512xf32>
    %52 = arith.select %47, %45, %51 : vector<128x512xi1>, vector<128x512xf32>
    %53 = arith.truncf %52 : vector<128x512xf32> to vector<128x512xbf16>
    %c0_24 = arith.constant 0 : index
    %c0_25 = arith.constant 0 : index
    %54 = vector.load %arg7[%c0_24, %c0_25] : memref<512x128xbf16, #tpu.memory_space<vmem>>, vector<512x128xbf16>
    %cst_26 = arith.constant dense<0.000000e+00> : vector<128x128xf32>
    %55 = tpu.matmul %53, %54, %cst_26 {dimension_numbers = #tpu.dot_dimension_numbers<[1], [0], [0], [1], [0, 0, 1, 1], [], []>} : vector<128x512xbf16>, vector<512x128xbf16>, vector<128x128xf32> -> vector<128x128xf32>
    %c0_27 = arith.constant 0 : index
    %c0_28 = arith.constant 0 : index
    %56 = vector.load %arg8[%c0_27, %c0_28] : memref<1x128xf32, #tpu.memory_space<vmem>>, vector<1x128xf32>
    %57 = vector.broadcast %56 : vector<1x128xf32> to vector<128x128xf32>
    %58 = arith.addf %55, %57 : vector<128x128xf32>
    %59 = math.tanh %58 : vector<128x128xf32>
    %c0_29 = arith.constant 0 : index
    %c0_30 = arith.constant 0 : index
    %60 = vector.load %arg9[%c0_29, %c0_30] : memref<128x128xf32, #tpu.memory_space<vmem>>, vector<128x128xf32>
    tpu.vector_store %arg9[%c0_29, %c0_30], %59 {strides = array<i32>} : memref<128x128xf32, #tpu.memory_space<vmem>>, vector<128x128xf32>,
    return
  }
}

</mosaic_0001>

<bundles_post_ra>
// kernel: tpu_custom_call.1
= control target key start
LH: loop header
LB: loop body
LE: loop exit
PB: predicated region body
PF: predicated region fallthrough
CT: control target
= control target key end

     0   :  { %14 = vsyncpa [#allocation3], 0  ;;  %s10006_s0 = inlined_call_operand.vmem [shape: f32[128,32], index: 0, kind: input, shape index: {}]   ;;  %s10007_s1 = inlined_call_operand.vmem [shape: bf16[32,512], index: 1, kind: input, shape index: {}]   ;;  %s10008_s2 = inlined_call_operand.vmem [shape: f32[1,512], index: 2, kind: input, shape index: {}]   ;;  %s10009_s3 = inlined_call_operand.vmem [shape: f32[1,512], index: 3, kind: input, shape index: {}]   ;;  %s10010_s4 = inlined_call_operand.vmem [shape: f32[1,512], index: 4, kind: input, shape index: {}]   ;;  %s10011_s5 = inlined_call_operand.hbm [shape: bf16[512,512], index: 5, kind: input, shape index: {}]   ;;  %s10012_s6 = inlined_call_operand.vmem [shape: f32[1,512], index: 6, kind: input, shape index: {}]   ;;  %s10013_s7 = inlined_call_operand.hbm [shape: bf16[512,128], index: 7, kind: input, shape index: {}]   ;;  %s10014_s8 = inlined_call_operand.vmem [shape: f32[1,128], index: 8, kind: input, shape index: {}]   ;;  %s10015_s9 = inlined_call_operand.hbm [shape: f32[128,128], index: 9, kind: output, shape index: {}]  }
   0x1   :  { %15 = vsyncpa [#allocation6], 0 }
   0x2   :  { %16 = vsyncpa [#allocation4], 0  ;;  %s5883_s30 = smov [#allocation2]   ;;  %s5811_s13 = scalar_lea.hbm %s10011_s5, 16384 }
   0x3   :  { %s32_s10 = sshll.u32 %s5883_s30, 4  ;;  %p5812_p0 = scmp.ne.s32.totalorder %s10011_s5, %s5811_s13  ;;  %s33_s10 = int_to_ptr.vmem [resolvable:$true] %s32_s10 }
   0x4   :  { %p5815_p1 = scmp.lt.u32.totalorder %s5811_s13, %s10011_s5 }
   0x6   :  { %p5817_p2 = pnand %p5815_p1, %p5812_p0 }
   0x8   :  { %5820 = shalt.err (!%p5817_p2)
}
   0x9   :  { %s5821_s18 = scalar_lea.vmem %s33_s10, 16384  ;;  %p5826_p4 = scmp.lt.s32.totalorder %s33_s10, %s33_s10 }
   0xa   :  { %p5822_p3 = scmp.ne.s32.totalorder %s33_s10, %s5821_s18  ;;  %p5827_p5 = scmp.lt.s32.totalorder %s5821_s18, %s5821_s18 }
   0xc   :  { %p5828_p6 = por %p5827_p5, %p5826_p4 }
   0xe   :  { %p5829_p7 = pnand %p5828_p6, %p5822_p3 }
  0x10   :  { %5832 = shalt.err (!%p5829_p7)
}
  0x11   :  { %s5884_s19 = smov 256   ;;  %s5885_s20 = smov 16  }
  0x12   :  { %38 = dma.hbm_to_vmem [thread:$0]  %s10011_s5, 16384, %s33_s10, [#allocation3], %s5884_s19, %s5884_s19, %s5885_s20  }
  0x13   :  { %s5886_s23 = smov [#allocation5]   ;;  %s5833_s27 = scalar_lea.hbm %s10013_s7, 4096 }
  0x14   :  { %s46_s24 = sshll.u32 %s5886_s23, 4  ;;  %p5834_p8 = scmp.ne.s32.totalorder %s10013_s7, %s5833_s27  ;;  %s47_s24 = int_to_ptr.vmem [resolvable:$true] %s46_s24 }
  0x15   :  { %p5837_p9 = scmp.lt.u32.totalorder %s5833_s27, %s10013_s7 }
  0x17   :  { %p5839_p10 = pnand %p5837_p9, %p5834_p8 }
  0x19   :  { %5842 = shalt.err (!%p5839_p10)
}
  0x1a   :  { %s5843_s12 = scalar_lea.vmem %s47_s24, 4096  ;;  %p5848_p12 = scmp.lt.s32.totalorder %s47_s24, %s47_s24 }
  0x1b   :  { %p5844_p11 = scmp.ne.s32.totalorder %s47_s24, %s5843_s12  ;;  %p5849_p13 = scmp.lt.s32.totalorder %s5843_s12, %s5843_s12 }
  0x1d   :  { %p5850_p0 = por %p5849_p13, %p5848_p12 }
  0x1f   :  { %p5851_p1 = pnand %p5850_p0, %p5844_p11 }
  0x21   :  { %5854 = shalt.err (!%p5851_p1)
}
  0x22   :  { %s5887_s5 = smov 64   ;;  %s5888_s10 = smov 4  }
  0x23   :  { %52 = dma.hbm_to_vmem [thread:$0]  %s10013_s7, 4096, %s47_s24, [#allocation6], %s5887_s5, %s5887_s5, %s5888_s10  }
  0x24   :  { %5877 = dma.done.wait [#allocation3], 16384  }
  0x25   :  { %5878 = vsyncadd [#allocation3], 4294950912 }
  0x26   :  { %5879 = dma.done.wait [#allocation6], 4096  }
  0x27   :  { %5880 = vsyncadd [#allocation6], 4294963200  ;;  %v5889_v0 = vmov 0   ;;  %v5023_v1 = vld [vmem:[%s10007_s1 + $0x4] ss:$16 sps:$4 sm:$0xff]   ;;  %v63_v10 = vld [vmem:[%s10006_s0 + $0x8] sm:$0xff]  ;;  %v96_v33 = vlaneseq }
  0x28   :  { %213 = vmatprep.mubr.bf16.mxu0 %v5889_v0  ;;  %326 = vmatprep.mubr.bf16.mxu1 %v5889_v0  ;;  %v5025_v2 = vld [vmem:[%s10007_s1 + $0xc] ss:$16 sps:$4 sm:$0xff]   ;;  %v5027_v3 = vld [vmem:[%s10007_s1] ss:$16 sps:$4 sm:$0xff]   ;;  %v5028_v4 = vld [vmem:[%s10007_s1 + $0x8] ss:$16 sps:$4 sm:$0xff]  }
  0x29   :  { %181 = vmatprep.subr.bf16.mxu0 %v5023_v1  ;;  %294 = vmatprep.subr.bf16.mxu1 %v5025_v2  ;;  %v5029_v5 = vld [vmem:[%s10007_s1 + $0x24] ss:$16 sps:$4 sm:$0xff]   ;;  %v5031_v6 = vld [vmem:[%s10007_s1 + $0x2c] ss:$16 sps:$4 sm:$0xff]   ;;  %v5033_v7 = vld [vmem:[%s10007_s1 + $0x20] ss:$16 sps:$4 sm:$0xff]  }
  0x2a   :  { %182 = vmatpush1.bf16.msra.mxu0 %v5027_v3  ;;  %295 = vmatpush1.bf16.msra.mxu1 %v5028_v4  ;;  %v5034_v8 = vld [vmem:[%s10007_s1 + $0x28] ss:$16 sps:$4 sm:$0xff]   ;;  %v62_v9 = vld [vmem:[%s10006_s0] sm:$0xff]  ;;  %vm156_vm0 = vcmask 261120   ;;  %v64_v12 = vld [vmem:[%s10006_s0 + $0x10] sm:$0xff]  ;;  %v6071_v34 = vshrl.u32 %v96_v33, 7 }
  0x2b   :  { %183 = vmatprep.subr.bf16.mxu0 %v5029_v5  ;;  %296 = vmatprep.subr.bf16.mxu1 %v5031_v6  ;;  %v78_v11 = vpack.c.bf16 %v63_v10, %v62_v9  ;;  %v65_v13 = vld [vmem:[%s10006_s0 + $0x18] sm:$0xff]  ;;  %v66_v15 = vld [vmem:[%s10006_s0 + $0x20] sm:$0xff]  ;;  %v67_v16 = vld [vmem:[%s10006_s0 + $0x28] sm:$0xff] }
  0x2c   :  { %v79_v14 = vpack.c.bf16 %v65_v13, %v64_v12  ;;  %v80_v17 = vpack.c.bf16 %v67_v16, %v66_v15  ;;  %v68_v18 = vld [vmem:[%s10006_s0 + $0x30] sm:$0xff]  ;;  %v69_v19 = vld [vmem:[%s10006_s0 + $0x38] sm:$0xff]  ;;  %v70_v21 = vld [vmem:[%s10006_s0 + $0x40] sm:$0xff]  ;;  %v6074_v35 = vsub.s32 0, %v6071_v34  ;;  %v6082_v37 = vsub.s32 1, %v6071_v34 }
  0x2d   :  { %v81_v20 = vpack.c.bf16 %v69_v19, %v68_v18  ;;  %v71_v22 = vld [vmem:[%s10006_s0 + $0x48] sm:$0xff]  ;;  %v72_v24 = vld [vmem:[%s10006_s0 + $0x50] sm:$0xff]  ;;  %v73_v25 = vld [vmem:[%s10006_s0 + $0x58] sm:$0xff] }
  0x2e   :  { %184 = vmatpush1.bf16.msra.mxu0 %v5033_v7  ;;  %297 = vmatpush1.bf16.msra.mxu1 %v5034_v8  ;;  %v82_v23 = vpack.c.bf16 %v71_v22, %v70_v21  ;;  %v83_v26 = vpack.c.bf16 %v73_v25, %v72_v24  ;;  %v74_v27 = vld [vmem:[%s10006_s0 + $0x60] sm:$0xff]  ;;  %v75_v28 = vld [vmem:[%s10006_s0 + $0x68] sm:$0xff]  ;;  %v76_v30 = vld [vmem:[%s10006_s0 + $0x70] sm:$0xff]  ;;  %10204 = vst [vmem:[#allocation11_spill] sm:$0xff] %v6074_v35 }
  0x2f   :  { %v84_v29 = vpack.c.bf16 %v75_v28, %v74_v27  ;;  %v77_v31 = vld [vmem:[%s10006_s0 + $0x78] sm:$0xff]  ;;  %v6079_v36 = vld [vmem:[%s10008_s2] sm:$0xf]  ;;  %10205 = vst [vmem:[#allocation12_spill] sm:$0xff] %v6082_v37 }
  0x30   :  { %v85_v32 = vpack.c.bf16 %v77_v31, %v76_v30  ;;  %v6086_v38 = vrot.slane %v6079_v36, %v6074_v35  ;;  %v6090_v39 = vrot.slane %v6079_v36, %v6082_v37 }
  0x31   :  { %4580 = vmatmul.mubr.msk.bf16.vlgmr.msra.gmra.mrb[0].mxu0 %vm156_vm0, %v78_v11  ;;  %4588 = vmatmul.mubr.msk.bf16.vlgmr.msra.gmra.mrb[0].mxu1 %vm156_vm0, %v78_v11 }
  0x32   :  { %223 = vmatprep.mubr.bf16.mxu0 %v5889_v0  ;;  %336 = vmatprep.mubr.bf16.mxu1 %v5889_v0 }
  0x39   :  { %4581 = vmatmul.mubr.msk.bf16.gmra.mrb[4].mxu0 %vm156_vm0, %v79_v14  ;;  %4589 = vmatmul.mubr.msk.bf16.gmra.mrb[4].mxu1 %vm156_vm0, %v79_v14 }
  0x3a   :  { %233 = vmatprep.mubr.bf16.mxu0 %v5889_v0  ;;  %346 = vmatprep.mubr.bf16.mxu1 %v5889_v0 }
  0x41   :  { %4582 = vmatmul.mubr.msk.bf16.gmra.mrb[8].mxu0 %vm156_vm0, %v80_v17  ;;  %4590 = vmatmul.mubr.msk.bf16.gmra.mrb[8].mxu1 %vm156_vm0, %v80_v17 }
  0x42   :  { %243 = vmatprep.mubr.bf16.mxu0 %v5889_v0  ;;  %356 = vmatprep.mubr.bf16.mxu1 %v5889_v0 }
  0x49   :  { %4583 = vmatmul.mubr.msk.bf16.gmra.mrb[12].mxu0 %vm156_vm0, %v81_v20  ;;  %4591 = vmatmul.mubr.msk.bf16.gmra.mrb[12].mxu1 %vm156_vm0, %v81_v20 }
  0x4a   :  { %253 = vmatprep.mubr.bf16.mxu0 %v5889_v0  ;;  %366 = vmatprep.mubr.bf16.mxu1 %v5889_v0 }
  0x51   :  { %4584 = vmatmul.mubr.msk.bf16.gmra.mrb[16].mxu0 %vm156_vm0, %v82_v23  ;;  %4592 = vmatmul.mubr.msk.bf16.gmra.mrb[16].mxu1 %vm156_vm0, %v82_v23 }
  0x52   :  { %263 = vmatprep.mubr.bf16.mxu0 %v5889_v0  ;;  %376 = vmatprep.mubr.bf16.mxu1 %v5889_v0 }
  0x59   :  { %4585 = vmatmul.mubr.msk.bf16.gmra.mrb[20].mxu0 %vm156_vm0, %v83_v26  ;;  %4593 = vmatmul.mubr.msk.bf16.gmra.mrb[20].mxu1 %vm156_vm0, %v83_v26 }
  0x5a   :  { %273 = vmatprep.mubr.bf16.mxu0 %v5889_v0  ;;  %386 = vmatprep.mubr.bf16.mxu1 %v5889_v0 }
  0x61   :  { %4586 = vmatmul.mubr.msk.bf16.gmra.mrb[24].mxu0 %vm156_vm0, %v84_v29  ;;  %4594 = vmatmul.mubr.msk.bf16.gmra.mrb[24].mxu1 %vm156_vm0, %v84_v29 }
  0x62   :  { %283 = vmatprep.mubr.bf16.mxu0 %v5889_v0  ;;  %396 = vmatprep.mubr.bf16.mxu1 %v5889_v0 }
  0x69   :  { %4587 = vmatmul.mubr.msk.bf16.gmra.mrb[28].mxu0 %vm156_vm0, %v85_v32  ;;  %4595 = vmatmul.mubr.msk.bf16.gmra.mrb[28].mxu1 %vm156_vm0, %v85_v32 }
 0x104   :  { %v215_v40 = vpop.f32.mrb[0].mxu0  ;;  %v6092_v41 = vpop.f32.mrb[0].mxu1 }
 0x105   :  { %v6095_v42 = vadd.f32 %v215_v40, %v6086_v38  ;;  %v217_v43 = vpop.f32.mrb[1].mxu0  ;;  %v6097_v44 = vpop.f32.mrb[1].mxu1 }
 0x106   :  { %v6100_v45 = vadd.f32 %v217_v43, %v6090_v39  ;;  %v219_v46 = vpop.f32.mrb[2].mxu0  ;;  %v6102_v47 = vpop.f32.mrb[2].mxu1 }
 0x107   :  { %v471_v48 = vmin.f32 %v6095_v42, 20.0  ;;  %v6106_v49 = vadd.f32 %v219_v46, %v6086_v38  ;;  %v221_v50 = vpop.f32.mrb[3].mxu0  ;;  %v6108_v51 = vpop.f32.mrb[3].mxu1  ;;  %vm407_vm1 = vcmp.gt.f32.partialorder %v6095_v42, 20.0 }
 0x108   :  { %v472_v52 = vmin.f32 %v6100_v45, 20.0  ;;  %v6112_v53 = vadd.f32 %v221_v50, %v6090_v39  ;;  %vm408_vm2 = vcmp.gt.f32.partialorder %v6100_v45, 20.0 }
 0x109   :  { %v535_v54 = vmul.f32 1.442695, %v471_v48  ;;  %v475_v55 = vmin.f32 %v6106_v49, 20.0  ;;  %vm411_vm3 = vcmp.gt.f32.partialorder %v6106_v49, 20.0 }
 0x10a   :  { %v537_v56 = vmul.f32 1.442695, %v472_v52  ;;  %v476_v57 = vmin.f32 %v6112_v53, 20.0  ;;  %vm412_vm4 = vcmp.gt.f32.partialorder %v6112_v53, 20.0 }
 0x10b   :  { %5259 = vpow2.f32 %v535_v54  ;;  %v543_v58 = vmul.f32 1.442695, %v475_v55  ;;  %v6167_v54 = vsub.s32 2, %v6071_v34 }
 0x10c   :  { %5261 = vpow2.f32 %v537_v56  ;;  %v545_v59 = vmul.f32 1.442695, %v476_v57  ;;  %v225_v60 = vpop.f32.mrb[4].mxu0  ;;  %v6116_v61 = vpop.f32.mrb[4].mxu1 }
 0x10d   :  { %5263 = vpow2.f32 %v543_v58  ;;  %v227_v62 = vpop.f32.mrb[5].mxu0  ;;  %v6118_v63 = vpop.f32.mrb[5].mxu1  ;;  %v6133_v9 = vadd.f32 %v225_v60, %v6086_v38  ;;  %10207 = vst [vmem:[#allocation14_spill] sm:$0xff] %v6167_v54 }
 0x10e   :  { %5265 = vpow2.f32 %v545_v59  ;;  %v6121_v0 = vadd.f32 %v227_v62, %v6090_v39  ;;  %v229_v1 = vpop.f32.mrb[6].mxu0  ;;  %v6123_v2 = vpop.f32.mrb[6].mxu1 }
 0x10f   :  { %v231_v3 = vpop.f32.mrb[7].mxu0  ;;  %v6125_v4 = vpop.f32.mrb[7].mxu1  ;;  %v479_v25 = vmin.f32 %v6133_v9, 20.0  ;;  %vm415_vm15 = vcmp.gt.f32.partialorder %v6133_v9, 20.0 }
 0x110   :  { %v480_v5 = vmin.f32 %v6121_v0, 20.0  ;;  %v6129_v6 = vadd.f32 %v231_v3, %v6090_v39  ;;  %vm416_vm10 = vcmp.gt.f32.partialorder %v6121_v0, 20.0 }
 0x111   :  { %v551_v30 = vmul.f32 1.442695, %v479_v25 }
 0x112   :  { %v553_v7 = vmul.f32 1.442695, %v480_v5  ;;  %v484_v8 = vmin.f32 %v6129_v6, 20.0  ;;  %vm420_vm12 = vcmp.gt.f32.partialorder %v6129_v6, 20.0 }
 0x114   :  { %5267 = vpow2.f32 %v553_v7  ;;  %v561_v10 = vmul.f32 1.442695, %v484_v8  ;;  %v6135_v11 = vpop.f32.mrb[8].mxu0  ;;  %v6137_v12 = vpop.f32.mrb[8].mxu1  ;;  %v6185_v8 = vadd.f32 %v229_v1, %v6086_v38 }
 0x115   :  { %v5260_v13 = vpop.eup %5259  ;;  %v6139_v14 = vpop.f32.mrb[9].mxu0 }
 0x116   :  { %v6141_v15 = vpop.f32.mrb[9].mxu1  ;;  %v5262_v16 = vpop.eup %5261  ;;  %v663_v17 = vadd.f32 1.0, %v5260_v13  ;;  %5269 = vpow2.f32 %v561_v10  ;;  %v666_v28 = vmul.f32 -0.5, %v5260_v13  ;;  %v669_v48 = vand.u32 2147483647, %v5260_v13 }
 0x117   :  { %v6143_v18 = vpop.f32.mrb[10].mxu0  ;;  %v6145_v19 = vpop.f32.mrb[10].mxu1  ;;  %v672_v21 = vadd.f32 1.0, %v5262_v16  ;;  %v675_v29 = vmul.f32 -0.5, %v5262_v16  ;;  %v678_v50 = vand.u32 2147483647, %v5262_v16 }
 0x118   :  { %v5264_v20 = vpop.eup %5263  ;;  %v6147_v22 = vpop.f32.mrb[11].mxu0  ;;  %5271 = vlog2.f32 %v663_v17  ;;  %v667_v55 = vadd.f32 1.0, %v666_v28  ;;  %vm6187_vm5 = vcmp.lt.f32.partialorder %v669_v48, 0.0004427343  ;;  %v483_v48 = vmin.f32 %v6185_v8, 20.0 }
 0x119   :  { %v6149_v23 = vpop.eup %5265  ;;  %v699_v24 = vadd.f32 1.0, %v5264_v20  ;;  %v6152_v26 = vpop.f32.mrb[11].mxu1  ;;  %5273 = vlog2.f32 %v672_v21  ;;  %v702_v33 = vmul.f32 -0.5, %v5264_v20  ;;  %v676_v56 = vadd.f32 1.0, %v675_v29 }
 0x11a   :  { %v708_v27 = vadd.f32 1.0, %v6149_v23  ;;  %v711_v52 = vmul.f32 -0.5, %v6149_v23  ;;  %v705_v62 = vand.u32 2147483647, %v5264_v20  ;;  %v668_v29 = vmul.f32 %v5260_v13, %v667_v55 }
 0x11b   :  { %5275 = vlog2.f32 %v699_v24  ;;  %v703_v7 = vadd.f32 1.0, %v702_v33  ;;  %v714_v24 = vand.u32 2147483647, %v6149_v23  ;;  %vm6193_vm6 = vcmp.lt.f32.partialorder %v678_v50, 0.0004427343 }
 0x11c   :  { %5277 = vlog2.f32 %v708_v27  ;;  %v6155_v31 = vpop.f32.mrb[12].mxu0  ;;  %v6157_v32 = vpop.f32.mrb[12].mxu1  ;;  %v712_v21 = vadd.f32 1.0, %v711_v52  ;;  %vm6197_vm7 = vcmp.lt.f32.partialorder %v705_v62, 0.0004427343  ;;  %v6206_v13 = vadd.f32 %v6139_v14, %v6090_v39 }
 0x11d   :  { %v6159_v40 = vpop.f32.mrb[13].mxu0  ;;  %v6161_v43 = vpop.f32.mrb[13].mxu1  ;;  %5279 = vpow2.f32 %v551_v30  ;;  %v677_v30 = vmul.f32 %v5262_v16, %v676_v56  ;;  %vm6220_vm8 = vcmp.lt.f32.partialorder %v714_v24, 0.0004427343 }
 0x11e   :  { %10206 = vst [vmem:[#allocation13_spill] sm:$0xff] %v6161_v43  ;;  %v6163_v46 = vpop.eup %5267  ;;  %v6171_v58 = vpop.f32.mrb[14].mxu0  ;;  %v713_v17 = vmul.f32 %v6149_v23, %v712_v21  ;;  %v488_v33 = vmin.f32 %v6206_v13, 20.0  ;;  %vm424_vm14 = vcmp.gt.f32.partialorder %v6206_v13, 20.0 }
 0x11f   :  { %v744_v57 = vadd.f32 1.0, %v6163_v46  ;;  %v6173_v59 = vpop.f32.mrb[14].mxu1  ;;  %v6179_v3 = vpop.f32.mrb[15].mxu0  ;;  %v747_v52 = vmul.f32 -0.5, %v6163_v46 }
 0x120   :  { %10208 = vst [vmem:[#allocation15_spill] sm:$0xff] %v6173_v59  ;;  %v6175_v60 = vpop.eup %5269  ;;  %v6181_v5 = vpop.f32.mrb[15].mxu1 }
 0x121   :  { %10209 = vst [vmem:[#allocation16_spill] sm:$0xff] %v6181_v5  ;;  %5281 = vlog2.f32 %v744_v57  ;;  %v780_v25 = vadd.f32 1.0, %v6175_v60  ;;  %v748_v24 = vadd.f32 1.0, %v747_v52  ;;  %v6266_v52 = vsub.s32 3, %v6071_v34 }
 0x122   :  { %v5272_v10 = vpop.eup %5271 }
 0x123   :  { %v5274_v27 = vpop.eup %5273  ;;  %v665_v28 = vmul.f32 0.6931472, %v5272_v10  ;;  %5283 = vlog2.f32 %v780_v25  ;;  %v704_v10 = vmul.f32 %v5264_v20, %v703_v7  ;;  %v750_v25 = vand.u32 2147483647, %v6163_v46  ;;  %10223 = vst [vmem:[#allocation22_spill] sm:$0xff] %v6266_v52 }
 0x124   :  { %v674_v57 = vmul.f32 0.6931472, %v5274_v27  ;;  %v6208_v16 = vpop.f32.mrb[16].mxu0  ;;  %v6210_v50 = vpop.f32.mrb[16].mxu1  ;;  %v6276_v20 = vadd.f32 %v6147_v22, %v6090_v39  ;;  %v6287_v22 = vrot.slane %v6079_v36, %v6167_v54 }
 0x125   :  { %v5276_v1 = vpop.eup %5275  ;;  %v671_v35 = vsel %vm6187_vm5, %v668_v29, %v665_v28  ;;  %10216 = vst [vmem:[#allocation17_spill] sm:$0xff] %v6210_v50  ;;  %v6224_v14 = vpop.f32.mrb[17].mxu0  ;;  %vm751_vm9 = vcmp.lt.f32.partialorder %v750_v25, 0.0004427343  ;;  %v559_v25 = vmul.f32 1.442695, %v483_v48 }
 0x126   :  { %v701_v37 = vmul.f32 0.6931472, %v5276_v1  ;;  %v5278_v55 = vpop.eup %5277  ;;  %v6215_v56 = vsel %vm407_vm1, %v6095_v42, %v671_v35  ;;  %v680_v62 = vsel %vm6193_vm6, %v677_v30, %v674_v57  ;;  %v6234_v27 = vpop.f32.mrb[18].mxu0  ;;  %v6350_v54 = vadd.f32 %v6102_v47, %v6287_v22 }
 0x127   :  { %10217 = vst [vmem:[#allocation18_spill] sm:$0xff] %v6215_v56  ;;  %v6229_v7 = vsel %vm408_vm2, %v6100_v45, %v680_v62  ;;  %v710_v42 = vmul.f32 0.6931472, %v5278_v55  ;;  %v1387_v23 = vmul.f32 %v6215_v56, %v6215_v56  ;;  %v783_v45 = vmul.f32 -0.5, %v6175_v60  ;;  %v6244_v28 = vpop.f32.mrb[19].mxu0  ;;  %v6255_v1 = vpop.eup %5279 }
 0x128   :  { %10220 = vst [vmem:[#allocation19_spill] sm:$0xff] %v6229_v7  ;;  %v707_v35 = vsel %vm6197_vm7, %v704_v10, %v701_v37  ;;  %vm428_vm1 = vcmp.gt.f32.partialorder %v6276_v20, 20.0 }
 0x129   :  { %v6241_v21 = vsel %vm411_vm3, %v6106_v49, %v707_v35  ;;  %v716_v30 = vsel %vm6220_vm8, %v713_v17, %v710_v42  ;;  %v1388_v49 = vmul.f32 %v6229_v7, %v6229_v7  ;;  %v749_v35 = vmul.f32 %v6163_v46, %v748_v24 }
 0x12a   :  { %10221 = vst [vmem:[#allocation20_spill] sm:$0xff] %v6241_v21  ;;  %v6248_v37 = vadd.f32 %v6241_v21, %v6215_v56  ;;  %v1391_v29 = vmul.f32 %v6241_v21, %v6241_v21  ;;  %v6262_v57 = vsel %vm412_vm4, %v6112_v53, %v716_v30  ;;  %v784_v42 = vadd.f32 1.0, %v783_v45  ;;  %v6282_v21 = vpop.f32.mrb[17].mxu1 }
 0x12b   :  { %10222 = vst [vmem:[#allocation21_spill] sm:$0xff] %v6262_v57  ;;  %v5282_v10 = vpop.eup %5281  ;;  %v1324_v62 = vadd.f32 %v6262_v57, %v6229_v7  ;;  %v1392_v17 = vmul.f32 %v6262_v57, %v6262_v57  ;;  %v569_v30 = vmul.f32 1.442695, %v488_v33  ;;  %10224 = vst [vmem:[#allocation23_spill] sm:$0xff] %v6282_v21  ;;  %v492_v45 = vmin.f32 %v6276_v20, 20.0 }
 0x12c   :  { %v6268_v55 = vadd.f32 %v1391_v29, %v1387_v23  ;;  %v746_v53 = vmul.f32 0.6931472, %v5282_v10  ;;  %v786_v23 = vand.u32 2147483647, %v6175_v60  ;;  %v6280_v29 = vpop.f32.mrb[20].mxu0  ;;  %v6297_v33 = vrot.slane %v6079_v36, %v6266_v52 }
 0x12d   :  { %v1472_v34 = vadd.f32 %v1392_v17, %v1388_v49  ;;  %v5284_v7 = vpop.eup %5283  ;;  %5285 = vpow2.f32 %v569_v30  ;;  %v6289_v46 = vpop.f32.mrb[21].mxu0  ;;  %v6310_v36 = vadd.f32 %v6092_v41, %v6287_v22  ;;  %vm419_vm4 = vcmp.gt.f32.partialorder %v6185_v8, 20.0 }
 0x12e   :  { %v752_v57 = vsel %vm751_vm9, %v749_v35, %v746_v53  ;;  %10225 = vst [vmem:[#allocation24_spill] sm:$0xff] %v6289_v46  ;;  %v6299_v49 = vpop.f32.mrb[22].mxu0  ;;  %v782_v53 = vmul.f32 0.6931472, %v5284_v7  ;;  %v785_v35 = vmul.f32 %v6175_v60, %v784_v42  ;;  %vm787_vm11 = vcmp.lt.f32.partialorder %v786_v23, 0.0004427343 }
 0x12f   :  { %v6292_v24 = vsel %vm416_vm10, %v6121_v0, %v752_v57  ;;  %10227 = vst [vmem:[#allocation26_spill] sm:$0xff] %v6299_v49  ;;  %v6305_v30 = vpop.f32.mrb[23].mxu0  ;;  %v577_v7 = vmul.f32 1.442695, %v492_v45  ;;  %v6319_v60 = vpop.f32.mrb[18].mxu1  ;;  %5287 = vpow2.f32 %v559_v25  ;;  %v6328_v41 = vadd.f32 %v6097_v44, %v6297_v33 }
 0x130   :  { %10226 = vst [vmem:[#allocation25_spill] sm:$0xff] %v6292_v24  ;;  %v1325_v10 = vadd.f32 %v1324_v62, %v6292_v24  ;;  %v1396_v17 = vmul.f32 %v6292_v24, %v6292_v24  ;;  %10228 = vst [vmem:[#allocation27_spill] sm:$0xff] %v6305_v30  ;;  %v788_v57 = vsel %vm787_vm11, %v785_v35, %v782_v53  ;;  %v735_v23 = vadd.f32 1.0, %v6255_v1 }
 0x131   :  { %v6313_v48 = vsel %vm420_vm12, %v6129_v6, %v788_v57  ;;  %v6317_v62 = vadd.f32 %v6135_v11, %v6086_v38  ;;  %10230 = vst [vmem:[#allocation29_spill] sm:$0xff] %v6319_v60  ;;  %v6330_v6 = vpop.f32.mrb[19].mxu1  ;;  %5289 = vpow2.f32 %v577_v7  ;;  %v473_v45 = vmin.f32 %v6310_v36, 20.0 }
 0x132   :  { %v1473_v0 = vadd.f32 %v1472_v34, %v1396_v17  ;;  %10229 = vst [vmem:[#allocation28_spill] sm:$0xff] %v6313_v48  ;;  %v6322_v42 = vadd.f32 %v1325_v10, %v6313_v48  ;;  %v1400_v34 = vmul.f32 %v6313_v48, %v6313_v48  ;;  %10231 = vst [vmem:[#allocation30_spill] sm:$0xff] %v6330_v6  ;;  %v474_v53 = vmin.f32 %v6328_v41, 20.0  ;;  %v6340_v48 = vpop.f32.mrb[20].mxu1 }
 0x133   :  { %v487_v25 = vmin.f32 %v6317_v62, 20.0  ;;  %5291 = vlog2.f32 %v735_v23  ;;  %v539_v44 = vmul.f32 1.442695, %v473_v45  ;;  %10233 = vst [vmem:[#allocation32_spill] sm:$0xff] %v6340_v48  ;;  %v6355_v45 = vadd.f32 %v6143_v18, %v6086_v38 }
 0x134   :  { %v6333_v11 = vadd.f32 %v1473_v0, %v1400_v34  ;;  %v6337_v10 = vpop.f32.mrb[24].mxu0  ;;  %v541_v24 = vmul.f32 1.442695, %v474_v53  ;;  %v6360_v53 = vadd.f32 %v6108_v51, %v6297_v33  ;;  %v741_v48 = vand.u32 2147483647, %v6255_v1 }
 0x135   :  { %10232 = vst [vmem:[#allocation31_spill] sm:$0xff] %v6337_v10  ;;  %v567_v57 = vmul.f32 1.442695, %v487_v25  ;;  %v6344_v34 = vpop.f32.mrb[25].mxu0  ;;  %v491_v10 = vmin.f32 %v6355_v45, 20.0  ;;  %vm409_vm5 = vcmp.gt.f32.partialorder %v6310_v36, 20.0 }
 0x136   :  { %10234 = vst [vmem:[#allocation33_spill] sm:$0xff] %v6344_v34  ;;  %v6365_v47 = vpop.f32.mrb[26].mxu0  ;;  %v477_v34 = vmin.f32 %v6350_v54, 20.0  ;;  %v478_v51 = vmin.f32 %v6360_v53, 20.0  ;;  %vm6395_vm0 = vcmp.lt.f32.partialorder %v741_v48, 0.0004427343 }
 0x137   :  { %v5286_v17 = vpop.eup %5285  ;;  %10236 = vst [vmem:[#allocation35_spill] sm:$0xff] %v6365_v47  ;;  %vm410_vm6 = vcmp.gt.f32.partialorder %v6328_v41, 20.0  ;;  %vm423_vm8 = vcmp.gt.f32.partialorder %v6317_v62, 20.0  ;;  %vm413_vm9 = vcmp.gt.f32.partialorder %v6350_v54, 20.0  ;;  %vm414_vm11 = vcmp.gt.f32.partialorder %v6360_v53, 20.0 }
 0x138   :  { %v816_v35 = vadd.f32 1.0, %v5286_v17  ;;  %v819_v7 = vmul.f32 -0.5, %v5286_v17 }
 0x139   :  { %v6342_v0 = vpop.eup %5287 }
 0x13a   :  { %5293 = vlog2.f32 %v816_v35  ;;  %v771_v23 = vadd.f32 1.0, %v6342_v0  ;;  %v738_v35 = vmul.f32 -0.5, %v6255_v1 }
 0x13b   :  { %5295 = vpow2.f32 %v539_v44  ;;  %v6346_v56 = vpop.eup %5289  ;;  %v820_v44 = vadd.f32 1.0, %v819_v7 }
 0x13c   :  { %5297 = vpow2.f32 %v567_v57  ;;  %v852_v25 = vadd.f32 1.0, %v6346_v56  ;;  %v822_v57 = vand.u32 2147483647, %v5286_v17  ;;  %v739_v6 = vadd.f32 1.0, %v738_v35 }
 0x13d   :  { %5299 = vpow2.f32 %v541_v24  ;;  %v6363_v24 = vpop.f32.mrb[21].mxu1  ;;  %v5292_v52 = vpop.eup %5291  ;;  %v821_v7 = vmul.f32 %v5286_v17, %v820_v44  ;;  %v575_v44 = vmul.f32 1.442695, %v491_v10  ;;  %v858_v10 = vand.u32 2147483647, %v6346_v56 }
 0x13e   :  { %10235 = vst [vmem:[#allocation34_spill] sm:$0xff] %v6363_v24  ;;  %5301 = vlog2.f32 %v852_v25  ;;  %v855_v24 = vmul.f32 -0.5, %v6346_v56  ;;  %v774_v25 = vmul.f32 -0.5, %v6342_v0  ;;  %vm823_vm13 = vcmp.lt.f32.partialorder %v822_v57, 0.0004427343  ;;  %v6380_v5 = vpop.f32.mrb[22].mxu1 }
 0x13f   :  { %5303 = vlog2.f32 %v771_v23  ;;  %v737_v21 = vmul.f32 0.6931472, %v5292_v52  ;;  %v6378_v23 = vadd.f32 %v6155_v31, %v6086_v38  ;;  %10237 = vst [vmem:[#allocation36_spill] sm:$0xff] %v6380_v5  ;;  %v6389_v57 = vadd.f32 %v6159_v40, %v6090_v39 }
 0x140   :  { %v547_v52 = vmul.f32 1.442695, %v477_v34  ;;  %v740_v31 = vmul.f32 %v6255_v1, %v739_v6  ;;  %v549_v5 = vmul.f32 1.442695, %v478_v51  ;;  %v6403_v40 = vadd.f32 %v6171_v58, %v6086_v38  ;;  %v6414_v58 = vpop.f32.mrb[27].mxu0 }
 0x141   :  { %v495_v6 = vmin.f32 %v6378_v23, 20.0  ;;  %5305 = vpow2.f32 %v575_v44  ;;  %v496_v51 = vmin.f32 %v6389_v57, 20.0  ;;  %10241 = vst [vmem:[#allocation38_spill] sm:$0xff] %v6414_v58  ;;  %vm859_vm2 = vcmp.lt.f32.partialorder %v858_v10, 0.0004427343 }
 0x142   :  { %v743_v34 = vsel %vm6395_vm0, %v740_v31, %v737_v21  ;;  %5307 = vpow2.f32 %v547_v52  ;;  %v499_v44 = vmin.f32 %v6403_v40, 20.0 }
 0x143   :  { %5309 = vpow2.f32 %v549_v5  ;;  %v583_v46 = vmul.f32 1.442695, %v495_v6 }
 0x144   :  { %v5294_v18 = vpop.eup %5293 }
 0x145   :  { %v818_v60 = vmul.f32 0.6931472, %v5294_v18  ;;  %v6373_v47 = vpop.eup %5295 }
 0x146   :  { %v6382_v35 = vpop.eup %5297 }
 0x147   :  { %v824_v50 = vsel %vm823_vm13, %v821_v7, %v818_v60  ;;  %v6391_v18 = vpop.eup %5299  ;;  %v856_v7 = vadd.f32 1.0, %v855_v24  ;;  %v807_v1 = vadd.f32 1.0, %v6382_v35 }
 0x148   :  { %v6385_v17 = vsel %vm424_vm14, %v6206_v13, %v824_v50  ;;  %v775_v13 = vadd.f32 1.0, %v774_v25  ;;  %v777_v50 = vand.u32 2147483647, %v6342_v0  ;;  %v5302_v24 = vpop.eup %5301  ;;  %v681_v25 = vadd.f32 1.0, %v6373_v47 }
 0x149   :  { %10238 = vst [vmem:[#allocation37_spill] sm:$0xff] %v6385_v17  ;;  %v1404_v48 = vmul.f32 %v6385_v17, %v6385_v17  ;;  %v690_v30 = vadd.f32 1.0, %v6391_v18  ;;  %v1327_v21 = vadd.f32 %v6322_v42, %v6385_v17  ;;  %v854_v31 = vmul.f32 0.6931472, %v5302_v24  ;;  %v5304_v59 = vpop.eup %5303 }
 0x14a   :  { %v857_v60 = vmul.f32 %v6346_v56, %v856_v7  ;;  %5311 = vlog2.f32 %v807_v1  ;;  %v585_v42 = vmul.f32 1.442695, %v496_v51  ;;  %v6427_v56 = vadd.f32 %v6179_v3, %v6090_v39  ;;  %v6446_v3 = vpop.f32.mrb[23].mxu1 }
 0x14b   :  { %v1475_v49 = vadd.f32 %v6333_v11, %v1404_v48  ;;  %5313 = vlog2.f32 %v681_v25  ;;  %v773_v52 = vmul.f32 0.6931472, %v5304_v59  ;;  %v6437_v11 = vsel %vm415_vm15, %v6133_v9, %v743_v34  ;;  %10244 = vst [vmem:[#allocation41_spill] sm:$0xff] %v6446_v3 }
 0x14c   :  { %v860_v43 = vsel %vm859_vm2, %v857_v60, %v854_v31  ;;  %5315 = vlog2.f32 %v690_v30  ;;  %10243 = vst [vmem:[#allocation40_spill] sm:$0xff] %v6437_v11  ;;  %v6444_v59 = vadd.f32 %v6116_v61, %v6287_v22  ;;  %vm6448_vm3 = vcmp.lt.f32.partialorder %v777_v50, 0.0004427343 }
 0x14d   :  { %v6423_v58 = vsel %vm428_vm1, %v6276_v20, %v860_v43  ;;  %v591_v43 = vmul.f32 1.442695, %v499_v44  ;;  %v776_v20 = vmul.f32 %v6342_v0, %v775_v13  ;;  %5317 = vpow2.f32 %v583_v46  ;;  %v6462_v0 = vpop.eup %5305 }
 0x14e   :  { %10242 = vst [vmem:[#allocation39_spill] sm:$0xff] %v6423_v58  ;;  %v6430_v7 = vadd.f32 %v1327_v21, %v6423_v58  ;;  %v1408_v5 = vmul.f32 %v6423_v58, %v6423_v58  ;;  %5319 = vpow2.f32 %v585_v42  ;;  %v500_v9 = vmin.f32 %v6427_v56, 20.0  ;;  %v6467_v34 = vpop.eup %5307 }
 0x14f   :  { %v1395_v30 = vmul.f32 %v6437_v11, %v6437_v11  ;;  %v684_v46 = vmul.f32 -0.5, %v6373_v47  ;;  %v6460_v61 = vadd.f32 %v6208_v16, %v6086_v38  ;;  %v810_v13 = vmul.f32 -0.5, %v6382_v35  ;;  %v6480_v51 = vpop.eup %5309 }
 0x150   :  { %v6440_v10 = vadd.f32 %v1475_v49, %v1408_v5  ;;  %v779_v49 = vsel %vm6448_vm3, %v776_v20, %v773_v52  ;;  %5321 = vpow2.f32 %v591_v43  ;;  %v693_v50 = vmul.f32 -0.5, %v6391_v18 }
 0x151   :  { %v1304_v48 = vadd.f32 %v6248_v37, %v6437_v11  ;;  %v481_v6 = vmin.f32 %v6444_v59, 20.0  ;;  %v6474_v16 = vadd.f32 %v6118_v63, %v6297_v33  ;;  %v6478_v24 = vadd.f32 %v6123_v2, %v6287_v22 }
 0x152   :  { %v6483_v25 = vsel %vm419_vm4, %v6185_v8, %v779_v49  ;;  %v813_v21 = vand.u32 2147483647, %v6382_v35  ;;  %v593_v31 = vmul.f32 1.442695, %v500_v9  ;;  %v717_v37 = vadd.f32 1.0, %v6467_v34 }
 0x153   :  { %10247 = vst [vmem:[#allocation42_spill] sm:$0xff] %v6483_v25  ;;  %v1452_v44 = vadd.f32 %v6268_v55, %v1395_v30  ;;  %v685_v63 = vadd.f32 1.0, %v684_v46  ;;  %v726_v42 = vadd.f32 1.0, %v6480_v51  ;;  %v503_v2 = vmin.f32 %v6460_v61, 20.0 }
 0x154   :  { %v5312_v60 = vpop.eup %5311  ;;  %v811_v5 = vadd.f32 1.0, %v810_v13  ;;  %v687_v8 = vand.u32 2147483647, %v6373_v47  ;;  %v694_v43 = vadd.f32 1.0, %v693_v50  ;;  %5323 = vlog2.f32 %v717_v37 }
 0x155   :  { %v5314_v52 = vpop.eup %5313  ;;  %v843_v1 = vadd.f32 1.0, %v6462_v0  ;;  %v696_v55 = vand.u32 2147483647, %v6391_v18  ;;  %v720_v9 = vmul.f32 -0.5, %v6467_v34  ;;  %5325 = vlog2.f32 %v726_v42  ;;  %v6508_v42 = vpop.f32.mrb[24].mxu1 }
 0x156   :  { %v5316_v20 = vpop.eup %5315  ;;  %vm6496_vm7 = vcmp.lt.f32.partialorder %v813_v21, 0.0004427343  ;;  %5327 = vpow2.f32 %v593_v31  ;;  %v729_v49 = vmul.f32 -0.5, %v6480_v51  ;;  %v555_v46 = vmul.f32 1.442695, %v481_v6  ;;  %10250 = vst [vmem:[#allocation43_spill] sm:$0xff] %v6508_v42 }
 0x157   :  { %v6501_v13 = vpop.eup %5317  ;;  %v1399_v50 = vmul.f32 %v6483_v25, %v6483_v25  ;;  %v683_v37 = vmul.f32 0.6931472, %v5314_v52  ;;  %v686_v58 = vmul.f32 %v6373_v47, %v685_v63  ;;  %v599_v21 = vmul.f32 1.442695, %v503_v2 }
 0x158   :  { %v6510_v17 = vpop.eup %5319  ;;  %v809_v31 = vmul.f32 0.6931472, %v5312_v60  ;;  %vm6512_vm10 = vcmp.lt.f32.partialorder %v687_v8, 0.0004427343  ;;  %v692_v11 = vmul.f32 0.6931472, %v5316_v20  ;;  %v695_v3 = vmul.f32 %v6391_v18, %v694_v43 }
 0x159   :  { %v812_v52 = vmul.f32 %v6382_v35, %v811_v5  ;;  %5329 = vlog2.f32 %v843_v1  ;;  %vm6519_vm12 = vcmp.lt.f32.partialorder %v696_v55, 0.0004427343  ;;  %v721_v63 = vadd.f32 1.0, %v720_v9  ;;  %v6536_v9 = vpop.f32.mrb[25].mxu1 }
 0x15a   :  { %v6523_v2 = vpop.eup %5321  ;;  %v879_v60 = vadd.f32 1.0, %v6501_v13  ;;  %v723_v8 = vand.u32 2147483647, %v6467_v34  ;;  %v730_v42 = vadd.f32 1.0, %v729_v49  ;;  %5331 = vpow2.f32 %v555_v46 }
 0x15b   :  { %v888_v18 = vadd.f32 1.0, %v6510_v17  ;;  %v689_v43 = vsel %vm6512_vm10, %v686_v58, %v683_v37  ;;  %v732_v35 = vand.u32 2147483647, %v6480_v51  ;;  %5333 = vpow2.f32 %v599_v21 }
 0x15c   :  { %v1305_v5 = vadd.f32 %v1304_v48, %v6483_v25  ;;  %v1453_v20 = vadd.f32 %v1452_v44, %v1399_v50  ;;  %v815_v1 = vsel %vm6496_vm7, %v812_v52, %v809_v31  ;;  %v698_v55 = vsel %vm6519_vm12, %v695_v3, %v692_v11 }
 0x15d   :  { %v846_v49 = vmul.f32 -0.5, %v6462_v0  ;;  %v915_v46 = vadd.f32 1.0, %v6523_v2  ;;  %v722_v58 = vmul.f32 %v6467_v34, %v721_v63  ;;  %v6543_v37 = vadd.f32 %v6224_v14, %v6090_v39 }
 0x15e   :  { %v5324_v48 = vpop.eup %5323  ;;  %5335 = vlog2.f32 %v879_v60  ;;  %v6548_v44 = vsel %vm409_vm5, %v6310_v36, %v689_v43  ;;  %vm6550_vm13 = vcmp.lt.f32.partialorder %v723_v8, 0.0004427343  ;;  %v731_v3 = vmul.f32 %v6480_v51, %v730_v42  ;;  %v6564_v36 = vpop.f32.mrb[26].mxu1 }
 0x15f   :  { %10255 = vst [vmem:[#allocation44_spill] sm:$0xff] %v6548_v44  ;;  %v5326_v30 = vpop.eup %5325  ;;  %5337 = vlog2.f32 %v888_v18  ;;  %v6558_v14 = vsel %vm410_vm6, %v6328_v41, %v698_v55  ;;  %v719_v34 = vmul.f32 0.6931472, %v5324_v48  ;;  %vm6560_vm14 = vcmp.lt.f32.partialorder %v732_v35, 0.0004427343  ;;  %v6580_v63 = vpop.f32.mrb[27].mxu1 }
 0x160   :  { %10258 = vst [vmem:[#allocation45_spill] sm:$0xff] %v6558_v14  ;;  %v6566_v21 = vpop.eup %5327  ;;  %v6571_v51 = vsel %vm423_vm8, %v6317_v62, %v815_v1  ;;  %v849_v42 = vand.u32 2147483647, %v6462_v0  ;;  %v882_v31 = vmul.f32 -0.5, %v6501_v13  ;;  %v728_v41 = vmul.f32 0.6931472, %v5326_v30 }
 0x161   :  { %10261 = vst [vmem:[#allocation46_spill] sm:$0xff] %v6571_v51  ;;  %5339 = vlog2.f32 %v915_v46  ;;  %v1389_v6 = vmul.f32 %v6548_v44, %v6548_v44  ;;  %v725_v52 = vsel %vm6550_vm13, %v722_v58, %v719_v34  ;;  %v504_v47 = vmin.f32 %v6543_v37, 20.0  ;;  %v6607_v46 = vpop.f32.mrb[28].mxu0 }
 0x162   :  { %v1390_v62 = vmul.f32 %v6558_v14, %v6558_v14  ;;  %v6587_v60 = vsel %vm413_vm9, %v6350_v54, %v725_v52  ;;  %v734_v8 = vsel %vm6560_vm14, %v731_v3, %v728_v41  ;;  %v6593_v18 = vadd.f32 %v6234_v27, %v6086_v38  ;;  %v6625_v52 = vpop.f32.mrb[28].mxu1 }
 0x163   :  { %10262 = vst [vmem:[#allocation47_spill] sm:$0xff] %v6587_v60  ;;  %v5330_v43 = vpop.eup %5329  ;;  %v924_v35 = vadd.f32 1.0, %v6566_v21  ;;  %v6598_v1 = vadd.f32 %v6587_v60, %v6548_v44  ;;  %v1393_v55 = vmul.f32 %v6587_v60, %v6587_v60  ;;  %v6605_v54 = vsel %vm414_vm11, %v6360_v53, %v734_v8  ;;  %10264 = vst [vmem:[#allocation49_spill] sm:$0xff] %v6625_v52 }
 0x164   :  { %10263 = vst [vmem:[#allocation48_spill] sm:$0xff] %v6605_v54  ;;  %v6609_v58 = vpop.eup %5331  ;;  %v1403_v27 = vmul.f32 %v6571_v51, %v6571_v51  ;;  %v847_v48 = vadd.f32 1.0, %v846_v49  ;;  %v6615_v11 = vadd.f32 %v6605_v54, %v6558_v14  ;;  %v1394_v3 = vmul.f32 %v6605_v54, %v6605_v54 }
 0x165   :  { %v6619_v30 = vpop.eup %5333  ;;  %v891_v53 = vmul.f32 -0.5, %v6510_v17  ;;  %v6622_v34 = vadd.f32 %v1393_v55, %v1389_v6  ;;  %v601_v50 = vmul.f32 1.442695, %v504_v47  ;;  %v482_v41 = vmin.f32 %v6474_v16, 20.0 }
 0x166   :  { %v6628_v49 = vadd.f32 %v1305_v5, %v6571_v51  ;;  %vm427_vm15 = vcmp.gt.f32.partialorder %v6355_v45, 20.0  ;;  %v883_v8 = vadd.f32 1.0, %v882_v31  ;;  %v6631_v60 = vadd.f32 %v1394_v3, %v1390_v62 }
 0x167   :  { %v507_v44 = vmin.f32 %v6593_v18, 20.0  ;;  %v845_v54 = vmul.f32 0.6931472, %v5330_v43  ;;  %v918_v14 = vmul.f32 -0.5, %v6523_v2  ;;  %5341 = vlog2.f32 %v924_v35  ;;  %v6645_v35 = vpop.f32.mrb[29].mxu0 }
 0x168   :  { %v753_v6 = vadd.f32 1.0, %v6609_v58  ;;  %v5336_v47 = vpop.eup %5335  ;;  %v6636_v55 = vadd.f32 %v1453_v20, %v1403_v27  ;;  %v848_v25 = vmul.f32 %v6462_v0, %v847_v48  ;;  %vm6639_vm0 = vcmp.lt.f32.partialorder %v849_v42, 0.0004427343  ;;  %10267 = vst [vmem:[#allocation50_spill] sm:$0xff] %v6645_v35 }
 0x169   :  { %v951_v31 = vadd.f32 1.0, %v6619_v30  ;;  %v5338_v62 = vpop.eup %5337  ;;  %v885_v3 = vand.u32 2147483647, %v6501_v13  ;;  %v892_v43 = vadd.f32 1.0, %v891_v53  ;;  %5343 = vpow2.f32 %v601_v50 }
 0x16a   :  { %v557_v51 = vmul.f32 1.442695, %v482_v41  ;;  %vm431_vm1 = vcmp.gt.f32.partialorder %v6378_v23, 20.0  ;;  %v884_v20 = vmul.f32 %v6501_v13, %v883_v8  ;;  %vm432_vm2 = vcmp.gt.f32.partialorder %v6389_v57, 20.0  ;;  %v6662_v8 = vpop.f32.mrb[29].mxu1 }
 0x16b   :  { %v894_v0 = vand.u32 2147483647, %v6510_v17  ;;  %v927_v42 = vmul.f32 -0.5, %v6566_v21  ;;  %v607_v27 = vmul.f32 1.442695, %v507_v44  ;;  %v5340_v48 = vpop.eup %5339  ;;  %v851_v52 = vsel %vm6639_vm0, %v848_v25, %v845_v54 }
 0x16c   :  { %v919_v53 = vadd.f32 1.0, %v918_v14  ;;  %5345 = vlog2.f32 %v753_v6  ;;  %v6656_v50 = vadd.f32 %v6244_v28, %v6090_v39  ;;  %v881_v41 = vmul.f32 0.6931472, %v5336_v47 }
 0x16d   :  { %v890_v35 = vmul.f32 0.6931472, %v5338_v62  ;;  %5347 = vlog2.f32 %v951_v31  ;;  %v6660_v13 = vadd.f32 %v6125_v4, %v6297_v33  ;;  %v893_v44 = vmul.f32 %v6510_v17, %v892_v43 }
 0x16e   :  { %5349 = vpow2.f32 %v557_v51  ;;  %v485_v25 = vmin.f32 %v6478_v24, 20.0  ;;  %v6668_v14 = vadd.f32 %v6137_v12, %v6287_v22  ;;  %vm435_vm3 = vcmp.gt.f32.partialorder %v6403_v40, 20.0 }
 0x16f   :  { %v921_v28 = vand.u32 2147483647, %v6523_v2  ;;  %v928_v54 = vadd.f32 1.0, %v927_v42  ;;  %v930_v6 = vand.u32 2147483647, %v6566_v21  ;;  %5351 = vpow2.f32 %v607_v27 }
 0x170   :  { %v6676_v4 = vsel %vm427_vm15, %v6355_v45, %v851_v52  ;;  %vm6678_vm4 = vcmp.lt.f32.partialorder %v885_v3, 0.0004427343  ;;  %vm6682_vm5 = vcmp.lt.f32.partialorder %v894_v0, 0.0004427343  ;;  %v508_v51 = vmin.f32 %v6656_v50, 20.0  ;;  %v6692_v52 = vpop.f32.mrb[30].mxu0 }
 0x171   :  { %10268 = vst [vmem:[#allocation51_spill] sm:$0xff] %v6676_v4  ;;  %v887_v47 = vsel %vm6678_vm4, %v884_v20, %v881_v41  ;;  %v896_v5 = vsel %vm6682_vm5, %v893_v44, %v890_v35  ;;  %v917_v31 = vmul.f32 0.6931472, %v5340_v48  ;;  %v486_v45 = vmin.f32 %v6660_v13, 20.0  ;;  %10273 = vst [vmem:[#allocation52_spill] sm:$0xff] %v6692_v52  ;;  %v5342_v62 = vpop.eup %5341 }
 0x172   :  { %v920_v3 = vmul.f32 %v6523_v2, %v919_v53  ;;  %v756_v43 = vmul.f32 -0.5, %v6609_v58  ;;  %v563_v0 = vmul.f32 1.442695, %v485_v25  ;;  %v489_v42 = vmin.f32 %v6668_v14, 20.0 }
 0x173   :  { %v1407_v27 = vmul.f32 %v6676_v4, %v6676_v4  ;;  %vm6699_vm6 = vcmp.lt.f32.partialorder %v921_v28, 0.0004427343  ;;  %vm436_vm7 = vcmp.gt.f32.partialorder %v6427_v56, 20.0  ;;  %v929_v35 = vmul.f32 %v6566_v21, %v928_v54  ;;  %v6709_v2 = vpop.eup %5343 }
 0x174   :  { %vm6705_vm8 = vcmp.lt.f32.partialorder %v930_v6, 0.0004427343  ;;  %v1307_v53 = vadd.f32 %v6628_v49, %v6676_v4  ;;  %v6716_v41 = vsel %vm431_vm1, %v6378_v23, %v887_v47  ;;  %v6721_v44 = vsel %vm432_vm2, %v6389_v57, %v896_v5 }
 0x175   :  { %10278 = vst [vmem:[#allocation53_spill] sm:$0xff] %v6716_v41  ;;  %10279 = vst [vmem:[#allocation54_spill] sm:$0xff] %v6721_v44  ;;  %v609_v21 = vmul.f32 1.442695, %v508_v51  ;;  %v923_v25 = vsel %vm6699_vm6, %v920_v3, %v917_v31  ;;  %v926_v28 = vmul.f32 0.6931472, %v5342_v62  ;;  %5353 = vpow2.f32 %v563_v0 }
 0x176   :  { %v954_v54 = vmul.f32 -0.5, %v6619_v30  ;;  %v565_v6 = vmul.f32 1.442695, %v486_v45  ;;  %v5346_v17 = vpop.eup %5345  ;;  %vm417_vm9 = vcmp.gt.f32.partialorder %v6444_v59, 20.0  ;;  %v757_v49 = vadd.f32 1.0, %v756_v43 }
 0x177   :  { %v571_v23 = vmul.f32 1.442695, %v489_v42  ;;  %v6729_v12 = vadd.f32 %v6141_v15, %v6297_v33  ;;  %v5348_v57 = vpop.eup %5347  ;;  %v1455_v51 = vadd.f32 %v6636_v55, %v1407_v27  ;;  %v1308_v47 = vadd.f32 %v1307_v53, %v6716_v41 }
 0x178   :  { %v759_v5 = vand.u32 2147483647, %v6609_v58  ;;  %v960_v31 = vadd.f32 1.0, %v6709_v2  ;;  %v6735_v45 = vpop.eup %5349  ;;  %v1411_v62 = vmul.f32 %v6716_v41, %v6716_v41  ;;  %v1412_v3 = vmul.f32 %v6721_v44, %v6721_v44 }
 0x179   :  { %v6744_v15 = vsel %vm435_vm3, %v6403_v40, %v923_v25  ;;  %5355 = vpow2.f32 %v609_v21  ;;  %v6746_v55 = vpop.eup %5351  ;;  %v932_v43 = vsel %vm6705_vm8, %v929_v35, %v926_v28  ;;  %v955_v0 = vadd.f32 1.0, %v954_v54 }
 0x17a   :  { %10280 = vst [vmem:[#allocation55_spill] sm:$0xff] %v6744_v15  ;;  %v957_v42 = vand.u32 2147483647, %v6619_v30  ;;  %5357 = vpow2.f32 %v565_v6  ;;  %v755_v27 = vmul.f32 0.6931472, %v5346_v17  ;;  %v758_v20 = vmul.f32 %v6609_v58, %v757_v49 }
 0x17b   :  { %5359 = vpow2.f32 %v571_v23  ;;  %v490_v53 = vmin.f32 %v6729_v12, 20.0  ;;  %v953_v41 = vmul.f32 0.6931472, %v5348_v57  ;;  %vm6753_vm10 = vcmp.lt.f32.partialorder %v759_v5, 0.0004427343 }
 0x17c   :  { %5361 = vlog2.f32 %v960_v31  ;;  %v762_v21 = vadd.f32 1.0, %v6735_v45  ;;  %v6761_v35 = vsel %vm436_vm7, %v6427_v56, %v932_v43  ;;  %v963_v48 = vmul.f32 -0.5, %v6709_v2  ;;  %v6800_v43 = vpop.f32.mrb[30].mxu1 }
 0x17d   :  { %10283 = vst [vmem:[#allocation56_spill] sm:$0xff] %v6761_v35  ;;  %v987_v58 = vadd.f32 1.0, %v6746_v55  ;;  %v6767_v25 = vadd.f32 %v6145_v19, %v6287_v22  ;;  %v1456_v28 = vadd.f32 %v1455_v51, %v1411_v62  ;;  %v1329_v54 = vadd.f32 %v6430_v7, %v6721_v44  ;;  %10287 = vst [vmem:[#allocation58_spill] sm:$0xff] %v6800_v43  ;;  %v5076_v43 = vld [vmem:[#allocation2 + $0xcc] ss:$16 sps:$4 sm:$0xff]  }
 0x17e   :  { %v1415_v6 = vmul.f32 %v6744_v15, %v6744_v15  ;;  %v956_v17 = vmul.f32 %v6619_v30, %v955_v0  ;;  %v1477_v56 = vadd.f32 %v6440_v10, %v1412_v3  ;;  %vm6775_vm11 = vcmp.lt.f32.partialorder %v957_v42, 0.0004427343 }
 0x17f   :  { %v761_v23 = vsel %vm6753_vm10, %v758_v20, %v755_v27  ;;  %v573_v19 = vmul.f32 1.442695, %v490_v53  ;;  %v1416_v57 = vmul.f32 %v6761_v35, %v6761_v35  ;;  %v966_v51 = vand.u32 2147483647, %v6709_v2  ;;  %v6786_v30 = vpop.eup %5353 }
 0x180   :  { %v959_v7 = vsel %vm6775_vm11, %v956_v17, %v953_v41  ;;  %5363 = vlog2.f32 %v762_v21  ;;  %v964_v10 = vadd.f32 1.0, %v963_v48  ;;  %v493_v5 = vmin.f32 %v6767_v25, 20.0 }
 0x181   :  { %5365 = vlog2.f32 %v987_v58  ;;  %v6791_v31 = vadd.f32 %v6152_v26, %v6297_v33  ;;  %v1309_v62 = vadd.f32 %v1308_v47, %v6744_v15  ;;  %v1457_v3 = vadd.f32 %v1456_v28, %v1415_v6 }
 0x182   :  { %vm439_vm12 = vcmp.gt.f32.partialorder %v6460_v61, 20.0  ;;  %v6798_v41 = vsel %vm417_vm9, %v6444_v59, %v761_v23  ;;  %v6805_v42 = vadd.f32 %v1329_v54, %v6761_v35  ;;  %v765_v47 = vmul.f32 -0.5, %v6735_v45 }
 0x183   :  { %10286 = vst [vmem:[#allocation57_spill] sm:$0xff] %v6798_v41  ;;  %v6802_v0 = vpop.eup %5355  ;;  %v6808_v26 = vsel %vm439_vm12, %v6460_v61, %v959_v7  ;;  %5367 = vpow2.f32 %v573_v19  ;;  %v6813_v20 = vadd.f32 %v1477_v56, %v1416_v57  ;;  %vm6815_vm13 = vcmp.lt.f32.partialorder %v966_v51, 0.0004427343 }
 0x184   :  { %10288 = vst [vmem:[#allocation59_spill] sm:$0xff] %v6808_v26  ;;  %v6811_v27 = vpop.eup %5357  ;;  %v768_v53 = vand.u32 2147483647, %v6735_v45  ;;  %v789_v40 = vadd.f32 1.0, %v6786_v30  ;;  %v1397_v61 = vmul.f32 %v6798_v41, %v6798_v41  ;;  %v965_v48 = vmul.f32 %v6709_v2, %v964_v10  ;;  %v6850_v10 = vpop.f32.mrb[31].mxu0 }
 0x185   :  { %v6821_v21 = vpop.eup %5359  ;;  %v579_v58 = vmul.f32 1.442695, %v493_v5  ;;  %v494_v28 = vmin.f32 %v6791_v31, 20.0  ;;  %v6828_v6 = vadd.f32 %v1309_v62, %v6808_v26  ;;  %v1419_v17 = vmul.f32 %v6808_v26, %v6808_v26  ;;  %10293 = vst [vmem:[#allocation60_spill] sm:$0xff] %v6850_v10 }
 0x186   :  { %v5362_v54 = vpop.eup %5361  ;;  %v6834_v56 = vadd.f32 %v6598_v1, %v6798_v41  ;;  %v996_v49 = vadd.f32 1.0, %v6802_v0  ;;  %vm440_vm14 = vcmp.gt.f32.partialorder %v6543_v37, 20.0  ;;  %v766_v23 = vadd.f32 1.0, %v765_v47 }
 0x187   :  { %v990_v2 = vmul.f32 -0.5, %v6746_v55  ;;  %v798_v19 = vadd.f32 1.0, %v6811_v27  ;;  %v6842_v57 = vadd.f32 %v6280_v29, %v6086_v38  ;;  %vm6844_vm15 = vcmp.lt.f32.partialorder %v768_v53, 0.0004427343 }
 0x188   :  { %5369 = vlog2.f32 %v789_v40  ;;  %v792_v1 = vmul.f32 -0.5, %v6786_v30  ;;  %v825_v51 = vadd.f32 1.0, %v6821_v21  ;;  %v6853_v5 = vadd.f32 %v6622_v34, %v1397_v61 }
 0x189   :  { %v962_v62 = vmul.f32 0.6931472, %v5362_v54  ;;  %vm418_vm0 = vcmp.gt.f32.partialorder %v6474_v16, 20.0  ;;  %5371 = vpow2.f32 %v579_v58  ;;  %v581_v29 = vmul.f32 1.442695, %v494_v28  ;;  %v6865_v54 = vpop.f32.mrb[31].mxu1 }
 0x18a   :  { %v5364_v47 = vpop.eup %5363  ;;  %v6856_v53 = vadd.f32 %v1457_v3, %v1419_v17  ;;  %v993_v41 = vand.u32 2147483647, %v6746_v55  ;;  %5373 = vlog2.f32 %v996_v49  ;;  %v6861_v40 = vadd.f32 %v6157_v32, %v6287_v22  ;;  %10294 = vst [vmem:[#allocation61_spill] sm:$0xff] %v6865_v54 }
 0x18b   :  { %v5366_v26 = vpop.eup %5365  ;;  %v991_v15 = vadd.f32 1.0, %v990_v2  ;;  %v999_v34 = vmul.f32 -0.5, %v6802_v0  ;;  %5375 = vlog2.f32 %v798_v19  ;;  %v511_v61 = vmin.f32 %v6842_v57, 20.0 }
 0x18c   :  { %v767_v58 = vmul.f32 %v6735_v45, %v766_v23  ;;  %vm443_vm1 = vcmp.gt.f32.partialorder %v6593_v18, 20.0  ;;  %v793_v3 = vadd.f32 1.0, %v792_v1  ;;  %v795_v28 = vand.u32 2147483647, %v6786_v30 }
 0x18d   :  { %5377 = vlog2.f32 %v825_v51  ;;  %v6870_v17 = vpop.eup %5367  ;;  %v968_v32 = vsel %vm6815_vm13, %v965_v48, %v962_v62  ;;  %v764_v49 = vmul.f32 0.6931472, %v5364_v47  ;;  %v801_v2 = vmul.f32 -0.5, %v6811_v27  ;;  %v10298_v62 = vld [vmem:[#allocation24_spill] sm:$0xff] }
 0x18e   :  { %5379 = vpow2.f32 %v581_v29  ;;  %v989_v19 = vmul.f32 0.6931472, %v5366_v26  ;;  %vm6875_vm2 = vcmp.lt.f32.partialorder %v993_v41, 0.0004427343  ;;  %v828_v45 = vmul.f32 -0.5, %v6821_v21 }
 0x18f   :  { %v497_v23 = vmin.f32 %v6861_v40, 20.0  ;;  %v992_v1 = vmul.f32 %v6746_v55, %v991_v15  ;;  %v1000_v51 = vadd.f32 1.0, %v999_v34  ;;  %v1002_v44 = vand.u32 2147483647, %v6802_v0 }
 0x190   :  { %v615_v59 = vmul.f32 1.442695, %v511_v61  ;;  %v6886_v48 = vsel %vm440_vm14, %v6543_v37, %v968_v32  ;;  %v804_v41 = vand.u32 2147483647, %v6811_v27  ;;  %v834_v26 = vadd.f32 1.0, %v6870_v17 }
 0x191   :  { %10297 = vst [vmem:[#allocation62_spill] sm:$0xff] %v6886_v48  ;;  %v6892_v29 = vadd.f32 %v10298_v62, %v6090_v39  ;;  %v770_v15 = vsel %vm6844_vm15, %v767_v58, %v764_v49  ;;  %v794_v55 = vmul.f32 %v6786_v30, %v793_v3  ;;  %vm6897_vm3 = vcmp.lt.f32.partialorder %v795_v28, 0.0004427343  ;;  %v10301_v58 = vld [vmem:[#allocation13_spill] sm:$0xff] }
 0x192   :  { %v802_v34 = vadd.f32 1.0, %v801_v2  ;;  %v5370_v37 = vpop.eup %5369  ;;  %v995_v61 = vsel %vm6875_vm2, %v992_v1, %v989_v19  ;;  %vm421_vm4 = vcmp.gt.f32.partialorder %v6478_v24, 20.0  ;;  %v829_v32 = vadd.f32 1.0, %v828_v45 }
 0x193   :  { %v831_v62 = vand.u32 2147483647, %v6821_v21  ;;  %v587_v4 = vmul.f32 1.442695, %v497_v23  ;;  %v6905_v54 = vpop.eup %5371  ;;  %v1420_v30 = vmul.f32 %v6886_v48, %v6886_v48  ;;  %v6910_v7 = vmul.f32 %v6802_v0, %v1000_v51 }
 0x194   :  { %5381 = vpow2.f32 %v615_v59  ;;  %v6914_v3 = vadd.f32 %v10301_v58, %v6297_v33  ;;  %v5374_v35 = vpop.eup %5373  ;;  %v6919_v28 = vsel %vm418_vm0, %v6474_v16, %v770_v15  ;;  %vm6921_vm5 = vcmp.lt.f32.partialorder %v1002_v44, 0.0004427343 }
 0x195   :  { %10302 = vst [vmem:[#allocation24_spill] sm:$0xff] %v6919_v28  ;;  %vm6925_vm6 = vcmp.lt.f32.partialorder %v804_v41, 0.0004427343  ;;  %5383 = vlog2.f32 %v834_v26  ;;  %v512_v0 = vmin.f32 %v6892_v29, 20.0  ;;  %v5376_v19 = vpop.eup %5375  ;;  %v6932_v45 = vadd.f32 %v6805_v42, %v6886_v48  ;;  %v10310_v26 = vld [vmem:[#allocation26_spill] sm:$0xff] }
 0x196   :  { %v6937_v16 = vsel %vm443_vm1, %v6593_v18, %v995_v61  ;;  %v791_v44 = vmul.f32 0.6931472, %v5370_v37  ;;  %v6940_v23 = vmul.f32 %v6811_v27, %v802_v34  ;;  %v6943_v51 = vmul.f32 %v6821_v21, %v829_v32 }
 0x197   :  { %10307 = vst [vmem:[#allocation13_spill] sm:$0xff] %v6937_v16  ;;  %v5378_v1 = vpop.eup %5377  ;;  %vm6945_vm7 = vcmp.lt.f32.partialorder %v831_v62, 0.0004427343  ;;  %v861_v42 = vadd.f32 1.0, %v6905_v54  ;;  %5385 = vpow2.f32 %v587_v4  ;;  %v6953_v18 = vadd.f32 %v6813_v20, %v1420_v30  ;;  %v10311_v30 = vld [vmem:[#allocation15_spill] sm:$0xff] }
 0x198   :  { %v6950_v41 = vpop.eup %5379  ;;  %v1398_v27 = vmul.f32 %v6919_v28, %v6919_v28  ;;  %vm422_vm8 = vcmp.gt.f32.partialorder %v6660_v13, 20.0  ;;  %vm425_vm9 = vcmp.gt.f32.partialorder %v6668_v14, 20.0  ;;  %v498_v21 = vmin.f32 %v6914_v3, 20.0 }
 0x199   :  { %v6962_v15 = vadd.f32 %v10310_v26, %v6086_v38  ;;  %v6966_v4 = vadd.f32 %v6615_v11, %v6919_v28  ;;  %v1423_v20 = vmul.f32 %v6937_v16, %v6937_v16  ;;  %vm444_vm10 = vcmp.gt.f32.partialorder %v6656_v50, 20.0  ;;  %v10312_v28 = vld [vmem:[#allocation27_spill] sm:$0xff] }
 0x19a   :  { %v998_v34 = vmul.f32 0.6931472, %v5374_v35  ;;  %v617_v37 = vmul.f32 1.442695, %v512_v0  ;;  %v797_v61 = vsel %vm6897_vm3, %v794_v55, %v791_v44  ;;  %v800_v32 = vmul.f32 0.6931472, %v5376_v19 }
 0x19b   :  { %v837_v62 = vmul.f32 -0.5, %v6870_v17  ;;  %v6976_v58 = vadd.f32 %v10311_v30, %v6287_v22  ;;  %v827_v26 = vmul.f32 0.6931472, %v5378_v1  ;;  %5387 = vlog2.f32 %v861_v42  ;;  %v10313_v1 = vld [vmem:[#allocation16_spill] sm:$0xff]  ;;  %v5037_v42 = vld [vmem:[#allocation2 + $0x4] ss:$16 sps:$4 sm:$0xff]  }
 0x19c   :  { %v870_v11 = vadd.f32 1.0, %v6950_v41  ;;  %v6981_v48 = vadd.f32 %v10312_v28, %v6090_v39  ;;  %v6984_v35 = vadd.f32 %v6631_v60, %v1398_v27  ;;  %v840_v55 = vand.u32 2147483647, %v6870_v17  ;;  %2685 = vmatprep.subr.bf16.mxu0 %v5037_v42  ;;  %v5041_v42 = vld [vmem:[#allocation2 + $0x20] ss:$16 sps:$4 sm:$0xff]  }
 0x19d   :  { %v589_v47 = vmul.f32 1.442695, %v498_v21  ;;  %v515_v0 = vmin.f32 %v6962_v15, 20.0  ;;  %v6990_v19 = vadd.f32 %v6828_v6, %v6937_v16  ;;  %v6993_v44 = vadd.f32 %v6856_v53, %v1423_v20  ;;  %v5035_v20 = vld [vmem:[#allocation2] ss:$16 sps:$4 sm:$0xff]  }
 0x19e   :  { %5389 = vpow2.f32 %v617_v37  ;;  %v6997_v28 = vadd.f32 %v10313_v1, %v6297_v33  ;;  %v6999_v60 = vpop.eup %5381  ;;  %v7004_v27 = vsel %vm421_vm4, %v6478_v24, %v797_v61  ;;  %v1004_v6 = vsel %vm6921_vm5, %v6910_v7, %v998_v34  ;;  %v5038_v37 = vld [vmem:[#allocation2 + $0x8] ss:$16 sps:$4 sm:$0xff]   ;;  %v5040_v7 = vld [vmem:[#allocation2 + $0xc] ss:$16 sps:$4 sm:$0xff]   ;;  %2686 = vmatpush1.bf16.msra.mxu0 %v5035_v20 }
 0x19f   :  { %10314 = vst [vmem:[#allocation26_spill] sm:$0xff] %v7004_v27  ;;  %vm426_vm11 = vcmp.gt.f32.partialorder %v6729_v12, 20.0  ;;  %v838_v53 = vadd.f32 1.0, %v837_v62  ;;  %v501_v21 = vmin.f32 %v6976_v58, 20.0  ;;  %v5384_v30 = vpop.eup %5383  ;;  %v806_v1 = vsel %vm6925_vm6, %v6940_v23, %v800_v32  ;;  %2911 = vmatprep.subr.bf16.mxu1 %v5040_v7  ;;  %v5064_v16 = vld [vmem:[#allocation2 + $0x8c] ss:$16 sps:$4 sm:$0xff]  }
 0x1a0   :  { %v833_v24 = vsel %vm6945_vm7, %v6943_v51, %v827_v26  ;;  %5391 = vlog2.f32 %v870_v11  ;;  %v516_v49 = vmin.f32 %v6981_v48, 20.0  ;;  %vm7018_vm12 = vcmp.lt.f32.partialorder %v840_v55, 0.0004427343  ;;  %v5043_v26 = vld [vmem:[#allocation2 + $0x24] ss:$16 sps:$4 sm:$0xff]   ;;  %2912 = vmatpush1.bf16.msra.mxu1 %v5038_v37 }
 0x1a1   :  { %v864_v61 = vmul.f32 -0.5, %v6905_v54  ;;  %5393 = vpow2.f32 %v589_v47  ;;  %v623_v62 = vmul.f32 1.442695, %v515_v0  ;;  %v7023_v2 = vpop.eup %5385  ;;  %v1401_v23 = vmul.f32 %v7004_v27, %v7004_v27  ;;  %2687 = vmatprep.subr.bf16.mxu0 %v5043_v26 }
 0x1a2   :  { %v867_v51 = vand.u32 2147483647, %v6905_v54  ;;  %v1023_v59 = vadd.f32 1.0, %v6999_v60  ;;  %v502_v32 = vmin.f32 %v6997_v28, 20.0  ;;  %v7033_v11 = vsel %vm444_vm10, %v6656_v50, %v1004_v6  ;;  %2688 = vmatpush1.bf16.msra.mxu0 %v5041_v42 }
 0x1a3   :  { %10317 = vst [vmem:[#allocation15_spill] sm:$0xff] %v7033_v11  ;;  %v836_v55 = vmul.f32 0.6931472, %v5384_v30  ;;  %v839_v47 = vmul.f32 %v6870_v17, %v838_v53  ;;  %v595_v0 = vmul.f32 1.442695, %v501_v21  ;;  %v7038_v20 = vadd.f32 %v6834_v56, %v7004_v27 }
 0x1a4   :  { %v7043_v7 = vsel %vm422_vm8, %v6660_v13, %v806_v1  ;;  %v7048_v50 = vsel %vm425_vm9, %v6668_v14, %v833_v24  ;;  %v625_v6 = vmul.f32 1.442695, %v516_v49  ;;  %v5044_v17 = vld [vmem:[#allocation2 + $0x28] ss:$16 sps:$4 sm:$0xff]   ;;  %v5046_v53 = vld [vmem:[#allocation2 + $0x2c] ss:$16 sps:$4 sm:$0xff]   ;;  %5395 = vpow2.f32 %v623_v62 }
 0x1a5   :  { %10318 = vst [vmem:[#allocation27_spill] sm:$0xff] %v7043_v7  ;;  %10319 = vst [vmem:[#allocation16_spill] sm:$0xff] %v7048_v50  ;;  %vm429_vm13 = vcmp.gt.f32.partialorder %v6767_v25, 20.0  ;;  %v865_v21 = vadd.f32 1.0, %v864_v61  ;;  %v873_v56 = vmul.f32 -0.5, %v6950_v41  ;;  %v897_v37 = vadd.f32 1.0, %v7023_v2  ;;  %v5388_v13 = vpop.eup %5387  ;;  %2913 = vmatprep.subr.bf16.mxu1 %v5046_v53 }
 0x1a6   :  { %v7055_v30 = vadd.f32 %v6932_v45, %v7033_v11  ;;  %v1424_v14 = vmul.f32 %v7033_v11, %v7033_v11  ;;  %5397 = vlog2.f32 %v1023_v59  ;;  %v597_v1 = vmul.f32 1.442695, %v502_v32  ;;  %v5049_v24 = vld [vmem:[#allocation2 + $0x44] ss:$16 sps:$4 sm:$0xff]   ;;  %v5052_v49 = vld [vmem:[#allocation2 + $0x4c] ss:$16 sps:$4 sm:$0xff]   ;;  %2914 = vmatpush1.bf16.msra.mxu1 %v5044_v17 }
 0x1a7   :  { %v1495_v61 = vadd.f32 %v6853_v5, %v1401_v23  ;;  %v1402_v26 = vmul.f32 %v7043_v7, %v7043_v7  ;;  %v842_v62 = vsel %vm7018_vm12, %v839_v47, %v836_v55  ;;  %5399 = vpow2.f32 %v595_v0  ;;  %v5047_v53 = vld [vmem:[#allocation2 + $0x40] ss:$16 sps:$4 sm:$0xff]   ;;  %2689 = vmatprep.subr.bf16.mxu0 %v5049_v24  ;;  %2915 = vmatprep.subr.bf16.mxu1 %v5052_v49  ;;  %v5050_v55 = vld [vmem:[#allocation2 + $0x48] ss:$16 sps:$4 sm:$0xff]   ;;  %v5055_v24 = vld [vmem:[#allocation2 + $0x64] ss:$16 sps:$4 sm:$0xff]  }
 0x1a8   :  { %v7064_v45 = vpop.eup %5389  ;;  %v1405_v42 = vmul.f32 %v7048_v50, %v7048_v50  ;;  %v876_v59 = vand.u32 2147483647, %v6950_v41  ;;  %v1026_v32 = vmul.f32 -0.5, %v6999_v60  ;;  %5401 = vpow2.f32 %v625_v6  ;;  %2690 = vmatpush1.bf16.msra.mxu0 %v5047_v53  ;;  %v5061_v27 = vld [vmem:[#allocation2 + $0x84] ss:$16 sps:$4 sm:$0xff]  }
 0x1a9   :  { %v863_v5 = vmul.f32 0.6931472, %v5388_v13  ;;  %v866_v23 = vmul.f32 %v6905_v54, %v865_v21  ;;  %vm7071_vm14 = vcmp.lt.f32.partialorder %v867_v51, 0.0004427343  ;;  %5403 = vlog2.f32 %v897_v37  ;;  %2691 = vmatprep.subr.bf16.mxu0 %v5055_v24  ;;  %v5065_v49 = vld [vmem:[#allocation2 + $0xa0] ss:$16 sps:$4 sm:$0xff]  }
 0x1aa   :  { %v5392_v47 = vpop.eup %5391  ;;  %v7078_v0 = vsel %vm426_vm11, %v6729_v12, %v842_v62  ;;  %vm430_vm15 = vcmp.gt.f32.partialorder %v6791_v31, 20.0  ;;  %v874_v6 = vadd.f32 1.0, %v873_v56  ;;  %v1029_v17 = vand.u32 2147483647, %v6999_v60  ;;  %v10323_v12 = vld [vmem:[#allocation17_spill] sm:$0xff]  ;;  %2916 = vmatpush1.bf16.msra.mxu1 %v5050_v55 }
 0x1ab   :  { %10322 = vst [vmem:[#allocation63_spill] sm:$0xff] %v7078_v0  ;;  %5405 = vpow2.f32 %v597_v1  ;;  %v7082_v54 = vpop.eup %5393  ;;  %v7085_v51 = vadd.f32 %v6953_v18, %v1424_v14  ;;  %v1368_v21 = vadd.f32 %v6966_v4, %v7043_v7  ;;  %v1032_v37 = vadd.f32 1.0, %v7064_v45  ;;  %v5053_v56 = vld [vmem:[#allocation2 + $0x60] ss:$16 sps:$4 sm:$0xff]   ;;  %v5056_v62 = vld [vmem:[#allocation2 + $0x68] ss:$16 sps:$4 sm:$0xff]  }
 0x1ac   :  { %v7092_v13 = vadd.f32 %v10323_v12, %v6287_v22  ;;  %v1516_v1 = vadd.f32 %v6984_v35, %v1402_v26  ;;  %vm7095_vm0 = vcmp.lt.f32.partialorder %v876_v59, 0.0004427343  ;;  %v1027_v18 = vadd.f32 1.0, %v1026_v32  ;;  %v5058_v7 = vld [vmem:[#allocation2 + $0x6c] ss:$16 sps:$4 sm:$0xff]   ;;  %2692 = vmatpush1.bf16.msra.mxu0 %v5053_v56  ;;  %v10332_v56 = vld [vmem:[#allocation29_spill] sm:$0xff] }
 0x1ad   :  { %v900_v14 = vmul.f32 -0.5, %v7023_v2  ;;  %v1406_v4 = vmul.f32 %v7078_v0, %v7078_v0  ;;  %v869_v53 = vsel %vm7071_vm14, %v866_v23, %v863_v5  ;;  %v872_v12 = vmul.f32 0.6931472, %v5392_v47  ;;  %2917 = vmatprep.subr.bf16.mxu1 %v5058_v7  ;;  %2693 = vmatprep.subr.bf16.mxu0 %v5061_v27 }
 0x1ae   :  { %v903_v55 = vand.u32 2147483647, %v7023_v2  ;;  %v1348_v35 = vadd.f32 %v7038_v20, %v7048_v50  ;;  %v7107_v26 = vadd.f32 %v1495_v61, %v1405_v42  ;;  %v875_v59 = vmul.f32 %v6950_v41, %v874_v6  ;;  %v7111_v11 = vpop.eup %5395  ;;  %v5059_v61 = vld [vmem:[#allocation2 + $0x80] ss:$16 sps:$4 sm:$0xff]   ;;  %2918 = vmatpush1.bf16.msra.mxu1 %v5056_v62  ;;  %v5067_v62 = vld [vmem:[#allocation2 + $0xa4] ss:$16 sps:$4 sm:$0xff]  }
 0x1af   :  { %v906_v32 = vadd.f32 1.0, %v7082_v54  ;;  %v7114_v5 = vadd.f32 %v1368_v21, %v7078_v0  ;;  %vm7116_vm1 = vcmp.lt.f32.partialorder %v1029_v17, 0.0004427343  ;;  %5407 = vlog2.f32 %v1032_v37  ;;  %v10329_v6 = vld [vmem:[#allocation23_spill] sm:$0xff]  ;;  %v5062_v21 = vld [vmem:[#allocation2 + $0x88] ss:$16 sps:$4 sm:$0xff]   ;;  %2919 = vmatprep.subr.bf16.mxu1 %v5064_v16 }
 0x1b0   :  { %v505_v20 = vmin.f32 %v7092_v13, 20.0  ;;  %v5398_v41 = vpop.eup %5397  ;;  %v7124_v42 = vsel %vm429_vm13, %v6767_v25, %v869_v53  ;;  %v7127_v34 = vmul.f32 %v6999_v60, %v1027_v18  ;;  %v901_v47 = vadd.f32 1.0, %v900_v14  ;;  %2694 = vmatpush1.bf16.msra.mxu0 %v5059_v61 }
 0x1b1   :  { %10328 = vst [vmem:[#allocation17_spill] sm:$0xff] %v7124_v42  ;;  %v7131_v17 = vadd.f32 %v10329_v6, %v6297_v33  ;;  %v7133_v37 = vpop.eup %5399  ;;  %v7135_v7 = vadd.f32 %v1516_v1, %v1406_v4  ;;  %vm447_vm2 = vcmp.gt.f32.partialorder %v6842_v57, 20.0  ;;  %vm7138_vm3 = vcmp.lt.f32.partialorder %v903_v55, 0.0004427343  ;;  %2695 = vmatprep.subr.bf16.mxu0 %v5067_v62 }
 0x1b2   :  { %v1035_v60 = vmul.f32 -0.5, %v7064_v45  ;;  %v7145_v24 = vadd.f32 %v10332_v56, %v6287_v22  ;;  %v7147_v18 = vpop.eup %5401  ;;  %v878_v27 = vsel %vm7095_vm0, %v875_v59, %v872_v12  ;;  %v1038_v1 = vand.u32 2147483647, %v7064_v45  ;;  %2920 = vmatpush1.bf16.msra.mxu1 %v5062_v21  ;;  %v5068_v56 = vld [vmem:[#allocation2 + $0xa8] ss:$16 sps:$4 sm:$0xff]  }
 0x1b3   :  { %5409 = vlog2.f32 %v906_v32  ;;  %v1059_v14 = vadd.f32 1.0, %v7111_v11  ;;  %v5404_v4 = vpop.eup %5403  ;;  %v7154_v53 = vadd.f32 %v1348_v35, %v7124_v42  ;;  %v1409_v55 = vmul.f32 %v7124_v42, %v7124_v42  ;;  %v5073_v21 = vld [vmem:[#allocation2 + $0xc4] ss:$16 sps:$4 sm:$0xff]  }
 0x1b4   :  { %v1025_v16 = vmul.f32 0.6931472, %v5398_v41  ;;  %vm433_vm4 = vcmp.gt.f32.partialorder %v6861_v40, 20.0  ;;  %v603_v6 = vmul.f32 1.442695, %v505_v20  ;;  %v7162_v59 = vmul.f32 %v7023_v2, %v901_v47  ;;  %2696 = vmatpush1.bf16.msra.mxu0 %v5065_v49 }
 0x1b5   :  { %v7159_v12 = vpop.eup %5405  ;;  %v909_v32 = vmul.f32 -0.5, %v7082_v54  ;;  %v912_v61 = vand.u32 2147483647, %v7082_v54  ;;  %v506_v35 = vmin.f32 %v7131_v17, 20.0  ;;  %v7170_v41 = vsel %vm430_vm15, %v6791_v31, %v878_v27  ;;  %v5070_v47 = vld [vmem:[#allocation2 + $0xac] ss:$16 sps:$4 sm:$0xff]   ;;  %2697 = vmatprep.subr.bf16.mxu0 %v5073_v21 }
 0x1b6   :  { %10333 = vst [vmem:[#allocation23_spill] sm:$0xff] %v7170_v41  ;;  %v1036_v20 = vadd.f32 1.0, %v1035_v60  ;;  %v933_v0 = vadd.f32 1.0, %v7133_v37  ;;  %v509_v2 = vmin.f32 %v7145_v24, 20.0  ;;  %v899_v42 = vmul.f32 0.6931472, %v5404_v4  ;;  %2921 = vmatprep.subr.bf16.mxu1 %v5070_v47 }
 0x1b7   :  { %5411 = vlog2.f32 %v1059_v14  ;;  %v1062_v50 = vmul.f32 -0.5, %v7111_v11  ;;  %v1068_v10 = vadd.f32 1.0, %v7147_v18  ;;  %v1031_v62 = vsel %vm7116_vm1, %v7127_v34, %v1025_v16  ;;  %v10336_v27 = vld [vmem:[#allocation30_spill] sm:$0xff]  ;;  %v5071_v4 = vld [vmem:[#allocation2 + $0xc0] ss:$16 sps:$4 sm:$0xff]   ;;  %2922 = vmatpush1.bf16.msra.mxu1 %v5068_v56 }
 0x1b8   :  { %vm7179_vm5 = vcmp.lt.f32.partialorder %v1038_v1, 0.0004427343  ;;  %v942_v60 = vadd.f32 1.0, %v7159_v12  ;;  %5413 = vpow2.f32 %v603_v6  ;;  %v7186_v14 = vadd.f32 %v10336_v27, %v6297_v33  ;;  %v5074_v16 = vld [vmem:[#allocation2 + $0xc8] ss:$16 sps:$4 sm:$0xff]   ;;  %2923 = vmatprep.subr.bf16.mxu1 %v5076_v43  ;;  %2698 = vmatpush1.bf16.msra.mxu0 %v5071_v4 }
 0x1b9   :  { %v7189_v49 = vadd.f32 %v7107_v26, %v1409_v55  ;;  %v1410_v23 = vmul.f32 %v7170_v41, %v7170_v41  ;;  %vm7193_vm6 = vcmp.lt.f32.partialorder %v912_v61, 0.0004427343  ;;  %v605_v1 = vmul.f32 1.442695, %v506_v35  ;;  %v5408_v6 = vpop.eup %5407  ;;  %v5079_v35 = vld [vmem:[#allocation2 + $0xe4] ss:$16 sps:$4 sm:$0xff]  }
 0x1ba   :  { %v1065_v27 = vand.u32 2147483647, %v7111_v11  ;;  %5415 = vlog2.f32 %v933_v0  ;;  %v936_v47 = vmul.f32 -0.5, %v7133_v37  ;;  %v611_v52 = vmul.f32 1.442695, %v509_v2  ;;  %2699 = vmatprep.subr.bf16.mxu0 %v5079_v35 }
 0x1bb   :  { %v7202_v26 = vsel %vm447_vm2, %v6842_v57, %v1031_v62  ;;  %vm448_vm7 = vcmp.gt.f32.partialorder %v6892_v29, 20.0  ;;  %v910_v55 = vadd.f32 1.0, %v909_v32  ;;  %v1063_v61 = vadd.f32 1.0, %v1062_v50  ;;  %v5082_v56 = vld [vmem:[#allocation2 + $0xec] ss:$16 sps:$4 sm:$0xff]   ;;  %2924 = vmatpush1.bf16.msra.mxu1 %v5074_v16 }
 0x1bc   :  { %10339 = vst [vmem:[#allocation29_spill] sm:$0xff] %v7202_v26  ;;  %5417 = vlog2.f32 %v1068_v10  ;;  %v905_v0 = vsel %vm7138_vm3, %v7162_v59, %v899_v42  ;;  %vm434_vm8 = vcmp.gt.f32.partialorder %v6914_v3, 20.0  ;;  %v939_v43 = vand.u32 2147483647, %v7133_v37  ;;  %v5077_v21 = vld [vmem:[#allocation2 + $0xe0] ss:$16 sps:$4 sm:$0xff]   ;;  %2925 = vmatprep.subr.bf16.mxu1 %v5082_v56 }
 0x1bd   :  { %5419 = vlog2.f32 %v942_v60  ;;  %v510_v57 = vmin.f32 %v7186_v14, 20.0  ;;  %v5410_v2 = vpop.eup %5409  ;;  %v7213_v32 = vadd.f32 %v7114_v5, %v7170_v41  ;;  %v1034_v10 = vmul.f32 0.6931472, %v5408_v6  ;;  %v5080_v42 = vld [vmem:[#allocation2 + $0xe8] ss:$16 sps:$4 sm:$0xff]   ;;  %v10341_v60 = vld [vmem:[#allocation31_spill] sm:$0xff]  ;;  %2700 = vmatpush1.bf16.msra.mxu0 %v5077_v21 }
 0x1be   :  { %v1037_v50 = vmul.f32 %v7064_v45, %v1036_v20  ;;  %5421 = vpow2.f32 %v605_v1  ;;  %v1427_v25 = vmul.f32 %v7202_v26, %v7202_v26  ;;  %v937_v59 = vadd.f32 1.0, %v936_v47  ;;  %v5085_v1 = vld [vmem:[#allocation2 + $0x104] ss:$16 sps:$4 sm:$0xff]   ;;  %v5083_v35 = vld [vmem:[#allocation2 + $0x100] ss:$16 sps:$4 sm:$0xff]  }
 0x1bf   :  { %v1071_v62 = vmul.f32 -0.5, %v7147_v18  ;;  %5423 = vpow2.f32 %v611_v52  ;;  %v7222_v5 = vsel %vm433_vm4, %v6861_v40, %v905_v0  ;;  %v1074_v45 = vand.u32 2147483647, %v7147_v18  ;;  %2926 = vmatpush1.bf16.msra.mxu1 %v5080_v42  ;;  %2701 = vmatprep.subr.bf16.mxu0 %v5085_v1  ;;  %v10353_v41 = vld [vmem:[#allocation35_spill] sm:$0xff] }
 0x1c0   :  { %10340 = vst [vmem:[#allocation30_spill] sm:$0xff] %v7222_v5  ;;  %v945_v20 = vmul.f32 -0.5, %v7159_v12  ;;  %v7228_v4 = vadd.f32 %v10341_v60, %v6086_v38  ;;  %v7231_v16 = vadd.f32 %v7135_v7, %v1410_v23  ;;  %v908_v52 = vmul.f32 0.6931472, %v5410_v2  ;;  %v10344_v7 = vld [vmem:[#allocation32_spill] sm:$0xff] }
 0x1c1   :  { %v911_v6 = vmul.f32 %v7082_v54, %v910_v55  ;;  %v613_v47 = vmul.f32 1.442695, %v510_v57  ;;  %v5412_v40 = vpop.eup %5411  ;;  %v7236_v56 = vadd.f32 %v6990_v19, %v7202_v26  ;;  %v1040_v0 = vsel %vm7179_vm5, %v1037_v50, %v1034_v10  ;;  %v5086_v54 = vld [vmem:[#allocation2 + $0x108] ss:$16 sps:$4 sm:$0xff]   ;;  %v5088_v55 = vld [vmem:[#allocation2 + $0x10c] ss:$16 sps:$4 sm:$0xff]   ;;  %2702 = vmatpush1.bf16.msra.mxu0 %v5083_v35 }
 0x1c2   :  { %vm7240_vm9 = vcmp.lt.f32.partialorder %v1065_v27, 0.0004427343  ;;  %v7246_v23 = vadd.f32 %v10344_v7, %v6287_v22  ;;  %v7248_v57 = vpop.eup %5413  ;;  %v1413_v19 = vmul.f32 %v7222_v5, %v7222_v5  ;;  %v7253_v31 = vmul.f32 %v7111_v11, %v1063_v61  ;;  %2927 = vmatprep.subr.bf16.mxu1 %v5088_v55  ;;  %v5091_v11 = vld [vmem:[#allocation2 + $0x124] ss:$16 sps:$4 sm:$0xff]   ;;  %v5094_v7 = vld [vmem:[#allocation2 + $0x12c] ss:$16 sps:$4 sm:$0xff]  }
 0x1c3   :  { %vm7255_vm10 = vcmp.lt.f32.partialorder %v939_v43, 0.0004427343  ;;  %v1072_v2 = vadd.f32 1.0, %v1071_v62  ;;  %v7260_v10 = vadd.f32 %v6993_v44, %v1427_v25  ;;  %vm451_vm11 = vcmp.gt.f32.partialorder %v6962_v15, 20.0  ;;  %v10350_v25 = vld [vmem:[#allocation33_spill] sm:$0xff]  ;;  %2928 = vmatpush1.bf16.msra.mxu1 %v5086_v54  ;;  %2703 = vmatprep.subr.bf16.mxu0 %v5091_v11 }
 0x1c4   :  { %v7264_v50 = vmul.f32 %v7133_v37, %v937_v59  ;;  %v946_v21 = vadd.f32 1.0, %v945_v20  ;;  %v519_v42 = vmin.f32 %v7228_v4, 20.0  ;;  %v5416_v61 = vpop.eup %5415  ;;  %v7270_v43 = vsel %vm448_vm7, %v6892_v29, %v1040_v0  ;;  %v5089_v62 = vld [vmem:[#allocation2 + $0x120] ss:$16 sps:$4 sm:$0xff]   ;;  %2929 = vmatprep.subr.bf16.mxu1 %v5094_v7  ;;  %v5100_v7 = vld [vmem:[#allocation2 + $0x14c] ss:$16 sps:$4 sm:$0xff]  }
 0x1c5   :  { %10347 = vst [vmem:[#allocation31_spill] sm:$0xff] %v7270_v43  ;;  %v914_v44 = vsel %vm7193_vm6, %v911_v6, %v908_v52  ;;  %vm437_vm12 = vcmp.gt.f32.partialorder %v6976_v58, 20.0  ;;  %vm7275_vm13 = vcmp.lt.f32.partialorder %v1074_v45, 0.0004427343  ;;  %5425 = vpow2.f32 %v613_v47  ;;  %v5092_v45 = vld [vmem:[#allocation2 + $0x128] ss:$16 sps:$4 sm:$0xff]   ;;  %2704 = vmatpush1.bf16.msra.mxu0 %v5089_v62 }
 0x1c6   :  { %v7281_v59 = vadd.f32 %v10350_v25, %v6090_v39  ;;  %v5418_v20 = vpop.eup %5417  ;;  %v7285_v29 = vadd.f32 %v7154_v53, %v7222_v5  ;;  %v1061_v1 = vmul.f32 0.6931472, %v5412_v40  ;;  %v969_v34 = vadd.f32 1.0, %v7248_v57  ;;  %v10351_v40 = vld [vmem:[#allocation34_spill] sm:$0xff]  ;;  %v5095_v26 = vld [vmem:[#allocation2 + $0x140] ss:$16 sps:$4 sm:$0xff]  }
 0x1c7   :  { %v513_v52 = vmin.f32 %v7246_v23, 20.0  ;;  %v5420_v6 = vpop.eup %5419  ;;  %v7290_v47 = vadd.f32 %v7189_v49, %v1413_v19  ;;  %v7293_v35 = vmul.f32 %v7147_v18, %v1072_v2  ;;  %vm438_vm14 = vcmp.gt.f32.partialorder %v6997_v28, 20.0  ;;  %v5097_v2 = vld [vmem:[#allocation2 + $0x144] ss:$16 sps:$4 sm:$0xff]   ;;  %2930 = vmatpush1.bf16.msra.mxu1 %v5092_v45  ;;  %v5106_v27 = vld [vmem:[#allocation2 + $0x16c] ss:$16 sps:$4 sm:$0xff]  }
 0x1c8   :  { %v948_v53 = vand.u32 2147483647, %v7159_v12  ;;  %v7299_v0 = vadd.f32 %v10351_v40, %v6297_v33  ;;  %v7301_v55 = vpop.eup %5421  ;;  %v7305_v54 = vadd.f32 %v7055_v30, %v7270_v43  ;;  %v1428_v49 = vmul.f32 %v7270_v43, %v7270_v43  ;;  %2705 = vmatprep.subr.bf16.mxu0 %v5097_v2  ;;  %2931 = vmatprep.subr.bf16.mxu1 %v5100_v7 }
 0x1c9   :  { %v7312_v18 = vsel %vm434_vm8, %v6914_v3, %v914_v44  ;;  %vm452_vm15 = vcmp.gt.f32.partialorder %v6981_v48, 20.0  ;;  %v631_v19 = vmul.f32 1.442695, %v519_v42  ;;  %v7315_v11 = vpop.eup %5423  ;;  %v935_v25 = vmul.f32 0.6931472, %v5416_v61  ;;  %2706 = vmatpush1.bf16.msra.mxu0 %v5095_v26 }
 0x1ca   :  { %10352 = vst [vmem:[#allocation32_spill] sm:$0xff] %v7312_v18  ;;  %v947_v40 = vmul.f32 %v7159_v12, %v946_v21  ;;  %v520_v30 = vmin.f32 %v7281_v59, 20.0  ;;  %v7321_v5 = vadd.f32 %v10353_v41, %v6086_v38  ;;  %v1067_v3 = vsel %vm7240_vm9, %v7253_v31, %v1061_v1  ;;  %v5098_v61 = vld [vmem:[#allocation2 + $0x148] ss:$16 sps:$4 sm:$0xff]  }
 0x1cb   :  { %v1070_v42 = vmul.f32 0.6931472, %v5418_v20  ;;  %5427 = vlog2.f32 %v969_v34  ;;  %v619_v44 = vmul.f32 1.442695, %v513_v52  ;;  %v7328_v12 = vadd.f32 %v7213_v32, %v7312_v18  ;;  %v10356_v31 = vld [vmem:[#allocation36_spill] sm:$0xff]  ;;  %2932 = vmatpush1.bf16.msra.mxu1 %v5098_v61  ;;  %v10359_v61 = vld [vmem:[#allocation38_spill] sm:$0xff] }
 0x1cc   :  { %v944_v21 = vmul.f32 0.6931472, %v5420_v6  ;;  %v978_v41 = vadd.f32 1.0, %v7301_v55  ;;  %v514_v62 = vmin.f32 %v7299_v0, 20.0  ;;  %vm7332_vm0 = vcmp.lt.f32.partialorder %v948_v53, 0.0004427343  ;;  %2933 = vmatprep.subr.bf16.mxu1 %v5106_v27 }
 0x1cd   :  { %v1005_v60 = vadd.f32 1.0, %v7315_v11  ;;  %5429 = vpow2.f32 %v631_v19  ;;  %v7339_v20 = vadd.f32 %v10356_v31, %v6287_v22  ;;  %v5103_v32 = vld [vmem:[#allocation2 + $0x164] ss:$16 sps:$4 sm:$0xff]   ;;  %v7344_v1 = vsel %vm451_vm11, %v6962_v15, %v1067_v3  ;;  %v5101_v6 = vld [vmem:[#allocation2 + $0x160] ss:$16 sps:$4 sm:$0xff]  }
 0x1ce   :  { %v941_v34 = vsel %vm7255_vm10, %v7264_v50, %v935_v25  ;;  %v633_v52 = vmul.f32 1.442695, %v520_v30  ;;  %v523_v45 = vmin.f32 %v7321_v5, 20.0  ;;  %v1414_v53 = vmul.f32 %v7312_v18, %v7312_v18  ;;  %2707 = vmatprep.subr.bf16.mxu0 %v5103_v32  ;;  %v5104_v15 = vld [vmem:[#allocation2 + $0x168] ss:$16 sps:$4 sm:$0xff]   ;;  %v10366_v18 = vld [vmem:[#allocation41_spill] sm:$0xff] }
 0x1cf   :  { %v1076_v26 = vsel %vm7275_vm13, %v7293_v35, %v1070_v42  ;;  %v972_v19 = vmul.f32 -0.5, %v7248_v57  ;;  %5431 = vpow2.f32 %v619_v44  ;;  %v7356_v50 = vpop.eup %5425  ;;  %v7359_v2 = vadd.f32 %v7085_v51, %v1428_v49  ;;  %2708 = vmatpush1.bf16.msra.mxu0 %v5101_v6  ;;  %v5109_v51 = vld [vmem:[#allocation2 + $0x184] ss:$16 sps:$4 sm:$0xff]   ;;  %2934 = vmatpush1.bf16.msra.mxu1 %v5104_v15 }
 0x1d0   :  { %v950_v25 = vsel %vm7332_vm0, %v947_v40, %v944_v21  ;;  %5433 = vlog2.f32 %v978_v41  ;;  %v621_v30 = vmul.f32 1.442695, %v514_v62  ;;  %v1431_v37 = vmul.f32 %v7344_v1, %v7344_v1  ;;  %v5107_v41 = vld [vmem:[#allocation2 + $0x180] ss:$16 sps:$4 sm:$0xff]   ;;  %2709 = vmatprep.subr.bf16.mxu0 %v5109_v51  ;;  %v5115_v6 = vld [vmem:[#allocation2 + $0x1a4] ss:$16 sps:$4 sm:$0xff]  }
 0x1d1   :  { %v7368_v35 = vsel %vm437_vm12, %v6976_v58, %v941_v34  ;;  %5435 = vlog2.f32 %v1005_v60  ;;  %v517_v3 = vmin.f32 %v7339_v20, 20.0  ;;  %v7374_v43 = vsel %vm452_vm15, %v6981_v48, %v1076_v26  ;;  %v5110_v48 = vld [vmem:[#allocation2 + $0x188] ss:$16 sps:$4 sm:$0xff]   ;;  %v5112_v60 = vld [vmem:[#allocation2 + $0x18c] ss:$16 sps:$4 sm:$0xff]  }
 0x1d2   :  { %10357 = vst [vmem:[#allocation33_spill] sm:$0xff] %v7368_v35  ;;  %v975_v49 = vand.u32 2147483647, %v7248_v57  ;;  %5437 = vpow2.f32 %v633_v52  ;;  %v639_v40 = vmul.f32 1.442695, %v523_v45  ;;  %v7380_v58 = vsel %vm438_vm14, %v6997_v28, %v950_v25  ;;  %2935 = vmatprep.subr.bf16.mxu1 %v5112_v60 }
 0x1d3   :  { %10358 = vst [vmem:[#allocation34_spill] sm:$0xff] %v7380_v58  ;;  %v973_v42 = vadd.f32 1.0, %v972_v19  ;;  %v1014_v44 = vadd.f32 1.0, %v7356_v50  ;;  %v7385_v21 = vadd.f32 %v10359_v61, %v6090_v39  ;;  %vm441_vm1 = vcmp.gt.f32.partialorder %v7092_v13, 20.0  ;;  %2710 = vmatpush1.bf16.msra.mxu0 %v5107_v41  ;;  %v5118_v26 = vld [vmem:[#allocation2 + $0x1ac] ss:$16 sps:$4 sm:$0xff]   ;;  %2936 = vmatpush1.bf16.msra.mxu1 %v5110_v48 }
 0x1d4   :  { %v981_v62 = vmul.f32 -0.5, %v7301_v55  ;;  %v984_v7 = vand.u32 2147483647, %v7301_v55  ;;  %v1008_v28 = vmul.f32 -0.5, %v7315_v11  ;;  %5439 = vpow2.f32 %v621_v30  ;;  %2711 = vmatprep.subr.bf16.mxu0 %v5115_v6  ;;  %2937 = vmatprep.subr.bf16.mxu1 %v5118_v26  ;;  %v5119_v6 = vld [vmem:[#allocation2 + $0x1c0] ss:$16 sps:$4 sm:$0xff]  }
 0x1d5   :  { %v5428_v31 = vpop.eup %5427  ;;  %v1519_v32 = vadd.f32 %v7231_v16, %v1414_v53  ;;  %v7394_v34 = vadd.f32 %v7236_v56, %v7344_v1  ;;  %v7397_v52 = vadd.f32 %v7260_v10, %v1431_v37  ;;  %v627_v45 = vmul.f32 1.442695, %v517_v3  ;;  %v5113_v16 = vld [vmem:[#allocation2 + $0x1a0] ss:$16 sps:$4 sm:$0xff]   ;;  %v5122_v26 = vld [vmem:[#allocation2 + $0x1c8] ss:$16 sps:$4 sm:$0xff]  }
 0x1d6   :  { %v7401_v19 = vadd.f32 %v7285_v29, %v7368_v35  ;;  %v1011_v15 = vand.u32 2147483647, %v7315_v11  ;;  %v1017_v27 = vmul.f32 -0.5, %v7356_v50  ;;  %5441 = vpow2.f32 %v639_v40  ;;  %v5116_v29 = vld [vmem:[#allocation2 + $0x1a8] ss:$16 sps:$4 sm:$0xff]  }
 0x1d7   :  { %v7405_v56 = vpop.eup %5429  ;;  %v1417_v10 = vmul.f32 %v7368_v35, %v7368_v35  ;;  %v1432_v53 = vmul.f32 %v7374_v43, %v7374_v43  ;;  %v1418_v25 = vmul.f32 %v7380_v58, %v7380_v58  ;;  %5443 = vlog2.f32 %v1014_v44  ;;  %2712 = vmatpush1.bf16.msra.mxu0 %v5113_v16  ;;  %2938 = vmatpush1.bf16.msra.mxu1 %v5116_v29  ;;  %v5125_v3 = vld [vmem:[#allocation2 + $0x1e0] ss:$16 sps:$4 sm:$0xff]  }
 0x1d8   :  { %v971_v30 = vmul.f32 0.6931472, %v5428_v31  ;;  %v974_v37 = vmul.f32 %v7248_v57, %v973_v42  ;;  %vm7414_vm2 = vcmp.lt.f32.partialorder %v975_v49, 0.0004427343  ;;  %v524_v51 = vmin.f32 %v7385_v21, 20.0 }
 0x1d9   :  { %v7419_v40 = vpop.eup %5431  ;;  %vm442_vm3 = vcmp.gt.f32.partialorder %v7131_v17, 20.0  ;;  %v982_v61 = vadd.f32 1.0, %v981_v62  ;;  %vm7422_vm4 = vcmp.lt.f32.partialorder %v984_v7, 0.0004427343  ;;  %v1009_v41 = vadd.f32 1.0, %v1008_v28 }
 0x1da   :  { %5445 = vpow2.f32 %v627_v45  ;;  %v5121_v57 = vld [vmem:[#allocation2 + $0x1c4] ss:$16 sps:$4 sm:$0xff]   ;;  %v5434_v49 = vpop.eup %5433  ;;  %vm445_vm5 = vcmp.gt.f32.partialorder %v7145_v24, 20.0  ;;  %vm7427_vm6 = vcmp.lt.f32.partialorder %v1011_v15, 0.0004427343  ;;  %v1018_v48 = vadd.f32 1.0, %v1017_v27 }
 0x1db   :  { %v1020_v60 = vand.u32 2147483647, %v7356_v50  ;;  %v1095_v62 = vadd.f32 1.0, %v7405_v56  ;;  %v5436_v7 = vpop.eup %5435  ;;  %v7434_v31 = vadd.f32 %v7290_v47, %v1417_v10  ;;  %v7438_v28 = vadd.f32 %v7305_v54, %v7374_v43  ;;  %2713 = vmatprep.subr.bf16.mxu0 %v5121_v57  ;;  %v5124_v15 = vld [vmem:[#allocation2 + $0x1cc] ss:$16 sps:$4 sm:$0xff]  }
 0x1dc   :  { %v7441_v45 = vadd.f32 %v7359_v2, %v1432_v53  ;;  %v7443_v27 = vpop.eup %5437  ;;  %v977_v16 = vsel %vm7414_vm2, %v974_v37, %v971_v30  ;;  %v1041_v47 = vadd.f32 1.0, %v7419_v40  ;;  %v641_v10 = vmul.f32 1.442695, %v524_v51  ;;  %2714 = vmatpush1.bf16.msra.mxu0 %v5119_v6  ;;  %2939 = vmatprep.subr.bf16.mxu1 %v5124_v15  ;;  %v5127_v30 = vld [vmem:[#allocation2 + $0x1e4] ss:$16 sps:$4 sm:$0xff]  }
 0x1dd   :  { %v7450_v54 = vadd.f32 %v10366_v18, %v6297_v33  ;;  %v7454_v2 = vadd.f32 %v7328_v12, %v7380_v58  ;;  %v7456_v53 = vadd.f32 %v1519_v32, %v1418_v25  ;;  %v980_v29 = vmul.f32 0.6931472, %v5434_v49  ;;  %2940 = vmatpush1.bf16.msra.mxu1 %v5122_v26  ;;  %2715 = vmatprep.subr.bf16.mxu0 %v5127_v30  ;;  %v10369_v30 = vld [vmem:[#allocation43_spill] sm:$0xff] }
 0x1de   :  { %v983_v57 = vmul.f32 %v7301_v55, %v982_v61  ;;  %v7459_v37 = vpop.eup %5439  ;;  %v1007_v51 = vmul.f32 0.6931472, %v5436_v7  ;;  %v1010_v35 = vmul.f32 %v7315_v11, %v1009_v41  ;;  %vm7462_vm7 = vcmp.lt.f32.partialorder %v1020_v60, 0.0004427343  ;;  %v5128_v61 = vld [vmem:[#allocation2 + $0x1e8] ss:$16 sps:$4 sm:$0xff]  }
 0x1df   :  { %v1098_v12 = vmul.f32 -0.5, %v7405_v56  ;;  %v7470_v32 = vsel %vm441_vm1, %v7092_v13, %v977_v16  ;;  %5447 = vlog2.f32 %v1095_v62  ;;  %v1044_v55 = vmul.f32 -0.5, %v7419_v40  ;;  %v5130_v11 = vld [vmem:[#allocation2 + $0x1ec] ss:$16 sps:$4 sm:$0xff]   ;;  %v5133_v62 = vld [vmem:[#allocation2 + $0x204] ss:$16 sps:$4 sm:$0xff]  }
 0x1e0   :  { %v1104_v25 = vadd.f32 1.0, %v7443_v27  ;;  %v7474_v41 = vpop.eup %5441  ;;  %vm446_vm8 = vcmp.gt.f32.partialorder %v7186_v14, 20.0  ;;  %v7478_v49 = vmul.f32 %v7356_v50, %v1018_v48  ;;  %5449 = vlog2.f32 %v1041_v47  ;;  %2716 = vmatpush1.bf16.msra.mxu0 %v5125_v3  ;;  %2941 = vmatprep.subr.bf16.mxu1 %v5130_v11  ;;  %v5136_v16 = vld [vmem:[#allocation2 + $0x20c] ss:$16 sps:$4 sm:$0xff]  }
 0x1e1   :  { %v1107_v13 = vmul.f32 -0.5, %v7443_v27  ;;  %v518_v60 = vmin.f32 %v7450_v54, 20.0  ;;  %v5444_v7 = vpop.eup %5443  ;;  %v986_v6 = vsel %vm7422_vm4, %v983_v57, %v980_v29  ;;  %v1101_v26 = vand.u32 2147483647, %v7405_v56  ;;  %2798 = vmatprep.subr.bf16.mxu0 %v5133_v62  ;;  %2942 = vmatpush1.bf16.msra.mxu1 %v5128_v61 }
 0x1e2   :  { %v1050_v15 = vadd.f32 1.0, %v7459_v37  ;;  %5451 = vpow2.f32 %v641_v10  ;;  %v1421_v50 = vmul.f32 %v7470_v32, %v7470_v32  ;;  %v1013_v48 = vsel %vm7427_vm6, %v1010_v35, %v1007_v51  ;;  %3024 = vmatprep.subr.bf16.mxu1 %v5136_v16 }
 0x1e3   :  { %v1099_v47 = vadd.f32 1.0, %v1098_v12  ;;  %v7492_v58 = vadd.f32 %v10369_v30, %v6287_v22  ;;  %v1045_v29 = vadd.f32 1.0, %v1044_v55  ;;  %v1047_v10 = vand.u32 2147483647, %v7419_v40 }
 0x1e4   :  { %v7494_v44 = vpop.eup %5445  ;;  %5453 = vlog2.f32 %v1104_v25  ;;  %v1131_v57 = vadd.f32 1.0, %v7474_v41  ;;  %v7501_v42 = vsel %vm442_vm3, %v7131_v17, %v986_v6  ;;  %v1016_v35 = vmul.f32 0.6931472, %v5444_v7 }
 0x1e5   :  { %10370 = vst [vmem:[#allocation35_spill] sm:$0xff] %v7501_v42  ;;  %v1108_v3 = vadd.f32 1.0, %v1107_v13  ;;  %v629_v51 = vmul.f32 1.442695, %v518_v60  ;;  %v7506_v12 = vsel %vm445_vm5, %v7145_v24, %v1013_v48  ;;  %5455 = vlog2.f32 %v1050_v15 }
 0x1e6   :  { %v521_v55 = vmin.f32 %v7492_v58, 20.0  ;;  %v7511_v25 = vadd.f32 %v6536_v9, %v6297_v33  ;;  %v1352_v17 = vadd.f32 %v7401_v19, %v7470_v32  ;;  %v1500_v61 = vadd.f32 %v7434_v31, %v1421_v50 }
 0x1e7   :  { %v7517_v11 = vmul.f32 %v7405_v56, %v1099_v47  ;;  %v1077_v13 = vadd.f32 1.0, %v7494_v44  ;;  %v1422_v24 = vmul.f32 %v7501_v42, %v7501_v42  ;;  %vm7522_vm9 = vcmp.lt.f32.partialorder %v1101_v26, 0.0004427343 }
 0x1e8   :  { %v7527_v9 = vmul.f32 %v7419_v40, %v1045_v29  ;;  %vm7529_vm10 = vcmp.lt.f32.partialorder %v1047_v10, 0.0004427343  ;;  %5457 = vlog2.f32 %v1131_v57  ;;  %v7535_v19 = vadd.f32 %v6564_v36, %v6287_v22 }
 0x1e9   :  { %v1425_v56 = vmul.f32 %v7506_v12, %v7506_v12  ;;  %v1022_v31 = vsel %vm7462_vm7, %v7478_v49, %v1016_v35  ;;  %v1110_v7 = vand.u32 2147483647, %v7443_v27  ;;  %5459 = vpow2.f32 %v629_v51  ;;  %v5448_v40 = vpop.eup %5447 }
 0x1ea   :  { %v7544_v6 = vmul.f32 %v7443_v27, %v1108_v3  ;;  %v1053_v26 = vmul.f32 -0.5, %v7459_v37  ;;  %v635_v15 = vmul.f32 1.442695, %v521_v55  ;;  %v522_v36 = vmin.f32 %v7511_v25, 20.0  ;;  %v5450_v16 = vpop.eup %5449 }
 0x1eb   :  { %v1373_v50 = vadd.f32 %v7454_v2, %v7501_v42  ;;  %v7551_v48 = vadd.f32 %v1352_v17, %v7506_v12  ;;  %vm455_vm11 = vcmp.gt.f32.partialorder %v7228_v4, 20.0  ;;  %vm449_vm12 = vcmp.gt.f32.partialorder %v7246_v23, 20.0 }
 0x1ec   :  { %5461 = vlog2.f32 %v1077_v13  ;;  %v7557_v27 = vadd.f32 %v6580_v63, %v6297_v33  ;;  %v7559_v18 = vpop.eup %5451  ;;  %v7562_v49 = vadd.f32 %v7456_v53, %v1422_v24  ;;  %v7567_v2 = vsel %vm446_vm8, %v7186_v14, %v1022_v31 }
 0x1ed   :  { %10375 = vst [vmem:[#allocation36_spill] sm:$0xff] %v7567_v2  ;;  %v1056_v47 = vand.u32 2147483647, %v7459_v37  ;;  %v525_v30 = vmin.f32 %v7535_v19, 20.0  ;;  %v7571_v29 = vadd.f32 %v1500_v61, %v1425_v56  ;;  %v1097_v10 = vmul.f32 0.6931472, %v5448_v40 }
 0x1ee   :  { %v1134_v63 = vmul.f32 -0.5, %v7474_v41  ;;  %v7576_v57 = vadd.f32 %v6607_v46, %v6086_v38  ;;  %v5454_v53 = vpop.eup %5453  ;;  %vm7578_vm13 = vcmp.lt.f32.partialorder %v1110_v7, 0.0004427343  ;;  %v1054_v14 = vadd.f32 1.0, %v1053_v26  ;;  %v10378_v46 = vld [vmem:[#allocation49_spill] sm:$0xff] }
 0x1ef   :  { %5463 = vpow2.f32 %v635_v15  ;;  %v637_v3 = vmul.f32 1.442695, %v522_v36  ;;  %v526_v51 = vmin.f32 %v7557_v27, 20.0  ;;  %v7584_v55 = vadd.f32 %v1373_v50, %v7567_v2  ;;  %v5456_v24 = vpop.eup %5455 }
 0x1f0   :  { %v1043_v17 = vmul.f32 0.6931472, %v5450_v16  ;;  %vm450_vm14 = vcmp.gt.f32.partialorder %v7299_v0, 20.0  ;;  %v1140_v61 = vadd.f32 1.0, %v7559_v18  ;;  %v7590_v13 = vadd.f32 %v10378_v46, %v6287_v22 }
 0x1f1   :  { %v1426_v56 = vmul.f32 %v7567_v2, %v7567_v2  ;;  %vm7594_vm15 = vcmp.lt.f32.partialorder %v1056_v47, 0.0004427343  ;;  %v1080_v7 = vmul.f32 -0.5, %v7494_v44  ;;  %v643_v40 = vmul.f32 1.442695, %v525_v30 }
 0x1f2   :  { %v1103_v26 = vsel %vm7522_vm9, %v7517_v11, %v1097_v10  ;;  %vm456_vm0 = vcmp.gt.f32.partialorder %v7281_v59, 20.0  ;;  %v1135_v15 = vadd.f32 1.0, %v1134_v63  ;;  %v1137_v36 = vand.u32 2147483647, %v7474_v41  ;;  %v5458_v50 = vpop.eup %5457  ;;  %v10381_v63 = vld [vmem:[#allocation50_spill] sm:$0xff] }
 0x1f3   :  { %v527_v16 = vmin.f32 %v7576_v57, 20.0  ;;  %v1106_v46 = vmul.f32 0.6931472, %v5454_v53  ;;  %v1055_v47 = vmul.f32 %v7459_v37, %v1054_v14  ;;  %5465 = vpow2.f32 %v637_v3  ;;  %v7606_v42 = vpop.eup %5459 }
 0x1f4   :  { %v645_v2 = vmul.f32 1.442695, %v526_v51  ;;  %v1049_v60 = vsel %vm7529_vm10, %v7527_v9, %v1043_v17  ;;  %v1052_v11 = vmul.f32 0.6931472, %v5456_v24  ;;  %vm459_vm1 = vcmp.gt.f32.partialorder %v7321_v5, 20.0 }
 0x1f5   :  { %5467 = vlog2.f32 %v1140_v61  ;;  %v529_v30 = vmin.f32 %v7590_v13, 20.0  ;;  %v7616_v10 = vsel %vm455_vm11, %v7228_v4, %v1103_v26  ;;  %vm453_vm2 = vcmp.gt.f32.partialorder %v7339_v20, 20.0 }
 0x1f6   :  { %v1081_v37 = vadd.f32 1.0, %v1080_v7  ;;  %5469 = vpow2.f32 %v643_v40  ;;  %v7621_v53 = vadd.f32 %v10381_v63, %v6090_v39  ;;  %v5462_v9 = vpop.eup %5461  ;;  %v1133_v62 = vmul.f32 0.6931472, %v5458_v50 }
 0x1f7   :  { %v1136_v14 = vmul.f32 %v7474_v41, %v1135_v15  ;;  %v1083_v3 = vand.u32 2147483647, %v7494_v44  ;;  %v647_v51 = vmul.f32 1.442695, %v527_v16  ;;  %v7628_v4 = vsel %vm449_vm12, %v7246_v23, %v1049_v60 }
 0x1f8   :  { %vm7630_vm3 = vcmp.lt.f32.partialorder %v1137_v36, 0.0004427343  ;;  %v1086_v61 = vadd.f32 1.0, %v7606_v42  ;;  %5471 = vpow2.f32 %v645_v2  ;;  %v1435_v24 = vmul.f32 %v7616_v10, %v7616_v10 }
 0x1f9   :  { %v1112_v41 = vsel %vm7578_vm13, %v7544_v6, %v1106_v46  ;;  %v1058_v7 = vsel %vm7594_vm15, %v1055_v47, %v1052_v11  ;;  %v651_v40 = vmul.f32 1.442695, %v529_v30  ;;  %v7642_v23 = vpop.eup %5463  ;;  %v1079_v26 = vmul.f32 0.6931472, %v5462_v9 }
 0x1fa   :  { %v1082_v15 = vmul.f32 %v7494_v44, %v1081_v37  ;;  %v528_v36 = vmin.f32 %v7621_v53, 20.0  ;;  %v7648_v2 = vadd.f32 %v6662_v8, %v6297_v33  ;;  %v1429_v16 = vmul.f32 %v7628_v4, %v7628_v4 }
 0x1fb   :  { %v1139_v6 = vsel %vm7630_vm3, %v1136_v14, %v1133_v62  ;;  %vm7654_vm4 = vcmp.lt.f32.partialorder %v1083_v3, 0.0004427343  ;;  %5473 = vpow2.f32 %v647_v51  ;;  %v7661_v44 = vsel %vm456_vm0, %v7281_v59, %v1112_v41 }
 0x1fc   :  { %v7666_v8 = vsel %vm450_vm14, %v7299_v0, %v1058_v7  ;;  %v1143_v31 = vmul.f32 -0.5, %v7559_v18  ;;  %5475 = vlog2.f32 %v1086_v61  ;;  %v1522_v50 = vadd.f32 %v7562_v49, %v1426_v56 }
 0x1fd   :  { %10386 = vst [vmem:[#allocation38_spill] sm:$0xff] %v7666_v8  ;;  %v1314_v46 = vadd.f32 %v7394_v34, %v7616_v10  ;;  %v1113_v47 = vadd.f32 1.0, %v7642_v23  ;;  %5477 = vpow2.f32 %v651_v40  ;;  %v7673_v60 = vpop.eup %5465  ;;  %v7678_v59 = vsel %vm459_vm1, %v7321_v5, %v1139_v6 }
 0x1fe   :  { %v1085_v0 = vsel %vm7654_vm4, %v1082_v15, %v1079_v26  ;;  %v649_v11 = vmul.f32 1.442695, %v528_v36  ;;  %v530_v30 = vmin.f32 %v7648_v2, 20.0  ;;  %v1462_v56 = vadd.f32 %v7397_v52, %v1435_v24 }
 0x1ff   :  { %v5468_v49 = vpop.eup %5467  ;;  %v1354_v34 = vadd.f32 %v7551_v48, %v7628_v4  ;;  %v1436_v37 = vmul.f32 %v7661_v44, %v7661_v44  ;;  %v1430_v63 = vmul.f32 %v7666_v8, %v7666_v8  ;;  %v1502_v9 = vadd.f32 %v7571_v29, %v1429_v16 }
 0x200   :  { %v7690_v5 = vpop.eup %5469  ;;  %v1335_v62 = vadd.f32 %v7438_v28, %v7661_v44  ;;  %vm460_vm5 = vcmp.gt.f32.partialorder %v7385_v21, 20.0  ;;  %v1144_v14 = vadd.f32 1.0, %v1143_v31  ;;  %v1146_v52 = vand.u32 2147483647, %v7559_v18 }
 0x201   :  { %v1439_v48 = vmul.f32 %v7678_v59, %v7678_v59  ;;  %v7702_v3 = vsel %vm453_vm2, %v7339_v20, %v1085_v0  ;;  %5479 = vlog2.f32 %v1113_v47  ;;  %v1122_v51 = vadd.f32 1.0, %v7673_v60 }
 0x202   :  { %v7705_v29 = vpop.eup %5471  ;;  %v1142_v17 = vmul.f32 0.6931472, %v5468_v49  ;;  %v1089_v28 = vmul.f32 -0.5, %v7606_v42  ;;  %5481 = vpow2.f32 %v649_v11  ;;  %v653_v61 = vmul.f32 1.442695, %v530_v30  ;;  %v10389_v11 = vld [vmem:[#allocation52_spill] sm:$0xff] }
 0x203   :  { %v7709_v24 = vadd.f32 %v7441_v45, %v1436_v37  ;;  %v7713_v41 = vadd.f32 %v7584_v55, %v7666_v8  ;;  %v7715_v7 = vadd.f32 %v1522_v50, %v1430_v63  ;;  %v1149_v20 = vadd.f32 1.0, %v7690_v5  ;;  %v10444_v8 = vld [vmem:[#allocation13_spill] sm:$0xff] }
 0x204   :  { %v7719_v40 = vadd.f32 %v1314_v46, %v7678_v59  ;;  %v1433_v26 = vmul.f32 %v7702_v3, %v7702_v3  ;;  %v1145_v15 = vmul.f32 %v7559_v18, %v1144_v14  ;;  %vm7724_vm6 = vcmp.lt.f32.partialorder %v1146_v52, 0.0004427343 }
 0x205   :  { %v7728_v45 = vpop.eup %5473  ;;  %v7730_v55 = vadd.f32 %v1462_v56, %v1439_v48  ;;  %v1116_v16 = vmul.f32 -0.5, %v7642_v23  ;;  %5483 = vlog2.f32 %v1122_v51  ;;  %v1158_v6 = vadd.f32 1.0, %v7705_v29 }
 0x206   :  { %v5476_v35 = vpop.eup %5475  ;;  %v1148_v31 = vsel %vm7724_vm6, %v1145_v15, %v1142_v17  ;;  %vm454_vm7 = vcmp.gt.f32.partialorder %v7450_v54, 20.0  ;;  %v1090_v18 = vadd.f32 1.0, %v1089_v28  ;;  %v1092_v50 = vand.u32 2147483647, %v7606_v42 }
 0x207   :  { %5485 = vpow2.f32 %v653_v61  ;;  %v7738_v46 = vpop.eup %5477  ;;  %v1119_v47 = vand.u32 2147483647, %v7642_v23  ;;  %v1125_v0 = vmul.f32 -0.5, %v7673_v60  ;;  %v7744_v30 = vadd.f32 %v10389_v11, %v6086_v38 }
 0x208   :  { %5487 = vlog2.f32 %v1149_v20  ;;  %v7747_v49 = vadd.f32 %v1354_v34, %v7702_v3  ;;  %v7749_v56 = vadd.f32 %v1502_v9, %v1433_v26  ;;  %v1152_v37 = vmul.f32 -0.5, %v7690_v5 }
 0x209   :  { %v1167_v63 = vadd.f32 1.0, %v7728_v45  ;;  %v7756_v14 = vsel %vm460_vm5, %v7385_v21, %v1148_v31  ;;  %v1117_v52 = vadd.f32 1.0, %v1116_v16  ;;  %5489 = vlog2.f32 %v1158_v6 }
 0x20a   :  { %v1161_v48 = vmul.f32 -0.5, %v7705_v29  ;;  %v1088_v38 = vmul.f32 0.6931472, %v5476_v35  ;;  %v1091_v51 = vmul.f32 %v7606_v42, %v1090_v18  ;;  %vm7760_vm8 = vcmp.lt.f32.partialorder %v1092_v50, 0.0004427343 }
 0x20b   :  { %vm457_vm9 = vcmp.gt.f32.partialorder %v7492_v58, 20.0  ;;  %v1185_v9 = vadd.f32 1.0, %v7738_v46  ;;  %v5480_v17 = vpop.eup %5479  ;;  %vm7766_vm10 = vcmp.lt.f32.partialorder %v1119_v47, 0.0004427343  ;;  %v1126_v21 = vadd.f32 1.0, %v1125_v0 }
 0x20c   :  { %v1128_v61 = vand.u32 2147483647, %v7673_v60  ;;  %v531_v20 = vmin.f32 %v7744_v30, 20.0  ;;  %v7772_v26 = vpop.eup %5481  ;;  %v7775_v42 = vadd.f32 %v1335_v62, %v7756_v14  ;;  %v1153_v15 = vadd.f32 1.0, %v1152_v37  ;;  %v10394_v62 = vld [vmem:[#allocation58_spill] sm:$0xff] }
 0x20d   :  { %v1155_v36 = vand.u32 2147483647, %v7690_v5  ;;  %5491 = vlog2.f32 %v1167_v63  ;;  %v7780_v16 = vmul.f32 %v7756_v14, %v7756_v14  ;;  %v1118_v6 = vmul.f32 %v7642_v23, %v1117_v52 }
 0x20e   :  { %v1162_v35 = vadd.f32 1.0, %v1161_v48  ;;  %v1164_v31 = vand.u32 2147483647, %v7705_v29  ;;  %v1094_v18 = vsel %vm7760_vm8, %v1091_v51, %v1088_v38  ;;  %v1115_v50 = vmul.f32 0.6931472, %v5480_v17 }
 0x20f   :  { %vm458_vm11 = vcmp.gt.f32.partialorder %v7511_v25, 20.0  ;;  %5493 = vlog2.f32 %v1185_v9  ;;  %v7789_v47 = vadd.f32 %v10394_v62, %v6287_v22  ;;  %v5484_v0 = vpop.eup %5483  ;;  %v1127_v11 = vmul.f32 %v7673_v60, %v1126_v21 }
 0x210   :  { %vm7792_vm12 = vcmp.lt.f32.partialorder %v1128_v61, 0.0004427343  ;;  %v1176_v23 = vadd.f32 1.0, %v7772_v26  ;;  %v655_v63 = vmul.f32 1.442695, %v531_v20  ;;  %vm461_vm13 = vcmp.gt.f32.partialorder %v7535_v19, 20.0 }
 0x211   :  { %v7797_v52 = vpop.eup %5485  ;;  %v1154_v48 = vmul.f32 %v7690_v5, %v1153_v15  ;;  %vm7801_vm14 = vcmp.lt.f32.partialorder %v1155_v36, 0.0004427343  ;;  %v1170_v22 = vmul.f32 -0.5, %v7728_v45  ;;  %v1173_v60 = vand.u32 2147483647, %v7728_v45  ;;  %v10402_v20 = vld [vmem:[#allocation60_spill] sm:$0xff] }
 0x212   :  { %v5488_v51 = vpop.eup %5487  ;;  %v7810_v34 = vsel %vm454_vm7, %v7450_v54, %v1094_v18  ;;  %v1163_v9 = vmul.f32 %v7705_v29, %v1162_v35  ;;  %vm7813_vm15 = vcmp.lt.f32.partialorder %v1164_v31, 0.0004427343  ;;  %5495 = vpow2.f32 %v655_v63  ;;  %v10403_v35 = vld [vmem:[#allocation61_spill] sm:$0xff] }
 0x213   :  { %10399 = vst [vmem:[#allocation41_spill] sm:$0xff] %v7810_v34  ;;  %v1121_v5 = vsel %vm7766_vm10, %v1118_v6, %v1115_v50  ;;  %v1124_v21 = vmul.f32 0.6931472, %v5484_v0  ;;  %vm462_vm0 = vcmp.gt.f32.partialorder %v7557_v27, 20.0  ;;  %v533_v61 = vmin.f32 %v7789_v47, 20.0  ;;  %v5490_v54 = vpop.eup %5489 }
 0x214   :  { %v7823_v15 = vadd.f32 %v10402_v20, %v6090_v39  ;;  %v1188_v29 = vmul.f32 -0.5, %v7738_v46  ;;  %5497 = vlog2.f32 %v1176_v23  ;;  %v1194_v36 = vadd.f32 1.0, %v7797_v52 }
 0x215   :  { %v7829_v31 = vadd.f32 %v10403_v35, %v6297_v33  ;;  %v1376_v28 = vadd.f32 %v7713_v41, %v7810_v34  ;;  %v1434_v6 = vmul.f32 %v7810_v34, %v7810_v34  ;;  %v1151_v18 = vmul.f32 0.6931472, %v5488_v51  ;;  %v10443_v34 = vld [vmem:[#allocation59_spill] sm:$0xff] }
 0x216   :  { %v659_v50 = vmul.f32 1.442695, %v533_v61  ;;  %v7838_v39 = vsel %vm457_vm9, %v7492_v58, %v1121_v5  ;;  %v1171_v62 = vadd.f32 1.0, %v1170_v22  ;;  %vm7840_vm1 = vcmp.lt.f32.partialorder %v1173_v60, 0.0004427343 }
 0x217   :  { %v532_v33 = vmin.f32 %v7823_v15, 20.0  ;;  %v5492_v23 = vpop.eup %5491  ;;  %v1130_v41 = vsel %vm7792_vm12, %v1127_v11, %v1124_v21  ;;  %v1160_v63 = vmul.f32 0.6931472, %v5490_v54  ;;  %v534_v51 = vmin.f32 %v7829_v31, 20.0 }
 0x218   :  { %5499 = vpow2.f32 %v659_v50  ;;  %vm463_vm2 = vcmp.gt.f32.partialorder %v7576_v57, 20.0  ;;  %vm465_vm3 = vcmp.gt.f32.partialorder %v7590_v13, 20.0  ;;  %v1189_v58 = vadd.f32 1.0, %v1188_v29 }
 0x219   :  { %v1191_v22 = vand.u32 2147483647, %v7738_v46  ;;  %5501 = vlog2.f32 %v1194_v36  ;;  %v657_v60 = vmul.f32 1.442695, %v532_v33  ;;  %v5494_v5 = vpop.eup %5493  ;;  %v1524_v61 = vadd.f32 %v7715_v7, %v1434_v6 }
 0x21a   :  { %v1157_v37 = vsel %vm7801_vm14, %v1154_v48, %v1151_v18  ;;  %v1179_v11 = vmul.f32 -0.5, %v7772_v26  ;;  %v661_v21 = vmul.f32 1.442695, %v534_v51  ;;  %v1437_v20 = vmul.f32 %v7838_v39, %v7838_v39 }
 0x21b   :  { %v7860_v54 = vsel %vm458_vm11, %v7511_v25, %v1130_v41  ;;  %v1169_v29 = vmul.f32 0.6931472, %v5492_v23  ;;  %5503 = vpow2.f32 %v657_v60  ;;  %v1166_v36 = vsel %vm7813_vm15, %v1163_v9, %v1160_v63 }
 0x21c   :  { %10406 = vst [vmem:[#allocation43_spill] sm:$0xff] %v7860_v54  ;;  %v1172_v7 = vmul.f32 %v7728_v45, %v1171_v62  ;;  %v1197_v48 = vmul.f32 -0.5, %v7797_v52  ;;  %5505 = vpow2.f32 %v661_v21  ;;  %v7866_v38 = vpop.eup %5495  ;;  %v7871_v35 = vsel %vm461_vm13, %v7535_v19, %v1157_v37 }
 0x21d   :  { %10407 = vst [vmem:[#allocation49_spill] sm:$0xff] %v7871_v35  ;;  %v1187_v6 = vmul.f32 0.6931472, %v5494_v5  ;;  %v1190_v25 = vmul.f32 %v7738_v46, %v1189_v58  ;;  %v1182_v18 = vand.u32 2147483647, %v7772_v26  ;;  %v1356_v9 = vadd.f32 %v7747_v49, %v7838_v39 }
 0x21e   :  { %v1438_v45 = vmul.f32 %v7860_v54, %v7860_v54  ;;  %vm7879_vm4 = vcmp.lt.f32.partialorder %v1191_v22, 0.0004427343  ;;  %v1203_v50 = vadd.f32 1.0, %v7866_v38  ;;  %v5498_v62 = vpop.eup %5497  ;;  %v1504_v19 = vadd.f32 %v7749_v56, %v1437_v20 }
 0x21f   :  { %v7888_v46 = vsel %vm462_vm0, %v7557_v27, %v1166_v36  ;;  %v1175_v49 = vsel %vm7840_vm1, %v1172_v7, %v1169_v29  ;;  %v1180_v33 = vadd.f32 1.0, %v1179_v11  ;;  %v1377_v23 = vadd.f32 %v1376_v28, %v7860_v54  ;;  %v7931_v36 = vld [vmem:[%s10009_s3] sm:$0xf] }
 0x220   :  { %10410 = vst [vmem:[#allocation50_spill] sm:$0xff] %v7888_v46  ;;  %v1441_v41 = vmul.f32 %v7871_v35, %v7871_v35  ;;  %vm464_vm5 = vcmp.gt.f32.partialorder %v7621_v53, 20.0  ;;  %v1198_v63 = vadd.f32 1.0, %v1197_v48  ;;  %5507 = vlog2.f32 %v1203_v50 }
 0x221   :  { %v7898_v56 = vadd.f32 %v7709_v24, %v7780_v16  ;;  %v1193_v27 = vsel %vm7879_vm4, %v1190_v25, %v1187_v6  ;;  %vm7902_vm6 = vcmp.lt.f32.partialorder %v1182_v18, 0.0004427343  ;;  %v1200_v28 = vand.u32 2147483647, %v7797_v52 }
 0x222   :  { %v7907_v51 = vpop.eup %5499  ;;  %v1525_v58 = vadd.f32 %v1524_v61, %v1438_v45  ;;  %v1442_v22 = vmul.f32 %v7888_v46, %v7888_v46  ;;  %v7914_v24 = vsel %vm463_vm2, %v7576_v57, %v1175_v49  ;;  %v1178_v16 = vmul.f32 0.6931472, %v5498_v62 }
 0x223   :  { %vm466_vm7 = vcmp.gt.f32.partialorder %v7648_v2, 20.0  ;;  %v5502_v60 = vpop.eup %5501  ;;  %v1357_v5 = vadd.f32 %v1356_v9, %v7871_v35  ;;  %v1181_v37 = vmul.f32 %v7772_v26, %v1180_v33  ;;  %v1206_v11 = vmul.f32 -0.5, %v7866_v38  ;;  %v10416_v33 = vld [vmem:[#allocation12_spill] sm:$0xff] }
 0x224   :  { %v1221_v61 = vadd.f32 1.0, %v7907_v51  ;;  %v1505_v21 = vadd.f32 %v1504_v19, %v1441_v41  ;;  %v1378_v20 = vadd.f32 %v1377_v23, %v7888_v46  ;;  %v7925_v57 = vsel %vm465_vm3, %v7590_v13, %v1193_v27 }
 0x225   :  { %10413 = vst [vmem:[#allocation52_spill] sm:$0xff] %v7925_v57  ;;  %v1199_v29 = vmul.f32 %v7797_v52, %v1198_v63  ;;  %v7933_v26 = vpop.eup %5503  ;;  %v1443_v7 = vmul.f32 %v7914_v24, %v7914_v24  ;;  %vm7937_vm8 = vcmp.lt.f32.partialorder %v1200_v28, 0.0004427343  ;;  %vm467_vm9 = vcmp.gt.f32.partialorder %v7744_v30, 20.0  ;;  %v7946_v52 = vld [vmem:[%s10010_s4] sm:$0xf] }
 0x226   :  { %5509 = vlog2.f32 %v1221_v61  ;;  %v1224_v13 = vmul.f32 -0.5, %v7907_v51  ;;  %v5506_v6 = vpop.eup %5505  ;;  %v7948_v25 = vadd.f32 %v1525_v58, %v1442_v22  ;;  %v1184_v18 = vsel %vm7902_vm6, %v1181_v37, %v1178_v16 }
 0x227   :  { %v1196_v9 = vmul.f32 0.6931472, %v5502_v60  ;;  %v1212_v45 = vadd.f32 1.0, %v7933_v26  ;;  %v1316_v17 = vadd.f32 %v7719_v40, %v7914_v24  ;;  %v1445_v50 = vmul.f32 %v7925_v57, %v7925_v57 }
 0x228   :  { %v1207_v62 = vadd.f32 1.0, %v1206_v11  ;;  %v1230_v19 = vadd.f32 1.0, %v5506_v6  ;;  %v1209_v49 = vand.u32 2147483647, %v7866_v38  ;;  %vm469_vm10 = vcmp.gt.f32.partialorder %v7789_v47, 20.0 }
 0x229   :  { %5511 = vlog2.f32 %v1212_v45  ;;  %v7961_v23 = vrot.slane %v7931_v36, %v10416_v33  ;;  %v7965_v41 = vrot.slane %v7946_v52, %v10416_v33  ;;  %v1464_v40 = vadd.f32 %v7730_v55, %v1443_v7 }
 0x22a   :  { %v7971_v63 = vsel %vm464_vm5, %v7621_v53, %v1184_v18  ;;  %v1225_v27 = vadd.f32 1.0, %v1224_v13  ;;  %5513 = vlog2.f32 %v1230_v19  ;;  %v5508_v0 = vpop.eup %5507  ;;  %v1358_v28 = vadd.f32 %v1357_v5, %v7925_v57  ;;  %v10417_v5 = vld [vmem:[#allocation11_spill] sm:$0xff] }
 0x22b   :  { %v1202_v58 = vsel %vm7937_vm8, %v1199_v29, %v1196_v9  ;;  %v1215_v22 = vmul.f32 -0.5, %v7933_v26  ;;  %v1233_v16 = vmul.f32 -0.5, %v5506_v6  ;;  %v1506_v60 = vadd.f32 %v1505_v21, %v1445_v50  ;;  %v10445_v57 = vld [vmem:[#allocation31_spill] sm:$0xff] }
 0x22c   :  { %v1205_v37 = vmul.f32 0.6931472, %v5508_v0  ;;  %v1208_v55 = vmul.f32 %v7866_v38, %v1207_v62  ;;  %v1227_v11 = vand.u32 2147483647, %v7907_v51  ;;  %v1337_v53 = vadd.f32 %v7775_v42, %v7971_v63  ;;  %v10421_v62 = vld [vmem:[#allocation22_spill] sm:$0xff] }
 0x22d   :  { %v1444_v61 = vmul.f32 %v7971_v63, %v7971_v63  ;;  %vm1210_vm11 = vcmp.lt.f32.partialorder %v1209_v49, 0.0004427343  ;;  %v7985_v7 = vrot.slane %v7931_v36, %v10417_v5  ;;  %v7990_v21 = vsel %vm466_vm7, %v7648_v2, %v1202_v58 }
 0x22e   :  { %10418 = vst [vmem:[#allocation58_spill] sm:$0xff] %v7990_v21  ;;  %v1211_v29 = vsel %vm1210_vm11, %v1208_v55, %v1205_v37  ;;  %v1226_v38 = vmul.f32 %v7907_v51, %v1225_v27  ;;  %vm468_vm12 = vcmp.gt.f32.partialorder %v7823_v15, 20.0  ;;  %vm470_vm13 = vcmp.gt.f32.partialorder %v7829_v31, 20.0 }
 0x22f   :  { %v7997_v42 = vrot.slane %v7946_v52, %v10417_v5  ;;  %v8002_v48 = vsel %vm467_vm9, %v7744_v30, %v1211_v29  ;;  %v1216_v13 = vadd.f32 1.0, %v1215_v22  ;;  %v1234_v18 = vadd.f32 1.0, %v1233_v16 }
 0x230   :  { %v1236_v2 = vand.u32 2147483647, %v5506_v6  ;;  %v5510_v9 = vpop.eup %5509  ;;  %v1317_v45 = vadd.f32 %v1316_v17, %v8002_v48  ;;  %v1447_v51 = vmul.f32 %v8002_v48, %v8002_v48  ;;  %vm8007_vm14 = vcmp.lt.f32.partialorder %v1227_v11, 0.0004427343 }
 0x231   :  { %v8013_v19 = vrot.slane %v7931_v36, %v10421_v62  ;;  %v1485_v30 = vadd.f32 %v7898_v56, %v1444_v61  ;;  %v1223_v49 = vmul.f32 0.6931472, %v5510_v9  ;;  %v1218_v27 = vand.u32 2147483647, %v7933_v26 }
 0x232   :  { %v8019_v0 = vrot.slane %v7946_v52, %v10421_v62  ;;  %v1379_v17 = vadd.f32 %v1378_v20, %v7990_v21  ;;  %v1446_v58 = vmul.f32 %v7990_v21, %v7990_v21  ;;  %v1318_v22 = vrot.slane %v1317_v45, 4 }
 0x233   :  { %v1465_v16 = vadd.f32 %v1464_v40, %v1447_v51  ;;  %v5512_v37 = vpop.eup %5511  ;;  %v1229_v55 = vsel %vm8007_vm14, %v1226_v38, %v1223_v49  ;;  %v1217_v56 = vmul.f32 %v7933_v26, %v1216_v13  ;;  %v1235_v11 = vmul.f32 %v5506_v6, %v1234_v18 }
 0x234   :  { %vm8027_vm15 = vcmp.lt.f32.partialorder %v1236_v2, 0.0004427343  ;;  %v5514_v29 = vpop.eup %5513  ;;  %v1319_v9 = vadd.f32 %v1318_v22, %v1317_v45  ;;  %v8034_v20 = vsel %vm469_vm10, %v7789_v47, %v1229_v55  ;;  %v1214_v40 = vmul.f32 0.6931472, %v5512_v37  ;;  %v10424_v2 = vld [vmem:[#allocation14_spill] sm:$0xff] }
 0x235   :  { %v1466_v62 = vrot.slane %v1465_v16, 4  ;;  %v1359_v51 = vadd.f32 %v1358_v28, %v8034_v20  ;;  %v1449_v38 = vmul.f32 %v8034_v20, %v8034_v20  ;;  %vm1219_vm0 = vcmp.lt.f32.partialorder %v1218_v27, 0.0004427343 }
 0x236   :  { %v1232_v26 = vmul.f32 0.6931472, %v5514_v29  ;;  %v1320_v6 = vrot.slane %v1319_v9, 2  ;;  %v1220_v18 = vsel %vm1219_vm0, %v1217_v56, %v1214_v40  ;;  %v8041_v45 = vrot.slane %v7931_v36, %v10424_v2 }
 0x237   :  { %v1467_v13 = vadd.f32 %v1466_v62, %v1465_v16  ;;  %v1360_v50 = vrot.slane %v1359_v51, 4  ;;  %v1507_v49 = vadd.f32 %v1506_v60, %v1449_v38  ;;  %v8046_v47 = vsel %vm468_vm12, %v7823_v15, %v1220_v18 }
 0x238   :  { %v1238_v28 = vsel %vm8027_vm15, %v1235_v11, %v1232_v26  ;;  %v1321_v22 = vadd.f32 %v1320_v6, %v1319_v9  ;;  %v1338_v37 = vadd.f32 %v1337_v53, %v8046_v47  ;;  %v1448_v62 = vmul.f32 %v8046_v47, %v8046_v47 }
 0x239   :  { %v1468_v27 = vrot.slane %v1467_v13, 2  ;;  %v1527_v36 = vadd.f32 %v7948_v25, %v1446_v58  ;;  %v1361_v16 = vadd.f32 %v1360_v50, %v1359_v51  ;;  %v1508_v55 = vrot.slane %v1507_v49, 4 }
 0x23a   :  { %v8057_v60 = vsel %vm470_vm13, %v7829_v31, %v1238_v28  ;;  %v1322_v15 = vrot.slane %v1321_v22, 1  ;;  %v1339_v61 = vrot.slane %v1338_v37, 4  ;;  %v1486_v11 = vadd.f32 %v1485_v30, %v1448_v62 }
 0x23b   :  { %v1469_v56 = vadd.f32 %v1468_v27, %v1467_v13  ;;  %v1362_v29 = vrot.slane %v1361_v16, 2  ;;  %v1509_v9 = vadd.f32 %v1508_v55, %v1507_v49  ;;  %v1380_v53 = vadd.f32 %v1379_v17, %v8057_v60 }
 0x23c   :  { %v1450_v40 = vmul.f32 %v8057_v60, %v8057_v60  ;;  %v1323_v38 = vadd.f32 %v1322_v15, %v1321_v22  ;;  %v1340_v58 = vadd.f32 %v1339_v61, %v1338_v37  ;;  %v1487_v51 = vrot.slane %v1486_v11, 4 }
 0x23d   :  { %v1470_v25 = vrot.slane %v1469_v56, 1  ;;  %v1363_v26 = vadd.f32 %v1362_v29, %v1361_v16  ;;  %v1510_v6 = vrot.slane %v1509_v9, 2  ;;  %v1381_v18 = vrot.slane %v1380_v53, 4 }
 0x23e   :  { %v1528_v31 = vadd.f32 %v1527_v36, %v1450_v40  ;;  %v8062_v28 = vmul.f32 0.0078125, %v1323_v38  ;;  %v1341_v13 = vrot.slane %v1340_v58, 2  ;;  %v1488_v30 = vadd.f32 %v1487_v51, %v1486_v11  ;;  %v10425_v11 = vld [vmem:[#allocation18_spill] sm:$0xff] }
 0x23f   :  { %v1471_v50 = vadd.f32 %v1470_v25, %v1469_v56  ;;  %v1364_v27 = vrot.slane %v1363_v26, 1  ;;  %v1511_v49 = vadd.f32 %v1510_v6, %v1509_v9  ;;  %v1382_v62 = vadd.f32 %v1381_v18, %v1380_v53 }
 0x240   :  { %v1529_v17 = vrot.slane %v1528_v31, 4  ;;  %v1543_v22 = vmul.f32 %v8062_v28, %v8062_v28  ;;  %v1342_v16 = vadd.f32 %v1341_v13, %v1340_v58  ;;  %v1489_v36 = vrot.slane %v1488_v30, 2  ;;  %v10426_v58 = vld [vmem:[#allocation20_spill] sm:$0xff] }
 0x241   :  { %v1539_v55 = vmul.f32 0.0078125, %v1471_v50  ;;  %v1365_v15 = vadd.f32 %v1364_v27, %v1363_v26  ;;  %v1512_v61 = vrot.slane %v1511_v49, 1  ;;  %v1383_v56 = vrot.slane %v1382_v62, 2 }
 0x242   :  { %v1343_v40 = vrot.slane %v1342_v16, 1  ;;  %v1530_v38 = vadd.f32 %v1529_v17, %v1528_v31  ;;  %v1490_v51 = vadd.f32 %v1489_v36, %v1488_v30  ;;  %v1559_v26 = vsub.f32 %v10426_v58, %v8062_v28  ;;  %v10428_v36 = vld [vmem:[#allocation42_spill] sm:$0xff] }
 0x243   :  { %v1547_v29 = vsub.f32 %v1539_v55, %v1543_v22  ;;  %v1513_v53 = vadd.f32 %v1512_v61, %v1511_v49  ;;  %v8070_v25 = vmul.f32 0.0078125, %v1365_v15  ;;  %v1384_v6 = vadd.f32 %v1383_v56, %v1382_v62 }
 0x244   :  { %v1344_v50 = vadd.f32 %v1343_v40, %v1342_v16  ;;  %v1531_v33 = vrot.slane %v1530_v38, 2  ;;  %v1491_v17 = vrot.slane %v1490_v51, 1  ;;  %v10427_v16 = vld [vmem:[#allocation40_spill] sm:$0xff]  ;;  %v1567_v56 = vsub.f32 %v10428_v36, %v8062_v28 }
 0x245   :  { %v1551_v18 = vmax.f32 %v1547_v29, 0.0  ;;  %v1541_v13 = vmul.f32 0.0078125, %v1513_v53  ;;  %v1545_v27 = vmul.f32 %v8070_v25, %v8070_v25  ;;  %v1385_v22 = vrot.slane %v1384_v6, 1 }
 0x246   :  { %v8078_v49 = vmul.f32 0.0078125, %v1344_v50  ;;  %v1532_v30 = vadd.f32 %v1531_v33, %v1530_v38  ;;  %v1492_v15 = vadd.f32 %v1491_v17, %v1490_v51  ;;  %v1563_v61 = vsub.f32 %v10427_v16, %v8062_v28  ;;  %v10429_v33 = vld [vmem:[#allocation19_spill] sm:$0xff]  ;;  %v10431_v17 = vld [vmem:[#allocation25_spill] sm:$0xff]  ;;  %v10432_v16 = vld [vmem:[#allocation28_spill] sm:$0xff] }
 0x247   :  { %v1619_v55 = vadd.f32 2e-05, %v1551_v18  ;;  %v1549_v62 = vsub.f32 %v1541_v13, %v1545_v27  ;;  %v1386_v53 = vadd.f32 %v1385_v22, %v1384_v6  ;;  %v10430_v13 = vld [vmem:[#allocation21_spill] sm:$0xff]  ;;  %v10434_v27 = vld [vmem:[#allocation39_spill] sm:$0xff]  ;;  %v1591_v37 = vsub.f32 %v10444_v8, %v8062_v28 }
 0x248   :  { %v1544_v29 = vmul.f32 %v8078_v49, %v8078_v49  ;;  %v1540_v50 = vmul.f32 0.0078125, %v1492_v15  ;;  %v1533_v58 = vrot.slane %v1532_v30, 1  ;;  %v10433_v22 = vld [vmem:[#allocation37_spill] sm:$0xff]  ;;  %v10440_v38 = vld [vmem:[#allocation55_spill] sm:$0xff] }
 0x249   :  { %5515 = vrsqrt.f32 %v1619_v55  ;;  %v1553_v18 = vmax.f32 %v1549_v62, 0.0  ;;  %v8090_v51 = vmul.f32 0.0078125, %v1386_v53  ;;  %v10435_v55 = vld [vmem:[#allocation46_spill] sm:$0xff]  ;;  %v10438_v62 = vld [vmem:[#allocation56_spill] sm:$0xff]  ;;  %v10439_v53 = vld [vmem:[#allocation53_spill] sm:$0xff]  ;;  %v1583_v46 = vsub.f32 %v10440_v38, %v8062_v28 }
 0x24a   :  { %v1548_v40 = vsub.f32 %v1540_v50, %v1544_v29  ;;  %v1534_v6 = vadd.f32 %v1533_v58, %v1532_v30  ;;  %v1571_v9 = vsub.f32 %v10435_v55, %v8062_v28  ;;  %v10436_v30 = vld [vmem:[#allocation51_spill] sm:$0xff]  ;;  %v10437_v50 = vld [vmem:[#allocation54_spill] sm:$0xff]  ;;  %v1579_v5 = vsub.f32 %v10439_v53, %v8062_v28 }
 0x24b   :  { %v1621_v31 = vadd.f32 2e-05, %v1553_v18  ;;  %v1546_v15 = vmul.f32 %v8090_v51, %v8090_v51  ;;  %v1575_v29 = vsub.f32 %v10436_v30, %v8062_v28  ;;  %v1587_v58 = vsub.f32 %v10443_v34, %v8062_v28 }
 0x24c   :  { %v1552_v36 = vmax.f32 %v1548_v40, 0.0  ;;  %v1542_v18 = vmul.f32 0.0078125, %v1534_v6  ;;  %v10442_v6 = vld [vmem:[#allocation15_spill] sm:$0xff]  ;;  %v1599_v30 = vsub.f32 %v7344_v1, %v8062_v28  ;;  %v1603_v53 = vsub.f32 %v7616_v10, %v8062_v28 }
 0x24d   :  { %5517 = vrsqrt.f32 %v1621_v31  ;;  %v10441_v31 = vld [vmem:[#allocation62_spill] sm:$0xff]  ;;  %v10448_v38 = vsub.f32 %v10425_v11, %v8062_v28 }
 0x24e   :  { %v1620_v54 = vadd.f32 2e-05, %v1552_v36  ;;  %v1550_v55 = vsub.f32 %v1542_v18, %v1546_v15  ;;  %v10446_v15 = vld [vmem:[#allocation29_spill] sm:$0xff] }
 0x24f   :  { %v1595_v18 = vsub.f32 %v10446_v15, %v8062_v28 }
 0x250   :  { %5519 = vrsqrt.f32 %v1620_v54  ;;  %v1554_v36 = vmax.f32 %v1550_v55, 0.0  ;;  %v10447_v55 = vsub.f32 %v8002_v48, %v8062_v28 }
 0x252   :  { %v1622_v1 = vadd.f32 2e-05, %v1554_v36 }
 0x253   :  { %v8134_v40 = vpop.eup %5515 }
 0x254   :  { %v8148_v15 = vmul.f32 %v8134_v40, %v10447_v55  ;;  %v1627_v34 = vmul.f32 %v8134_v40, %v10448_v38  ;;  %v1631_v8 = vmul.f32 %v8134_v40, %v1559_v26  ;;  %v1635_v21 = vmul.f32 %v8134_v40, %v1563_v61 }
 0x255   :  { %v1639_v10 = vmul.f32 %v8134_v40, %v1567_v56  ;;  %v1643_v54 = vmul.f32 %v8134_v40, %v1571_v9  ;;  %v1647_v35 = vmul.f32 %v8134_v40, %v1575_v29  ;;  %5521 = vrsqrt.f32 %v1622_v1 }
 0x256   :  { %v1713_v48 = vmul.f32 %v7985_v7, %v1627_v34  ;;  %v1717_v36 = vmul.f32 %v7985_v7, %v1631_v8  ;;  %v1651_v55 = vmul.f32 %v8134_v40, %v1579_v5  ;;  %v1721_v11 = vmul.f32 %v7985_v7, %v1635_v21 }
 0x257   :  { %v1725_v38 = vmul.f32 %v7985_v7, %v1639_v10  ;;  %v1729_v26 = vmul.f32 %v7985_v7, %v1643_v54  ;;  %v1733_v61 = vmul.f32 %v7985_v7, %v1647_v35  ;;  %v8166_v56 = vpop.eup %5517  ;;  %v1655_v34 = vmul.f32 %v8134_v40, %v1583_v46 }
 0x258   :  { %v1799_v9 = vadd.f32 %v7997_v42, %v1713_v48  ;;  %v1803_v29 = vadd.f32 %v7997_v42, %v1717_v36  ;;  %v1737_v8 = vmul.f32 %v7985_v7, %v1651_v55  ;;  %v10449_v5 = vsub.f32 %v8034_v20, %v8070_v25 }
 0x259   :  { %v1807_v54 = vadd.f32 %v7997_v42, %v1721_v11  ;;  %v1811_v35 = vadd.f32 %v7997_v42, %v1725_v38  ;;  %v1815_v1 = vadd.f32 %v7997_v42, %v1729_v26  ;;  %v1819_v48 = vadd.f32 %v7997_v42, %v1733_v61 }
 0x25a   :  { %v8176_v21 = vmul.f32 %v8166_v56, %v10449_v5  ;;  %v1863_v10 = vpack.c.bf16 %v1803_v29, %v1799_v9  ;;  %v1741_v36 = vmul.f32 %v7985_v7, %v1655_v34  ;;  %v1823_v46 = vadd.f32 %v7997_v42, %v1737_v8  ;;  %v8191_v11 = vpop.eup %5519 }
 0x25b   :  { %v8184_v55 = vpack.c.bf16 %v1811_v35, %v1807_v54  ;;  %v1659_v20 = vmul.f32 %v8134_v40, %v1587_v58  ;;  %v1663_v5 = vmul.f32 %v8134_v40, %v1591_v37  ;;  %v8193_v38 = vpack.c.bf16 %v1819_v48, %v1815_v1 }
 0x25c   :  { %10450 = vst [vmem:[#allocation60_spill] sm:$0xff] %v8176_v21  ;;  %v8189_v21 = vmul.f32 %v8134_v40, %v1595_v18  ;;  %v1827_v26 = vadd.f32 %v7997_v42, %v1741_v36  ;;  %v8197_v61 = vmul.f32 %v8134_v40, %v1599_v30  ;;  %v8200_v9 = vmul.f32 %v8134_v40, %v1603_v53 }
 0x25d   :  { %v10451_v58 = vsub.f32 %v8046_v47, %v8078_v49  ;;  %v10452_v18 = vsub.f32 %v10429_v33, %v8078_v49  ;;  %v10453_v34 = vsub.f32 %v10430_v13, %v8078_v49  ;;  %v10454_v53 = vsub.f32 %v10431_v17, %v8078_v49 }
 0x25e   :  { %v10455_v47 = vsub.f32 %v10432_v16, %v8078_v49  ;;  %v10456_v33 = vsub.f32 %v10433_v22, %v8078_v49  ;;  %v10457_v13 = vsub.f32 %v10434_v27, %v8078_v49  ;;  %v10458_v17 = vsub.f32 %v10437_v50, %v8078_v49 }
 0x25f   :  { %v8206_v37 = vmul.f32 %v8191_v11, %v10451_v58  ;;  %v1628_v29 = vmul.f32 %v8191_v11, %v10452_v18  ;;  %v1632_v30 = vmul.f32 %v8191_v11, %v10453_v34  ;;  %v1636_v8 = vmul.f32 %v8191_v11, %v10454_v53  ;;  %v8243_v34 = vpop.eup %5521 }
 0x260   :  { %v1640_v54 = vmul.f32 %v8191_v11, %v10455_v47  ;;  %v1644_v35 = vmul.f32 %v8191_v11, %v10456_v33  ;;  %v1648_v1 = vmul.f32 %v8191_v11, %v10457_v13  ;;  %v1652_v48 = vmul.f32 %v8191_v11, %v10458_v17 }
 0x261   :  { %v1714_v36 = vmul.f32 %v7961_v23, %v1628_v29  ;;  %v1718_v16 = vmul.f32 %v7961_v23, %v1632_v30  ;;  %v1722_v58 = vmul.f32 %v7961_v23, %v1636_v8  ;;  %v10459_v22 = vsub.f32 %v10438_v62, %v8078_v49 }
 0x262   :  { %v1726_v27 = vmul.f32 %v7961_v23, %v1640_v54  ;;  %v1730_v53 = vmul.f32 %v7961_v23, %v1644_v35  ;;  %v1734_v50 = vmul.f32 %v7961_v23, %v1648_v1  ;;  %v1738_v47 = vmul.f32 %v7961_v23, %v1652_v48  ;;  %v5131_v48 = vld [vmem:[#allocation2 + $0x200] ss:$16 sps:$4 sm:$0xff]  }
 0x263   :  { %v1656_v18 = vmul.f32 %v8191_v11, %v10459_v22  ;;  %v10460_v29 = vsub.f32 %v8057_v60, %v8090_v51  ;;  %v1800_v62 = vadd.f32 %v7965_v41, %v1714_v36  ;;  %v1804_v8 = vadd.f32 %v7965_v41, %v1718_v16 }
 0x264   :  { %v1808_v33 = vadd.f32 %v7965_v41, %v1722_v58  ;;  %v1812_v54 = vadd.f32 %v7965_v41, %v1726_v27  ;;  %v1816_v35 = vadd.f32 %v7965_v41, %v1730_v53  ;;  %v1820_v13 = vadd.f32 %v7965_v41, %v1734_v50  ;;  %v5134_v58 = vld [vmem:[#allocation2 + $0x208] ss:$16 sps:$4 sm:$0xff]  }
 0x265   :  { %v8253_v30 = vmul.f32 %v8243_v34, %v10460_v29  ;;  %v1742_v1 = vmul.f32 %v7961_v23, %v1656_v18  ;;  %v1864_v17 = vpack.c.bf16 %v1804_v8, %v1800_v62  ;;  %v1824_v60 = vadd.f32 %v7965_v41, %v1738_v47 }
 0x266   :  { %v8263_v22 = vpack.c.bf16 %v1827_v26, %v1823_v46  ;;  %v10461_v36 = vsub.f32 %v10441_v31, %v8078_v49  ;;  %v1868_v29 = vpack.c.bf16 %v1812_v54, %v1808_v33  ;;  %v8269_v27 = vpack.c.bf16 %v1820_v13, %v1816_v35  ;;  %v5139_v46 = vld [vmem:[#allocation2 + $0x224] ss:$16 sps:$4 sm:$0xff]   ;;  %v5142_v26 = vld [vmem:[#allocation2 + $0x22c] ss:$16 sps:$4 sm:$0xff]   ;;  %v5137_v35 = vld [vmem:[#allocation2 + $0x220] ss:$16 sps:$4 sm:$0xff]  }
 0x267   :  { %v1828_v53 = vadd.f32 %v7965_v41, %v1742_v1  ;;  %v10462_v18 = vsub.f32 %v10442_v6, %v8078_v49  ;;  %2717 = vmatprep.mubr.bf16.mxu0 %v1864_v17  ;;  %2943 = vmatprep.mubr.bf16.mxu1 %v1864_v17  ;;  %v1745_v31 = vmul.f32 %v7985_v7, %v1659_v20  ;;  %v5145_v1 = vld [vmem:[#allocation2 + $0x244] ss:$16 sps:$4 sm:$0xff]  }
 0x268   :  { %v1660_v16 = vmul.f32 %v8191_v11, %v10461_v36  ;;  %v1749_v62 = vmul.f32 %v7985_v7, %v1663_v5  ;;  %2718 = vmatmul.mubr.bf16.vlgmr.msra.gmra.mrb[32].mxu0 %v1863_v10  ;;  %2944 = vmatmul.mubr.bf16.vlgmr.msra.gmra.mrb[32].mxu1 %v1863_v10  ;;  %v10463_v6 = vsub.f32 %v10445_v57, %v8078_v49  ;;  %v5140_v10 = vld [vmem:[#allocation2 + $0x228] ss:$16 sps:$4 sm:$0xff]   ;;  %v5148_v36 = vld [vmem:[#allocation2 + $0x24c] ss:$16 sps:$4 sm:$0xff]  }
 0x269   :  { %v1664_v50 = vmul.f32 %v8191_v11, %v10462_v18  ;;  %v8279_v8 = vpack.c.bf16 %v1828_v53, %v1824_v60  ;;  %2799 = vmatpush1.bf16.msra.mxu0 %v5131_v48  ;;  %2727 = vmatprep.mubr.bf16.mxu0 %v1868_v29  ;;  %v1831_v20 = vadd.f32 %v7997_v42, %v1745_v31 }
 0x26a   :  { %v1746_v47 = vmul.f32 %v7961_v23, %v1660_v16  ;;  %v1668_v54 = vmul.f32 %v8191_v11, %v10463_v6  ;;  %v1835_v5 = vadd.f32 %v7997_v42, %v1749_v62  ;;  %2953 = vmatprep.mubr.bf16.mxu1 %v1868_v29  ;;  %3025 = vmatpush1.bf16.msra.mxu1 %v5134_v58 }
 0x26b   :  { %v1750_v33 = vmul.f32 %v7961_v23, %v1664_v50  ;;  %v10464_v57 = vsub.f32 %v7374_v43, %v8078_v49  ;;  %2800 = vmatprep.subr.bf16.mxu0 %v5139_v46  ;;  %3026 = vmatprep.subr.bf16.mxu1 %v5142_v26  ;;  %v1753_v29 = vmul.f32 %v7985_v7, %v8189_v21  ;;  %v5143_v26 = vld [vmem:[#allocation2 + $0x240] ss:$16 sps:$4 sm:$0xff]  }
 0x26c   :  { %v1832_v13 = vadd.f32 %v7965_v41, %v1746_v47  ;;  %v1754_v48 = vmul.f32 %v7961_v23, %v1668_v54  ;;  %v8295_v16 = vpack.c.bf16 %v1835_v5, %v1831_v20  ;;  %v1757_v58 = vmul.f32 %v7985_v7, %v8197_v61 }
 0x26d   :  { %v1836_v17 = vadd.f32 %v7965_v41, %v1750_v33  ;;  %v1672_v60 = vmul.f32 %v8191_v11, %v10464_v57  ;;  %v10465_v50 = vsub.f32 %v7661_v44, %v8078_v49  ;;  %2801 = vmatpush1.bf16.msra.mxu0 %v5137_v35  ;;  %v1839_v47 = vadd.f32 %v7997_v42, %v1753_v29  ;;  %v5146_v44 = vld [vmem:[#allocation2 + $0x248] ss:$16 sps:$4 sm:$0xff]   ;;  %v5149_v57 = vld [vmem:[#allocation2 + $0x260] ss:$16 sps:$4 sm:$0xff]  }
 0x26e   :  { %v1840_v43 = vadd.f32 %v7965_v41, %v1754_v48  ;;  %v1843_v21 = vadd.f32 %v7997_v42, %v1757_v58  ;;  %v10466_v61 = vsub.f32 %v7756_v14, %v8078_v49  ;;  %v10467_v62 = vsub.f32 %v7678_v59, %v8062_v28  ;;  %3027 = vmatpush1.bf16.msra.mxu1 %v5140_v10  ;;  %v5154_v14 = vld [vmem:[#allocation2 + $0x26c] ss:$16 sps:$4 sm:$0xff]  }
 0x26f   :  { %v8301_v53 = vpack.c.bf16 %v1836_v17, %v1832_v13  ;;  %v1758_v18 = vmul.f32 %v7961_v23, %v1672_v60  ;;  %v1676_v46 = vmul.f32 %v8191_v11, %v10465_v50  ;;  %2802 = vmatprep.subr.bf16.mxu0 %v5145_v1  ;;  %v1761_v35 = vmul.f32 %v7985_v7, %v8200_v9  ;;  %v5151_v13 = vld [vmem:[#allocation2 + $0x264] ss:$16 sps:$4 sm:$0xff]  }
 0x270   :  { %v1680_v31 = vmul.f32 %v8191_v11, %v10466_v61  ;;  %v1679_v33 = vmul.f32 %v8134_v40, %v10467_v62  ;;  %3028 = vmatprep.subr.bf16.mxu1 %v5148_v36  ;;  %v8323_v20 = vpack.c.bf16 %v1843_v21, %v1839_v47  ;;  %v1612_v10 = vsub.f32 %v7971_v63, %v8078_v49  ;;  %v5152_v49 = vld [vmem:[#allocation2 + $0x268] ss:$16 sps:$4 sm:$0xff]  }
 0x271   :  { %v1844_v6 = vadd.f32 %v7965_v41, %v1758_v18  ;;  %v1762_v54 = vmul.f32 %v7961_v23, %v1676_v46  ;;  %2728 = vmatmul.mubr.bf16.gmra.mrb[36].mxu0 %v8184_v55  ;;  %2954 = vmatmul.mubr.bf16.gmra.mrb[36].mxu1 %v8184_v55  ;;  %v1847_v17 = vadd.f32 %v7997_v42, %v1761_v35  ;;  %v5157_v55 = vld [vmem:[#allocation2 + $0x284] ss:$16 sps:$4 sm:$0xff]   ;;  %v5160_v18 = vld [vmem:[#allocation2 + $0x28c] ss:$16 sps:$4 sm:$0xff]   ;;  %v5158_v62 = vld [vmem:[#allocation2 + $0x288] ss:$16 sps:$4 sm:$0xff]  }
 0x272   :  { %v1766_v5 = vmul.f32 %v7961_v23, %v1680_v31  ;;  %v1765_v59 = vmul.f32 %v7985_v7, %v1679_v33  ;;  %2803 = vmatpush1.bf16.msra.mxu0 %v5143_v26  ;;  %2737 = vmatprep.mubr.bf16.mxu0 %v8269_v27  ;;  %v1684_v63 = vmul.f32 %v8191_v11, %v1612_v10  ;;  %v10469_v47 = vld [vmem:[#allocation48_spill] sm:$0xff]  ;;  %v10471_v31 = vld [vmem:[#allocation47_spill] sm:$0xff] }
 0x273   :  { %v8331_v1 = vpack.c.bf16 %v1844_v6, %v1840_v43  ;;  %v1848_v9 = vadd.f32 %v7965_v41, %v1762_v54  ;;  %2963 = vmatprep.mubr.bf16.mxu1 %v8269_v27  ;;  %3029 = vmatpush1.bf16.msra.mxu1 %v5146_v44  ;;  %v1774_v36 = vmul.f32 %v7961_v23, %v8206_v37  ;;  %v10468_v37 = vld [vmem:[#allocation45_spill] sm:$0xff]  ;;  %v5166_v6 = vld [vmem:[#allocation2 + $0x2ac] ss:$16 sps:$4 sm:$0xff]  }
 0x274   :  { %v1852_v60 = vadd.f32 %v7965_v41, %v1766_v5  ;;  %v1851_v48 = vadd.f32 %v7997_v42, %v1765_v59  ;;  %v1611_v29 = vsub.f32 %v7914_v24, %v8062_v28  ;;  %v1773_v58 = vmul.f32 %v7985_v7, %v8148_v15  ;;  %2804 = vmatprep.subr.bf16.mxu0 %v5151_v13  ;;  %v5155_v28 = vld [vmem:[#allocation2 + $0x280] ss:$16 sps:$4 sm:$0xff]  }
 0x275   :  { %3030 = vmatprep.subr.bf16.mxu1 %v5154_v14  ;;  %v1770_v27 = vmul.f32 %v7961_v23, %v1684_v63  ;;  %v1860_v50 = vadd.f32 %v7965_v41, %v1774_v36  ;;  %v1558_v26 = vsub.f32 %v10468_v37, %v8090_v51  ;;  %v8357_v24 = vrot.slane %v7946_v52, %v10424_v2  ;;  %v10470_v23 = vld [vmem:[#allocation44_spill] sm:$0xff]  ;;  %v5161_v59 = vld [vmem:[#allocation2 + $0x2a0] ss:$16 sps:$4 sm:$0xff]  }
 0x276   :  { %v8346_v43 = vpack.c.bf16 %v1852_v60, %v1848_v9  ;;  %v8348_v11 = vpack.c.bf16 %v1851_v48, %v1847_v17  ;;  %v1683_v46 = vmul.f32 %v8134_v40, %v1611_v29  ;;  %2805 = vmatpush1.bf16.msra.mxu0 %v5149_v57  ;;  %v1562_v21 = vsub.f32 %v10469_v47, %v8090_v51  ;;  %v5164_v57 = vld [vmem:[#allocation2 + $0x2a8] ss:$16 sps:$4 sm:$0xff]   ;;  %v5169_v60 = vld [vmem:[#allocation2 + $0x2c4] ss:$16 sps:$4 sm:$0xff]   ;;  %v5172_v48 = vld [vmem:[#allocation2 + $0x2cc] ss:$16 sps:$4 sm:$0xff]  }
 0x277   :  { %v1856_v15 = vadd.f32 %v7965_v41, %v1770_v27  ;;  %v1557_v61 = vsub.f32 %v10470_v23, %v8070_v25  ;;  %v1561_v40 = vsub.f32 %v10471_v31, %v8070_v25  ;;  %3031 = vmatpush1.bf16.msra.mxu1 %v5152_v49  ;;  %2806 = vmatprep.subr.bf16.mxu0 %v5157_v55  ;;  %v5163_v41 = vld [vmem:[#allocation2 + $0x2a4] ss:$16 sps:$4 sm:$0xff]   ;;  %v10473_v27 = vld [vmem:[#allocation26_spill] sm:$0xff] }
 0x278   :  { %v1769_v33 = vmul.f32 %v7985_v7, %v1683_v46  ;;  %v1859_v52 = vadd.f32 %v7997_v42, %v1773_v58  ;;  %v1630_v44 = vmul.f32 %v8243_v34, %v1558_v26  ;;  %3032 = vmatprep.subr.bf16.mxu1 %v5160_v18  ;;  %v1634_v35 = vmul.f32 %v8243_v34, %v1562_v21  ;;  %v10472_v36 = vld [vmem:[#allocation57_spill] sm:$0xff]  ;;  %v5170_v46 = vld [vmem:[#allocation2 + $0x2c8] ss:$16 sps:$4 sm:$0xff]  }
 0x279   :  { %v8369_v54 = vpack.c.bf16 %v1860_v50, %v1856_v15  ;;  %v1629_v13 = vmul.f32 %v8166_v56, %v1557_v61  ;;  %v1633_v14 = vmul.f32 %v8166_v56, %v1561_v40  ;;  %2738 = vmatmul.mubr.bf16.gmra.mrb[40].mxu0 %v8193_v38  ;;  %2964 = vmatmul.mubr.bf16.gmra.mrb[40].mxu1 %v8193_v38  ;;  %v5175_v26 = vld [vmem:[#allocation2 + $0x2e4] ss:$16 sps:$4 sm:$0xff]   ;;  %v10474_v21 = vld [vmem:[#allocation16_spill] sm:$0xff]  ;;  %v5173_v61 = vld [vmem:[#allocation2 + $0x2e0] ss:$16 sps:$4 sm:$0xff]  }
 0x27a   :  { %v1855_v7 = vadd.f32 %v7997_v42, %v1769_v33  ;;  %v1716_v5 = vmul.f32 %v8013_v19, %v1630_v44  ;;  %2807 = vmatpush1.bf16.msra.mxu0 %v5155_v28  ;;  %2747 = vmatprep.mubr.bf16.mxu0 %v8279_v8  ;;  %v1720_v10 = vmul.f32 %v8013_v19, %v1634_v35  ;;  %v5178_v28 = vld [vmem:[#allocation2 + $0x2ec] ss:$16 sps:$4 sm:$0xff]   ;;  %v5176_v40 = vld [vmem:[#allocation2 + $0x2e8] ss:$16 sps:$4 sm:$0xff]  }
 0x27b   :  { %v1715_v9 = vmul.f32 %v8041_v45, %v1629_v13  ;;  %v1719_v17 = vmul.f32 %v8041_v45, %v1633_v14  ;;  %2973 = vmatprep.mubr.bf16.mxu1 %v8279_v8  ;;  %3033 = vmatpush1.bf16.msra.mxu1 %v5158_v62  ;;  %v1565_v29 = vsub.f32 %v10472_v36, %v8070_v25  ;;  %v5167_v8 = vld [vmem:[#allocation2 + $0x2c0] ss:$16 sps:$4 sm:$0xff]   ;;  %v5181_v62 = vld [vmem:[#allocation2 + $0x304] ss:$16 sps:$4 sm:$0xff]  }
 0x27c   :  { %v8383_v38 = vpack.c.bf16 %v1859_v52, %v1855_v7  ;;  %v1802_v42 = vadd.f32 %v8019_v0, %v1716_v5  ;;  %2808 = vmatprep.subr.bf16.mxu0 %v5163_v41  ;;  %3034 = vmatprep.subr.bf16.mxu1 %v5166_v6  ;;  %v1806_v63 = vadd.f32 %v8019_v0, %v1720_v10  ;;  %v5184_v41 = vld [vmem:[#allocation2 + $0x30c] ss:$16 sps:$4 sm:$0xff]  }
 0x27d   :  { %v1801_v49 = vadd.f32 %v8357_v24, %v1715_v9  ;;  %v1805_v55 = vadd.f32 %v8357_v24, %v1719_v17  ;;  %v1569_v50 = vsub.f32 %v10473_v27, %v8070_v25  ;;  %v1637_v37 = vmul.f32 %v8166_v56, %v1565_v29  ;;  %v10476_v7 = vld [vmem:[#allocation30_spill] sm:$0xff]  ;;  %v5193_v27 = vld [vmem:[#allocation2 + $0x344] ss:$16 sps:$4 sm:$0xff]  }
 0x27e   :  { %2809 = vmatpush1.bf16.msra.mxu0 %v5161_v59  ;;  %v8391_v58 = vpack.c.bf16 %v1806_v63, %v1802_v42  ;;  %v1573_v23 = vsub.f32 %v10474_v21, %v8070_v25  ;;  %v1581_v5 = vsub.f32 %v10476_v7, %v8070_v25  ;;  %v10477_v59 = vld [vmem:[#allocation33_spill] sm:$0xff]  ;;  %v5182_v9 = vld [vmem:[#allocation2 + $0x308] ss:$16 sps:$4 sm:$0xff]   ;;  %v5190_v42 = vld [vmem:[#allocation2 + $0x32c] ss:$16 sps:$4 sm:$0xff]  }
 0x27f   :  { %v8393_v18 = vpack.c.bf16 %v1805_v55, %v1801_v49  ;;  %3035 = vmatpush1.bf16.msra.mxu1 %v5164_v57  ;;  %2810 = vmatprep.subr.bf16.mxu0 %v5169_v60  ;;  %v1641_v15 = vmul.f32 %v8166_v56, %v1569_v50  ;;  %v1723_v47 = vmul.f32 %v8041_v45, %v1637_v37  ;;  %v5187_v60 = vld [vmem:[#allocation2 + $0x324] ss:$16 sps:$4 sm:$0xff]   ;;  %v5185_v55 = vld [vmem:[#allocation2 + $0x320] ss:$16 sps:$4 sm:$0xff]  }
 0x280   :  { %3036 = vmatprep.subr.bf16.mxu1 %v5172_v48  ;;  %v1645_v44 = vmul.f32 %v8166_v56, %v1573_v23  ;;  %v1585_v10 = vsub.f32 %v10477_v59, %v8070_v25  ;;  %v1653_v48 = vmul.f32 %v8166_v56, %v1581_v5  ;;  %v5199_v23 = vld [vmem:[#allocation2 + $0x364] ss:$16 sps:$4 sm:$0xff]   ;;  %v5206_v5 = vld [vmem:[#allocation2 + $0x388] ss:$16 sps:$4 sm:$0xff]  }
 0x281   :  { %2748 = vmatmul.mubr.bf16.gmra.mrb[44].mxu0 %v8263_v22  ;;  %2974 = vmatmul.mubr.bf16.gmra.mrb[44].mxu1 %v8263_v22  ;;  %v1727_v31 = vmul.f32 %v8041_v45, %v1641_v15  ;;  %v1809_v33 = vadd.f32 %v8357_v24, %v1723_v47  ;;  %v10475_v22 = vld [vmem:[#allocation17_spill] sm:$0xff]  ;;  %v5194_v47 = vld [vmem:[#allocation2 + $0x348] ss:$16 sps:$4 sm:$0xff]  }
 0x282   :  { %2811 = vmatpush1.bf16.msra.mxu0 %v5167_v8  ;;  %2757 = vmatprep.mubr.bf16.mxu0 %v8301_v53  ;;  %v1577_v52 = vsub.f32 %v10475_v22, %v8070_v25  ;;  %v1731_v13 = vmul.f32 %v8041_v45, %v1645_v44  ;;  %v1657_v63 = vmul.f32 %v8166_v56, %v1585_v10  ;;  %v5188_v8 = vld [vmem:[#allocation2 + $0x328] ss:$16 sps:$4 sm:$0xff]   ;;  %v5205_v22 = vld [vmem:[#allocation2 + $0x384] ss:$16 sps:$4 sm:$0xff]  }
 0x283   :  { %2983 = vmatprep.mubr.bf16.mxu1 %v8301_v53  ;;  %3037 = vmatpush1.bf16.msra.mxu1 %v5170_v46  ;;  %v1813_v6 = vadd.f32 %v8357_v24, %v1727_v31  ;;  %v5179_v53 = vld [vmem:[#allocation2 + $0x300] ss:$16 sps:$4 sm:$0xff]   ;;  %v1739_v36 = vmul.f32 %v8041_v45, %v1653_v48 }
 0x284   :  { %2812 = vmatprep.subr.bf16.mxu0 %v5175_v26  ;;  %3038 = vmatprep.subr.bf16.mxu1 %v5178_v28  ;;  %v1649_v35 = vmul.f32 %v8166_v56, %v1577_v52  ;;  %v1817_v57 = vadd.f32 %v8357_v24, %v1731_v13  ;;  %v1743_v29 = vmul.f32 %v8041_v45, %v1657_v63  ;;  %v5191_v28 = vld [vmem:[#allocation2 + $0x340] ss:$16 sps:$4 sm:$0xff]   ;;  %v10480_v63 = vld [vmem:[#allocation58_spill] sm:$0xff] }
 0x285   :  { %v8414_v14 = vpack.c.bf16 %v1813_v6, %v1809_v33  ;;  %v1825_v46 = vadd.f32 %v8357_v24, %v1739_v36  ;;  %v1589_v26 = vsub.f32 %v7470_v32, %v8070_v25  ;;  %v5200_v33 = vld [vmem:[#allocation2 + $0x368] ss:$16 sps:$4 sm:$0xff]   ;;  %v5209_v36 = vld [vmem:[#allocation2 + $0x3a0] ss:$16 sps:$4 sm:$0xff]  }
 0x286   :  { %2813 = vmatpush1.bf16.msra.mxu0 %v5173_v61  ;;  %v1735_v17 = vmul.f32 %v8041_v45, %v1649_v35  ;;  %v1829_v37 = vadd.f32 %v8357_v24, %v1743_v29  ;;  %v5202_v61 = vld [vmem:[#allocation2 + $0x36c] ss:$16 sps:$4 sm:$0xff]   ;;  %v10481_v29 = vld [vmem:[#allocation27_spill] sm:$0xff] }
 0x287   :  { %3039 = vmatpush1.bf16.msra.mxu1 %v5176_v40  ;;  %2814 = vmatprep.subr.bf16.mxu0 %v5181_v62  ;;  %v1661_v21 = vmul.f32 %v8166_v56, %v1589_v26  ;;  %v1597_v40 = vsub.f32 %v7628_v4, %v8070_v25  ;;  %v5208_v4 = vld [vmem:[#allocation2 + $0x38c] ss:$16 sps:$4 sm:$0xff]  }
 0x288   :  { %3040 = vmatprep.subr.bf16.mxu1 %v5184_v41  ;;  %v1821_v49 = vadd.f32 %v8357_v24, %v1735_v17  ;;  %v8437_v15 = vpack.c.bf16 %v1829_v37, %v1825_v46  ;;  %v5214_v17 = vld [vmem:[#allocation2 + $0x3ac] ss:$16 sps:$4 sm:$0xff]   ;;  %v5217_v46 = vld [vmem:[#allocation2 + $0x3c4] ss:$16 sps:$4 sm:$0xff]  }
 0x289   :  { %2758 = vmatmul.mubr.bf16.gmra.mrb[48].mxu0 %v8295_v16  ;;  %2984 = vmatmul.mubr.bf16.gmra.mrb[48].mxu1 %v8295_v16  ;;  %v5196_v16 = vld [vmem:[#allocation2 + $0x34c] ss:$16 sps:$4 sm:$0xff]   ;;  %v1747_v32 = vmul.f32 %v8041_v45, %v1661_v21  ;;  %v1669_v44 = vmul.f32 %v8166_v56, %v1597_v40 }
 0x28a   :  { %2815 = vmatpush1.bf16.msra.mxu0 %v5179_v53  ;;  %2767 = vmatprep.mubr.bf16.mxu0 %v8331_v1  ;;  %v8431_v50 = vpack.c.bf16 %v1821_v49, %v1817_v57  ;;  %v1605_v53 = vsub.f32 %v7838_v39, %v8070_v25  ;;  %v10479_v57 = vld [vmem:[#allocation24_spill] sm:$0xff]  ;;  %v1614_v49 = vsub.f32 %v10480_v63, %v8090_v51 }
 0x28b   :  { %2993 = vmatprep.mubr.bf16.mxu1 %v8331_v1  ;;  %3041 = vmatpush1.bf16.msra.mxu1 %v5182_v9  ;;  %v1593_v1 = vsub.f32 %v7506_v12, %v8070_v25  ;;  %v5197_v12 = vld [vmem:[#allocation2 + $0x360] ss:$16 sps:$4 sm:$0xff]   ;;  %v1833_v52 = vadd.f32 %v8357_v24, %v1747_v32  ;;  %v1755_v35 = vmul.f32 %v8041_v45, %v1669_v44  ;;  %v5211_v9 = vld [vmem:[#allocation2 + $0x3a4] ss:$16 sps:$4 sm:$0xff]   ;;  %v10483_v32 = vld [vmem:[#allocation60_spill] sm:$0xff] }
 0x28c   :  { %2816 = vmatprep.subr.bf16.mxu0 %v5187_v60  ;;  %3042 = vmatprep.subr.bf16.mxu1 %v5190_v42  ;;  %v1566_v60 = vsub.f32 %v10479_v57, %v8090_v51  ;;  %v1677_v42 = vmul.f32 %v8166_v56, %v1605_v53  ;;  %v1775_v40 = vmul.f32 %v8041_v45, %v10483_v32  ;;  %v5223_v44 = vld [vmem:[#allocation2 + $0x3e4] ss:$16 sps:$4 sm:$0xff]   ;;  %v5221_v53 = vld [vmem:[#allocation2 + $0x3e0] ss:$16 sps:$4 sm:$0xff]   ;;  %v5231_v63 = vld [vmem:[#allocation5 + $0x48] sm:$0xff]  }
 0x28d   :  { %v1665_v31 = vmul.f32 %v8166_v56, %v1593_v1  ;;  %v1841_v10 = vadd.f32 %v8357_v24, %v1755_v35  ;;  %v5229_v57 = vld [vmem:[#allocation5 + $0xc0] sm:$0xff]   ;;  %v10489_v32 = vld [vmem:[#allocation36_spill] sm:$0xff] }
 0x28e   :  { %2817 = vmatpush1.bf16.msra.mxu0 %v5185_v55  ;;  %v1776_v55 = vmul.f32 %v8013_v19, %v8253_v30  ;;  %v1638_v37 = vmul.f32 %v8243_v34, %v1566_v60  ;;  %v1686_v30 = vmul.f32 %v8243_v34, %v1614_v49  ;;  %v5233_v49 = vld [vmem:[#allocation5 + $0xc8] sm:$0xff]  }
 0x28f   :  { %3043 = vmatpush1.bf16.msra.mxu1 %v5188_v8  ;;  %2818 = vmatprep.subr.bf16.mxu0 %v5193_v27  ;;  %v1751_v62 = vmul.f32 %v8041_v45, %v1665_v31  ;;  %v1570_v8 = vsub.f32 %v10481_v29, %v8090_v51  ;;  %v1763_v27 = vmul.f32 %v8041_v45, %v1677_v42  ;;  %v5228_v42 = vld [vmem:[#allocation5] sm:$0xff]   ;;  %v10487_v29 = vld [vmem:[#allocation34_spill] sm:$0xff] }
 0x290   :  { %3044 = vmatprep.subr.bf16.mxu1 %v5196_v16 }
 0x291   :  { %2768 = vmatmul.mubr.bf16.gmra.mrb[52].mxu0 %v8323_v20  ;;  %2994 = vmatmul.mubr.bf16.gmra.mrb[52].mxu1 %v8323_v20  ;;  %v1601_v20 = vsub.f32 %v7702_v3, %v8070_v25  ;;  %v1837_v41 = vadd.f32 %v8357_v24, %v1751_v62  ;;  %v10478_v3 = vld [vmem:[#allocation49_spill] sm:$0xff]  ;;  %v1642_v1 = vmul.f32 %v8243_v34, %v1570_v8 }
 0x292   :  { %2819 = vmatpush1.bf16.msra.mxu0 %v5191_v28  ;;  %2777 = vmatprep.mubr.bf16.mxu0 %v8346_v43  ;;  %v1609_v7 = vsub.f32 %v10478_v3, %v8070_v25  ;;  %v5220_v28 = vld [vmem:[#allocation2 + $0x3cc] ss:$16 sps:$4 sm:$0xff]   ;;  %v10485_v3 = vld [vmem:[#allocation23_spill] sm:$0xff]  ;;  %v1586_v8 = vsub.f32 %v10487_v29, %v8090_v51  ;;  %v5251_v29 = vld [vmem:[#allocation5 + $0x70] sm:$0xff]  }
 0x293   :  { %3003 = vmatprep.mubr.bf16.mxu1 %v8346_v43  ;;  %3045 = vmatpush1.bf16.msra.mxu1 %v5194_v47  ;;  %v1673_v6 = vmul.f32 %v8166_v56, %v1601_v20  ;;  %v5203_v43 = vld [vmem:[#allocation2 + $0x380] ss:$16 sps:$4 sm:$0xff]   ;;  %v8458_v13 = vpack.c.bf16 %v1837_v41, %v1833_v52  ;;  %v1849_v47 = vadd.f32 %v8357_v24, %v1763_v27 }
 0x294   :  { %2820 = vmatprep.subr.bf16.mxu0 %v5199_v23  ;;  %3046 = vmatprep.subr.bf16.mxu1 %v5202_v61  ;;  %v1681_v39 = vmul.f32 %v8166_v56, %v1609_v7  ;;  %v1862_v23 = vadd.f32 %v8019_v0, %v1776_v55  ;;  %v10482_v61 = vld [vmem:[#allocation52_spill] sm:$0xff]  ;;  %v1861_v20 = vadd.f32 %v8357_v24, %v1775_v40 }
 0x295   :  { %v1759_v59 = vmul.f32 %v8041_v45, %v1673_v6  ;;  %v1613_v31 = vsub.f32 %v10482_v61, %v8070_v25  ;;  %v1724_v25 = vmul.f32 %v8013_v19, %v1638_v37  ;;  %v1728_v41 = vmul.f32 %v8013_v19, %v1642_v1  ;;  %v10484_v6 = vld [vmem:[#allocation63_spill] sm:$0xff]  ;;  %v10486_v55 = vld [vmem:[#allocation32_spill] sm:$0xff]  ;;  %v5236_v1 = vld [vmem:[#allocation5 + $0x10] sm:$0xff]  }
 0x296   :  { %2821 = vmatpush1.bf16.msra.mxu0 %v5197_v12  ;;  %v1767_v16 = vmul.f32 %v8041_v45, %v1681_v39  ;;  %v5215_v12 = vld [vmem:[#allocation2 + $0x3c0] ss:$16 sps:$4 sm:$0xff]   ;;  %v1574_v35 = vsub.f32 %v10484_v6, %v8090_v51  ;;  %v1578_v7 = vsub.f32 %v10485_v3, %v8090_v51  ;;  %v1658_v37 = vmul.f32 %v8243_v34, %v1586_v8 }
 0x297   :  { %3047 = vmatpush1.bf16.msra.mxu1 %v5200_v33  ;;  %2822 = vmatprep.subr.bf16.mxu0 %v5205_v22  ;;  %v1845_v48 = vadd.f32 %v8357_v24, %v1759_v59  ;;  %v5218_v33 = vld [vmem:[#allocation2 + $0x3c8] ss:$16 sps:$4 sm:$0xff]   ;;  %v1685_v52 = vmul.f32 %v8166_v56, %v1613_v31  ;;  %v10488_v61 = vld [vmem:[#allocation35_spill] sm:$0xff]  ;;  %v1594_v40 = vsub.f32 %v10489_v32, %v8090_v51  ;;  %v5252_v8 = vld [vmem:[#allocation5 + $0x30] sm:$0xff]  }
 0x298   :  { %3048 = vmatprep.subr.bf16.mxu1 %v5208_v4  ;;  %v1853_v21 = vadd.f32 %v8357_v24, %v1767_v16  ;;  %v5226_v4 = vld [vmem:[#allocation2 + $0x3ec] ss:$16 sps:$4 sm:$0xff]   ;;  %v1590_v31 = vsub.f32 %v10488_v61, %v8090_v51 }
 0x299   :  { %2778 = vmatmul.mubr.bf16.gmra.mrb[56].mxu0 %v8348_v11  ;;  %3004 = vmatmul.mubr.bf16.gmra.mrb[56].mxu1 %v8348_v11  ;;  %v5212_v11 = vld [vmem:[#allocation2 + $0x3a8] ss:$16 sps:$4 sm:$0xff]   ;;  %v8484_v26 = vpack.c.bf16 %v1845_v48, %v1841_v10  ;;  %v1771_v56 = vmul.f32 %v8041_v45, %v1685_v52  ;;  %v5227_v10 = vld [vmem:[#allocation5 + $0x40] sm:$0xff]   ;;  %v1810_v45 = vadd.f32 %v8019_v0, %v1724_v25 }
 0x29a   :  { %2823 = vmatpush1.bf16.msra.mxu0 %v5203_v43  ;;  %2787 = vmatprep.mubr.bf16.mxu0 %v8369_v54  ;;  %v8496_v62 = vpack.c.bf16 %v1853_v21, %v1849_v47  ;;  %v5230_v48 = vld [vmem:[#allocation5 + $0x80] sm:$0xff]   ;;  %v5232_v16 = vld [vmem:[#allocation5 + $0x8] sm:$0xff]   ;;  %v1666_v52 = vmul.f32 %v8243_v34, %v1594_v40  ;;  %v10496_v40 = vld [vmem:[#allocation22_spill] sm:$0xff] }
 0x29b   :  { %3013 = vmatprep.mubr.bf16.mxu1 %v8369_v54  ;;  %3049 = vmatpush1.bf16.msra.mxu1 %v5206_v5  ;;  %v1772_v54 = vmul.f32 %v8013_v19, %v1686_v30  ;;  %v5224_v5 = vld [vmem:[#allocation2 + $0x3e8] ss:$16 sps:$4 sm:$0xff]   ;;  %v1857_v59 = vadd.f32 %v8357_v24, %v1771_v56  ;;  %v5235_v30 = vld [vmem:[#allocation5 + $0x50] sm:$0xff]  }
 0x29c   :  { %2824 = vmatprep.subr.bf16.mxu0 %v5211_v9  ;;  %3050 = vmatprep.subr.bf16.mxu1 %v5214_v17  ;;  %v1814_v9 = vadd.f32 %v8019_v0, %v1728_v41  ;;  %v1650_v17 = vmul.f32 %v8243_v34, %v1578_v7  ;;  %v10491_v41 = vld [vmem:[#allocation41_spill] sm:$0xff] }
 0x29d   :  { %v1858_v22 = vadd.f32 %v8019_v0, %v1772_v54  ;;  %v8519_v60 = vpack.c.bf16 %v1861_v20, %v1857_v59  ;;  %v1744_v54 = vmul.f32 %v8013_v19, %v1658_v37  ;;  %v1602_v6 = vsub.f32 %v10491_v41, %v8090_v51  ;;  %v5257_v37 = vld [vmem:[#allocation5 + $0xf8] sm:$0xff]  }
 0x29e   :  { %2825 = vmatpush1.bf16.msra.mxu0 %v5209_v36  ;;  %v1870_v39 = vpack.c.bf16 %v1814_v9, %v1810_v45  ;;  %v1736_v24 = vmul.f32 %v8013_v19, %v1650_v17  ;;  %v1582_v36 = vsub.f32 %v10486_v55, %v8090_v51  ;;  %v5246_v55 = vld [vmem:[#allocation5 + $0xa0] sm:$0xff]  }
 0x29f   :  { %3051 = vmatpush1.bf16.msra.mxu1 %v5212_v11  ;;  %2826 = vmatprep.subr.bf16.mxu0 %v5217_v46  ;;  %v8507_v43 = vpack.c.bf16 %v1862_v23, %v1858_v22  ;;  %v5238_v23 = vld [vmem:[#allocation5 + $0x90] sm:$0xff]   ;;  %v1662_v22 = vmul.f32 %v8243_v34, %v1590_v31  ;;  %v1674_v3 = vmul.f32 %v8243_v34, %v1602_v6 }
 0x2a0   :  { %3052 = vmatprep.subr.bf16.mxu1 %v5220_v28  ;;  %v1822_v11 = vadd.f32 %v8019_v0, %v1736_v24  ;;  %v1654_v46 = vmul.f32 %v8243_v34, %v1582_v36  ;;  %v5237_v28 = vld [vmem:[#allocation5 + $0xd0] sm:$0xff]   ;;  %v5249_v36 = vld [vmem:[#allocation5 + $0xe8] sm:$0xff]  }
 0x2a1   :  { %2788 = vmatmul.mubr.bf16.gmra.mrb[60].mxu0 %v8383_v38  ;;  %3014 = vmatmul.mubr.bf16.gmra.mrb[60].mxu1 %v8383_v38  ;;  %v1646_v38 = vmul.f32 %v8243_v34, %v1574_v35 }
 0x2a2   :  { %2827 = vmatpush1.bf16.msra.mxu0 %v5215_v12  ;;  %2830 = vmatprep.mubr.bf16.mxu0 %v8391_v58  ;;  %v1740_v21 = vmul.f32 %v8013_v19, %v1654_v46  ;;  %v5256_v46 = vld [vmem:[#allocation5 + $0x38] sm:$0xff]  }
 0x2a3   :  { %3053 = vmatpush1.bf16.msra.mxu1 %v5218_v33  ;;  %3056 = vmatprep.mubr.bf16.mxu1 %v8391_v58  ;;  %v1732_v58 = vmul.f32 %v8013_v19, %v1646_v38  ;;  %v1830_v33 = vadd.f32 %v8019_v0, %v1744_v54  ;;  %v10492_v38 = vld [vmem:[#allocation43_spill] sm:$0xff]  ;;  %v10495_v54 = vld [vmem:[#allocation12_spill] sm:$0xff] }
 0x2a4   :  { %2828 = vmatprep.subr.bf16.mxu0 %v5223_v44  ;;  %3054 = vmatprep.subr.bf16.mxu1 %v5226_v4  ;;  %v1826_v12 = vadd.f32 %v8019_v0, %v1740_v21  ;;  %v1752_v44 = vmul.f32 %v8013_v19, %v1666_v52  ;;  %v10490_v4 = vld [vmem:[#allocation38_spill] sm:$0xff]  ;;  %v1606_v59 = vsub.f32 %v10492_v38, %v8090_v51 }
 0x2a5   :  { %v1818_v27 = vadd.f32 %v8019_v0, %v1732_v58  ;;  %v1598_v25 = vsub.f32 %v10490_v4, %v8090_v51 }
 0x2a6   :  { %2829 = vmatpush1.bf16.msra.mxu0 %v5221_v53  ;;  %v1878_v20 = vpack.c.bf16 %v1830_v33, %v1826_v12  ;;  %v1838_v56 = vadd.f32 %v8019_v0, %v1752_v44 }
 0x2a7   :  { %3055 = vmatpush1.bf16.msra.mxu1 %v5224_v5  ;;  %4757 = vmatprep.subr.bf16.mxu0 %v5227_v10  ;;  %v1874_v47 = vpack.c.bf16 %v1822_v11, %v1818_v27  ;;  %v1670_v53 = vmul.f32 %v8243_v34, %v1598_v25  ;;  %v10493_v10 = vld [vmem:[#allocation50_spill] sm:$0xff]  ;;  %v5253_v27 = vld [vmem:[#allocation5 + $0xf0] sm:$0xff]  }
 0x2a8   :  { %4821 = vmatprep.subr.bf16.mxu1 %v5229_v57  ;;  %v1610_v45 = vsub.f32 %v10493_v10, %v8090_v51  ;;  %v1678_v57 = vmul.f32 %v8243_v34, %v1606_v59  ;;  %v5255_v11 = vld [vmem:[#allocation5 + $0x78] sm:$0xff]  }
 0x2a9   :  { %2831 = vmatmul.mubr.bf16.vlgmr.msra.gmra.mrb[32].mxu0 %v8393_v18  ;;  %v1756_v5 = vmul.f32 %v8013_v19, %v1670_v53 }
 0x2aa   :  { %3057 = vmatmul.mubr.bf16.vlgmr.msra.gmra.mrb[32].mxu1 %v8393_v18  ;;  %2840 = vmatprep.mubr.bf16.mxu0 %v1870_v39  ;;  %v5234_v18 = vld [vmem:[#allocation5 + $0x88] sm:$0xff]   ;;  %v1682_v58 = vmul.f32 %v8243_v34, %v1610_v45  ;;  %v5241_v34 = vld [vmem:[#allocation5 + $0xd8] sm:$0xff]  }
 0x2ab   :  { %3066 = vmatprep.mubr.bf16.mxu1 %v1870_v39  ;;  %4758 = vmatpush3.bf16.msra.mxu0 %v5228_v42  ;;  %v1842_v9 = vadd.f32 %v8019_v0, %v1756_v5  ;;  %v1764_v39 = vmul.f32 %v8013_v19, %v1678_v57 }
 0x2ac   :  { %4822 = vmatpush3.bf16.msra.mxu1 %v5230_v48  ;;  %4759 = vmatprep.subr.bf16.mxu0 %v5231_v63  ;;  %v5244_v63 = vld [vmem:[#allocation5 + $0x20] sm:$0xff]  }
 0x2ad   :  { %4823 = vmatprep.subr.bf16.mxu1 %v5233_v49  ;;  %v1850_v51 = vadd.f32 %v8019_v0, %v1764_v39  ;;  %v5245_v49 = vld [vmem:[#allocation5 + $0xe0] sm:$0xff]  }
 0x2af   :  { %4760 = vmatpush3.bf16.msra.mxu0 %v5232_v16  ;;  %v5254_v16 = vld [vmem:[#allocation5 + $0xb0] sm:$0xff]  }
 0x2b0   :  { %4824 = vmatpush3.bf16.msra.mxu1 %v5234_v18  ;;  %4761 = vmatprep.subr.bf16.mxu0 %v5235_v30  ;;  %v5258_v18 = vld [vmem:[#allocation5 + $0xb8] sm:$0xff]   ;;  %v2023_v30 = vld [vmem:[%s10012_s6] sm:$0xf] }
 0x2b1   :  { %2841 = vmatmul.mubr.bf16.gmra.mrb[36].mxu0 %v8414_v14  ;;  %4825 = vmatprep.subr.bf16.mxu1 %v5237_v28  ;;  %v10494_v28 = vld [vmem:[#allocation11_spill] sm:$0xff]  ;;  %v8599_v12 = vrot.slane %v2023_v30, %v10496_v40 }
 0x2b2   :  { %3067 = vmatmul.mubr.bf16.gmra.mrb[36].mxu1 %v8414_v14  ;;  %2850 = vmatprep.mubr.bf16.mxu0 %v1874_v47  ;;  %v1748_v14 = vmul.f32 %v8013_v19, %v1662_v22 }
 0x2b3   :  { %3076 = vmatprep.mubr.bf16.mxu1 %v1874_v47  ;;  %4762 = vmatpush3.bf16.msra.mxu0 %v5236_v1  ;;  %v8587_v1 = vrot.slane %v2023_v30, %v10494_v28  ;;  %v8590_v47 = vrot.slane %v2023_v30, %v10424_v2 }
 0x2b4   :  { %4826 = vmatpush3.bf16.msra.mxu1 %v5238_v23  ;;  %v1834_v35 = vadd.f32 %v8019_v0, %v1748_v14  ;;  %v8593_v23 = vrot.slane %v2023_v30, %v10495_v54 }
 0x2b5   :  { %4827 = vmatprep.subr.bf16.mxu1 %v5241_v34 }
 0x2b6   :  { %v1882_v7 = vpack.c.bf16 %v1838_v56, %v1834_v35 }
 0x2b9   :  { %2851 = vmatmul.mubr.bf16.gmra.mrb[40].mxu0 %v8431_v50 }
 0x2ba   :  { %3077 = vmatmul.mubr.bf16.gmra.mrb[40].mxu1 %v8431_v50  ;;  %2860 = vmatprep.mubr.bf16.mxu0 %v1878_v20  ;;  %v1760_v50 = vmul.f32 %v8013_v19, %v1674_v3 }
 0x2bb   :  { %3086 = vmatprep.mubr.bf16.mxu1 %v1878_v20 }
 0x2bc   :  { %v1846_v17 = vadd.f32 %v8019_v0, %v1760_v50 }
 0x2be   :  { %v1886_v42 = vpack.c.bf16 %v1846_v17, %v1842_v9 }
 0x2c1   :  { %2861 = vmatmul.mubr.bf16.gmra.mrb[44].mxu0 %v8437_v15 }
 0x2c2   :  { %3087 = vmatmul.mubr.bf16.gmra.mrb[44].mxu1 %v8437_v15  ;;  %2870 = vmatprep.mubr.bf16.mxu0 %v1882_v7  ;;  %v1768_v15 = vmul.f32 %v8013_v19, %v1682_v58  ;;  %v5239_v19 = vld [vmem:[#allocation5 + $0x58] sm:$0xff]  }
 0x2c3   :  { %3096 = vmatprep.mubr.bf16.mxu1 %v1882_v7  ;;  %4763 = vmatprep.subr.bf16.mxu0 %v5239_v19 }
 0x2c4   :  { %v1854_v24 = vadd.f32 %v8019_v0, %v1768_v15  ;;  %v5240_v0 = vld [vmem:[#allocation5 + $0x18] sm:$0xff]  }
 0x2c5   :  { %4764 = vmatpush3.bf16.msra.mxu0 %v5240_v0 }
 0x2c6   :  { %v1890_v48 = vpack.c.bf16 %v1854_v24, %v1850_v51 }
 0x2c9   :  { %2871 = vmatmul.mubr.bf16.gmra.mrb[48].mxu0 %v8458_v13 }
 0x2ca   :  { %3097 = vmatmul.mubr.bf16.gmra.mrb[48].mxu1 %v8458_v13  ;;  %2880 = vmatprep.mubr.bf16.mxu0 %v1886_v42  ;;  %v5242_v13 = vld [vmem:[#allocation5 + $0x98] sm:$0xff]  }
 0x2cb   :  { %3106 = vmatprep.mubr.bf16.mxu1 %v1886_v42  ;;  %4828 = vmatpush3.bf16.msra.mxu1 %v5242_v13 }
 0x2cc   :  { %4829 = vmatprep.subr.bf16.mxu1 %v5245_v49 }
 0x2cf   :  { %4830 = vmatpush3.bf16.msra.mxu1 %v5246_v55 }
 0x2d0   :  { %4831 = vmatprep.subr.bf16.mxu1 %v5249_v36 }
 0x2d1   :  { %2881 = vmatmul.mubr.bf16.gmra.mrb[52].mxu0 %v8484_v26 }
 0x2d2   :  { %3107 = vmatmul.mubr.bf16.gmra.mrb[52].mxu1 %v8484_v26  ;;  %2890 = vmatprep.mubr.bf16.mxu0 %v1890_v48  ;;  %v5243_v26 = vld [vmem:[#allocation5 + $0x60] sm:$0xff]  }
 0x2d3   :  { %3116 = vmatprep.mubr.bf16.mxu1 %v1890_v48  ;;  %4765 = vmatprep.subr.bf16.mxu0 %v5243_v26 }
 0x2d4   :  { %4766 = vmatpush3.bf16.msra.mxu0 %v5244_v63 }
 0x2d9   :  { %2891 = vmatmul.mubr.bf16.gmra.mrb[56].mxu0 %v8496_v62 }
 0x2da   :  { %3117 = vmatmul.mubr.bf16.gmra.mrb[56].mxu1 %v8496_v62  ;;  %2900 = vmatprep.mubr.bf16.mxu0 %v8507_v43  ;;  %v5247_v62 = vld [vmem:[#allocation5 + $0x68] sm:$0xff]  }
 0x2db   :  { %3126 = vmatprep.mubr.bf16.mxu1 %v8507_v43  ;;  %v5248_v43 = vld [vmem:[#allocation5 + $0x28] sm:$0xff]   ;;  %4767 = vmatprep.subr.bf16.mxu0 %v5247_v62 }
 0x2dc   :  { %4768 = vmatpush3.bf16.msra.mxu0 %v5248_v43 }
 0x2dd   :  { %4769 = vmatprep.subr.bf16.mxu0 %v5251_v29 }
 0x2e0   :  { %4770 = vmatpush3.bf16.msra.mxu0 %v5252_v8 }
 0x2e1   :  { %2901 = vmatmul.mubr.bf16.gmra.mrb[60].mxu0 %v8519_v60  ;;  %4771 = vmatprep.subr.bf16.mxu0 %v5255_v11 }
 0x2e2   :  { %3127 = vmatmul.mubr.bf16.gmra.mrb[60].mxu1 %v8519_v60  ;;  %v5250_v60 = vld [vmem:[#allocation5 + $0xa8] sm:$0xff]  }
 0x2e3   :  { %4832 = vmatpush3.bf16.msra.mxu1 %v5250_v60 }
 0x2e4   :  { %4833 = vmatprep.subr.bf16.mxu1 %v5253_v27  ;;  %4772 = vmatpush3.bf16.msra.mxu0 %v5256_v46 }
 0x2e7   :  { %4834 = vmatpush3.bf16.msra.mxu1 %v5254_v16 }
 0x2e8   :  { %4835 = vmatprep.subr.bf16.mxu1 %v5257_v37 }
 0x2eb   :  { %4836 = vmatpush3.bf16.msra.mxu1 %v5258_v18 }
 0x37c   :  { %v2832_v21 = vpop.f32.mrb[32].mxu0 }
 0x37d   :  { %v8596_v61 = vadd.f32 %v2832_v21, %v8587_v1  ;;  %v3058_v31 = vpop.f32.mrb[32].mxu1  ;;  %v2834_v32 = vpop.f32.mrb[33].mxu0 }
 0x37e   :  { %v8602_v33 = vadd.f32 %v3058_v31, %v8590_v47  ;;  %v3060_v22 = vpop.f32.mrb[33].mxu1  ;;  %v2836_v52 = vpop.f32.mrb[34].mxu0  ;;  %v8610_v25 = vadd.f32 %v2834_v32, %v8593_v23 }
 0x37f   :  { %v3201_v2 = vmin.f32 %v8596_v61, 20.0  ;;  %v8606_v20 = vadd.f32 %v2836_v52, %v8587_v1  ;;  %v3062_v14 = vpop.f32.mrb[34].mxu1  ;;  %v2838_v44 = vpop.f32.mrb[35].mxu0  ;;  %v8613_v35 = vadd.f32 %v3060_v22, %v8599_v12  ;;  %vm3137_vm2 = vcmp.gt.f32.partialorder %v8596_v61, 20.0 }
 0x380   :  { %v3203_v4 = vmin.f32 %v8602_v33, 20.0  ;;  %v3064_v41 = vpop.f32.mrb[35].mxu1  ;;  %v8617_v3 = vadd.f32 %v3062_v14, %v8590_v47  ;;  %v8620_v7 = vadd.f32 %v2838_v44, %v8593_v23  ;;  %v3202_v50 = vmin.f32 %v8610_v25, 20.0 }
 0x381   :  { %v3265_v6 = vmul.f32 1.442695, %v3201_v2  ;;  %v3205_v53 = vmin.f32 %v8606_v20, 20.0  ;;  %v8623_v5 = vadd.f32 %v3064_v41, %v8599_v12  ;;  %v3204_v45 = vmin.f32 %v8613_v35, 20.0 }
 0x382   :  { %v3269_v56 = vmul.f32 1.442695, %v3203_v4  ;;  %v3207_v59 = vmin.f32 %v8617_v3, 20.0  ;;  %v3206_v58 = vmin.f32 %v8620_v7, 20.0  ;;  %v3267_v48 = vmul.f32 1.442695, %v3202_v50 }
 0x383   :  { %5523 = vpow2.f32 %v3265_v6  ;;  %v3273_v38 = vmul.f32 1.442695, %v3205_v53  ;;  %v3208_v15 = vmin.f32 %v8623_v5, 20.0  ;;  %v3271_v0 = vmul.f32 1.442695, %v3204_v45 }
 0x384   :  { %5525 = vpow2.f32 %v3269_v56  ;;  %v2842_v10 = vpop.f32.mrb[36].mxu0  ;;  %v3277_v57 = vmul.f32 1.442695, %v3207_v59  ;;  %v3275_v34 = vmul.f32 1.442695, %v3206_v58  ;;  %vm3141_vm4 = vcmp.gt.f32.partialorder %v8606_v20, 20.0 }
 0x385   :  { %v3068_v9 = vpop.f32.mrb[36].mxu1  ;;  %v2844_v17 = vpop.f32.mrb[37].mxu0  ;;  %5527 = vpow2.f32 %v3273_v38  ;;  %v8633_v13 = vadd.f32 %v2842_v10, %v8587_v1  ;;  %v3279_v26 = vmul.f32 1.442695, %v3208_v15  ;;  %vm3139_vm5 = vcmp.gt.f32.partialorder %v8602_v33, 20.0 }
 0x386   :  { %v3070_v42 = vpop.f32.mrb[37].mxu1  ;;  %v2846_v39 = vpop.f32.mrb[38].mxu0  ;;  %5529 = vpow2.f32 %v3277_v57  ;;  %v8636_v63 = vadd.f32 %v3068_v9, %v8590_v47  ;;  %v8639_v49 = vadd.f32 %v2844_v17, %v8593_v23  ;;  %vm3143_vm6 = vcmp.gt.f32.partialorder %v8617_v3, 20.0 }
 0x387   :  { %v3072_v51 = vpop.f32.mrb[38].mxu1  ;;  %v2848_v24 = vpop.f32.mrb[39].mxu0  ;;  %10497 = vst [vmem:[#allocation61_spill] sm:$0xff] %v8633_v13  ;;  %5531 = vpow2.f32 %v3267_v48  ;;  %v3209_v8 = vmin.f32 %v8633_v13, 20.0  ;;  %v8652_v27 = vadd.f32 %v3070_v42, %v8599_v12  ;;  %v8662_v30 = vadd.f32 %v2846_v39, %v8587_v1 }
 0x388   :  { %v8630_v19 = vpop.f32.mrb[39].mxu1  ;;  %10498 = vst [vmem:[#allocation14_spill] sm:$0xff] %v8636_v63  ;;  %5533 = vpow2.f32 %v3271_v0  ;;  %v3211_v37 = vmin.f32 %v8636_v63, 20.0  ;;  %v3210_v18 = vmin.f32 %v8639_v49, 20.0  ;;  %v8678_v14 = vadd.f32 %v3072_v51, %v8590_v47 }
 0x389   :  { %5535 = vpow2.f32 %v3275_v34  ;;  %10499 = vst [vmem:[#allocation18_spill] sm:$0xff] %v8662_v30  ;;  %v3281_v52 = vmul.f32 1.442695, %v3209_v8  ;;  %v3212_v2 = vmin.f32 %v8652_v27, 20.0  ;;  %v8683_v6 = vadd.f32 %v2848_v24, %v8593_v23 }
 0x38a   :  { %5537 = vpow2.f32 %v3279_v26  ;;  %10500 = vst [vmem:[#allocation20_spill] sm:$0xff] %v8678_v14  ;;  %v3285_v41 = vmul.f32 1.442695, %v3211_v37  ;;  %v3283_v53 = vmul.f32 1.442695, %v3210_v18  ;;  %v3213_v50 = vmin.f32 %v8662_v30, 20.0 }
 0x38b   :  { %v3287_v42 = vmul.f32 1.442695, %v3212_v2  ;;  %v3215_v39 = vmin.f32 %v8678_v14, 20.0  ;;  %v8708_v34 = vadd.f32 %v8630_v19, %v8599_v12  ;;  %vm3138_vm9 = vcmp.gt.f32.partialorder %v8610_v25, 20.0 }
 0x38c   :  { %v2852_v62 = vpop.f32.mrb[40].mxu0  ;;  %vm3142_vm10 = vcmp.gt.f32.partialorder %v8620_v7, 20.0  ;;  %vm3140_vm11 = vcmp.gt.f32.partialorder %v8613_v35, 20.0  ;;  %vm3144_vm0 = vcmp.gt.f32.partialorder %v8623_v5, 20.0 }
 0x38d   :  { %v8641_v55 = vpop.eup %5523  ;;  %v8643_v43 = vpop.f32.mrb[40].mxu1  ;;  %10501 = vst [vmem:[#allocation40_spill] sm:$0xff] %v8708_v34  ;;  %v8722_v18 = vadd.f32 %v2852_v62, %v8587_v1 }
 0x38e   :  { %v8645_v36 = vpop.f32.mrb[41].mxu0  ;;  %v8647_v60 = vpop.eup %5525  ;;  %v3393_v29 = vadd.f32 1.0, %v8641_v55  ;;  %v3396_v54 = vmul.f32 -0.5, %v8641_v55  ;;  %v3399_v56 = vand.u32 2147483647, %v8641_v55 }
 0x38f   :  { %v8654_v16 = vpop.f32.mrb[41].mxu1  ;;  %v8656_v11 = vpop.f32.mrb[42].mxu0  ;;  %v3411_v46 = vadd.f32 1.0, %v8647_v60  ;;  %v3414_v44 = vmul.f32 -0.5, %v8647_v60  ;;  %v3417_v10 = vand.u32 2147483647, %v8647_v60 }
 0x390   :  { %5539 = vlog2.f32 %v3393_v29  ;;  %v8664_v28 = vpop.f32.mrb[42].mxu1  ;;  %v8666_v21 = vpop.eup %5527  ;;  %v3397_v59 = vadd.f32 1.0, %v3396_v54  ;;  %vm8716_vm1 = vcmp.lt.f32.partialorder %v3399_v56, 0.0004427343  ;;  %10504 = vst [vmem:[#allocation42_spill] sm:$0xff] %v8722_v18  ;;  %v3214_v56 = vmin.f32 %v8683_v6, 20.0 }
 0x391   :  { %5541 = vlog2.f32 %v3411_v46  ;;  %v8669_v31 = vpop.f32.mrb[43].mxu0  ;;  %v8671_v32 = vpop.f32.mrb[43].mxu1  ;;  %v3429_v22 = vadd.f32 1.0, %v8666_v21  ;;  %v3432_v45 = vmul.f32 -0.5, %v8666_v21  ;;  %v3415_v48 = vadd.f32 1.0, %v3414_v44 }
 0x392   :  { %v8673_v40 = vpop.eup %5529  ;;  %v3435_v0 = vand.u32 2147483647, %v8666_v21  ;;  %vm8730_vm3 = vcmp.lt.f32.partialorder %v3417_v10, 0.0004427343  ;;  %v3289_v44 = vmul.f32 1.442695, %v3213_v50  ;;  %v8778_v13 = vadd.f32 %v8656_v11, %v8587_v1 }
 0x393   :  { %v3447_v4 = vadd.f32 1.0, %v8673_v40  ;;  %5543 = vlog2.f32 %v3429_v22  ;;  %v8695_v57 = vpop.eup %5531  ;;  %v3450_v58 = vmul.f32 -0.5, %v8673_v40  ;;  %v3453_v37 = vand.u32 2147483647, %v8673_v40 }
 0x394   :  { %v8687_v38 = vpop.f32.mrb[44].mxu0  ;;  %v8703_v24 = vpop.eup %5533  ;;  %v3398_v22 = vmul.f32 %v8641_v55, %v3397_v59  ;;  %v3433_v2 = vadd.f32 1.0, %v3432_v45  ;;  %v8740_v55 = vadd.f32 %v8643_v43, %v8590_v47  ;;  %v3416_v10 = vmul.f32 %v8647_v60, %v3415_v48  ;;  %10514 = vst [vmem:[#allocation28_spill] sm:$0xff] %v8778_v13 }
 0x395   :  { %5545 = vlog2.f32 %v3447_v4  ;;  %v8691_v9 = vpop.f32.mrb[44].mxu1  ;;  %v8693_v17 = vpop.f32.mrb[45].mxu0  ;;  %v3451_v62 = vadd.f32 1.0, %v3450_v58  ;;  %vm8743_vm7 = vcmp.lt.f32.partialorder %v3435_v0, 0.0004427343  ;;  %v3216_v50 = vmin.f32 %v8708_v34, 20.0 }
 0x396   :  { %5547 = vpow2.f32 %v3281_v52  ;;  %v8699_v15 = vpop.f32.mrb[45].mxu1  ;;  %v8701_v51 = vpop.f32.mrb[46].mxu0  ;;  %10507 = vst [vmem:[#allocation19_spill] sm:$0xff] %v8740_v55  ;;  %vm8748_vm8 = vcmp.lt.f32.partialorder %v3453_v37, 0.0004427343  ;;  %v8758_v60 = vadd.f32 %v8645_v36, %v8593_v23  ;;  %v8762_v48 = vadd.f32 %v8654_v16, %v8599_v12 }
 0x397   :  { %5549 = vpow2.f32 %v3285_v41  ;;  %v8710_v26 = vpop.f32.mrb[46].mxu1  ;;  %v8712_v29 = vpop.f32.mrb[47].mxu0  ;;  %v3293_v41 = vmul.f32 1.442695, %v3215_v39  ;;  %v3217_v39 = vmin.f32 %v8722_v18, 20.0  ;;  %v3221_v58 = vmin.f32 %v8778_v13, 20.0 }
 0x398   :  { %v8714_v8 = vpop.eup %5535  ;;  %5551 = vpow2.f32 %v3283_v53  ;;  %v8724_v54 = vpop.f32.mrb[47].mxu1  ;;  %10512 = vst [vmem:[#allocation21_spill] sm:$0xff] %v8758_v60  ;;  %10513 = vst [vmem:[#allocation25_spill] sm:$0xff] %v8762_v48  ;;  %v3291_v18 = vmul.f32 1.442695, %v3214_v56  ;;  %v3220_v52 = vmin.f32 %v8762_v48, 20.0 }
 0x399   :  { %v8726_v19 = vpop.eup %5537  ;;  %5553 = vpow2.f32 %v3287_v42  ;;  %v3295_v30 = vmul.f32 1.442695, %v3216_v50  ;;  %v3297_v56 = vmul.f32 1.442695, %v3217_v39  ;;  %v3218_v50 = vmin.f32 %v8758_v60, 20.0 }
 0x39a   :  { %v5540_v4 = vpop.eup %5539  ;;  %5555 = vpow2.f32 %v3289_v44  ;;  %v8820_v39 = vadd.f32 %v8671_v32, %v8599_v12 }
 0x39b   :  { %v5542_v53 = vpop.eup %5541  ;;  %v3395_v59 = vmul.f32 0.6931472, %v5540_v4  ;;  %v3434_v4 = vmul.f32 %v8666_v21, %v3433_v2  ;;  %5557 = vpow2.f32 %v3293_v41  ;;  %v3219_v21 = vmin.f32 %v8740_v55, 20.0 }
 0x39c   :  { %v3413_v14 = vmul.f32 0.6931472, %v5542_v53  ;;  %v8753_v43 = vpop.f32.mrb[48].mxu0  ;;  %v3452_v53 = vmul.f32 %v8673_v40, %v3451_v62  ;;  %v8788_v55 = vadd.f32 %v8664_v28, %v8590_v47  ;;  %10517 = vst [vmem:[#allocation46_spill] sm:$0xff] %v8820_v39  ;;  %5559 = vpow2.f32 %v3291_v18 }
 0x39d   :  { %v8764_v0 = vpop.f32.mrb[48].mxu1  ;;  %v8766_v37 = vpop.f32.mrb[49].mxu0  ;;  %v3401_v16 = vsel %vm8716_vm1, %v3398_v22, %v3395_v59  ;;  %v3301_v32 = vmul.f32 1.442695, %v3219_v21  ;;  %5561 = vpow2.f32 %v3295_v30  ;;  %v3303_v21 = vmul.f32 1.442695, %v3220_v52 }
 0x39e   :  { %v5544_v42 = vpop.eup %5543  ;;  %v8770_v2 = vpop.f32.mrb[49].mxu1  ;;  %v3419_v62 = vsel %vm8730_vm3, %v3416_v10, %v3413_v14  ;;  %10515 = vst [vmem:[#allocation37_spill] sm:$0xff] %v8788_v55  ;;  %v8802_v14 = vadd.f32 %v8669_v31, %v8593_v23  ;;  %v8809_v28 = vsel %vm3137_vm2, %v8596_v61, %v3401_v16  ;;  %v8843_v16 = vadd.f32 %v8687_v38, %v8587_v1 }
 0x39f   :  { %v8772_v44 = vpop.f32.mrb[50].mxu0  ;;  %v5546_v36 = vpop.eup %5545  ;;  %v3431_v63 = vmul.f32 0.6931472, %v5544_v42  ;;  %v8825_v31 = vsel %vm3139_vm5, %v8602_v33, %v3419_v62  ;;  %v3223_v42 = vmin.f32 %v8788_v55, 20.0  ;;  %v3299_v33 = vmul.f32 1.442695, %v3218_v50 }
 0x3a0   :  { %v8780_v34 = vpop.f32.mrb[50].mxu1  ;;  %v8782_v40 = vpop.eup %5547  ;;  %v3449_v41 = vmul.f32 0.6931472, %v5546_v36  ;;  %10516 = vst [vmem:[#allocation39_spill] sm:$0xff] %v8802_v14  ;;  %v3222_v36 = vmin.f32 %v8802_v14, 20.0  ;;  %10518 = vst [vmem:[#allocation51_spill] sm:$0xff] %v8843_v16  ;;  %v8858_v50 = vadd.f32 %v8693_v17, %v8593_v23  ;;  %5563 = vpow2.f32 %v3297_v56 }
 0x3a1   :  { %v8790_v46 = vpop.f32.mrb[51].mxu0  ;;  %v8792_v22 = vpop.f32.mrb[51].mxu1  ;;  %v3437_v11 = vsel %vm8743_vm7, %v3434_v4, %v3431_v63  ;;  %v3305_v4 = vmul.f32 1.442695, %v3221_v58  ;;  %v8868_v61 = vadd.f32 %v8699_v15, %v8599_v12  ;;  %5565 = vpow2.f32 %v3301_v32 }
 0x3a2   :  { %v8794_v59 = vpop.eup %5549  ;;  %v8814_v45 = vsel %vm3141_vm4, %v8606_v20, %v3437_v11  ;;  %v3455_v63 = vsel %vm8748_vm8, %v3452_v53, %v3449_v41  ;;  %v3224_v11 = vmin.f32 %v8820_v39, 20.0  ;;  %10520 = vst [vmem:[#allocation56_spill] sm:$0xff] %v8858_v50  ;;  %v3309_v17 = vmul.f32 1.442695, %v3223_v42 }
 0x3a3   :  { %v8804_v10 = vpop.eup %5551  ;;  %v8832_v20 = vsel %vm3143_vm6, %v8617_v3, %v3455_v63  ;;  %v8847_v3 = vadd.f32 %v8691_v9, %v8590_v47  ;;  %10521 = vst [vmem:[#allocation53_spill] sm:$0xff] %v8868_v61  ;;  %v3225_v13 = vmin.f32 %v8843_v16, 20.0  ;;  %5567 = vpow2.f32 %v3299_v33 }
 0x3a4   :  { %v8838_v53 = vpop.f32.mrb[52].mxu0  ;;  %v8853_v18 = vpop.eup %5553  ;;  %v3307_v48 = vmul.f32 1.442695, %v3222_v36  ;;  %v8882_v15 = vadd.f32 %v8701_v51, %v8587_v1  ;;  %5569 = vpow2.f32 %v3303_v21  ;;  %v3311_v58 = vmul.f32 1.442695, %v3224_v11 }
 0x3a5   :  { %10519 = vst [vmem:[#allocation54_spill] sm:$0xff] %v8847_v3  ;;  %v8849_v62 = vpop.f32.mrb[52].mxu1  ;;  %v8851_v41 = vpop.f32.mrb[53].mxu0  ;;  %v3227_v56 = vmin.f32 %v8847_v3, 20.0  ;;  %v3226_v14 = vmin.f32 %v8858_v50, 20.0  ;;  %5571 = vpow2.f32 %v3305_v4  ;;  %v3228_v32 = vmin.f32 %v8868_v61, 20.0 }
 0x3a6   :  { %v8860_v38 = vpop.f32.mrb[53].mxu1  ;;  %v8862_v63 = vpop.f32.mrb[54].mxu0  ;;  %10523 = vst [vmem:[#allocation62_spill] sm:$0xff] %v8882_v15  ;;  %v8888_v42 = vadd.f32 %v8710_v26, %v8590_v47  ;;  %v8892_v33 = vadd.f32 %v8712_v29, %v8593_v23  ;;  %5573 = vpow2.f32 %v3309_v17  ;;  %v3313_v36 = vmul.f32 1.442695, %v3225_v13 }
 0x3a7   :  { %v8864_v9 = vpop.eup %5555  ;;  %v8870_v30 = vpop.f32.mrb[54].mxu1  ;;  %v8896_v51 = vadd.f32 %v8724_v54, %v8599_v12  ;;  %5575 = vpow2.f32 %v3307_v48  ;;  %v3317_v4 = vmul.f32 1.442695, %v3227_v56  ;;  %v3229_v11 = vmin.f32 %v8882_v15, 20.0 }
 0x3a8   :  { %v8872_v52 = vpop.f32.mrb[55].mxu0  ;;  %v8874_v55 = vpop.eup %5557  ;;  %10524 = vst [vmem:[#allocation15_spill] sm:$0xff] %v8888_v42  ;;  %10525 = vst [vmem:[#allocation59_spill] sm:$0xff] %v8892_v33  ;;  %5577 = vpow2.f32 %v3311_v58  ;;  %v3315_v29 = vmul.f32 1.442695, %v3226_v14  ;;  %v3231_v13 = vmin.f32 %v8888_v42, 20.0  ;;  %v8915_v56 = vadd.f32 %v8753_v43, %v8587_v1 }
 0x3a9   :  { %10522 = vst [vmem:[#allocation55_spill] sm:$0xff] %v8874_v55  ;;  %v8877_v39 = vpop.f32.mrb[55].mxu1  ;;  %10526 = vst [vmem:[#allocation13_spill] sm:$0xff] %v8896_v51  ;;  %v8905_v16 = vpop.eup %5559  ;;  %v3319_v61 = vmul.f32 1.442695, %v3228_v32  ;;  %v3230_v48 = vmin.f32 %v8892_v33, 20.0  ;;  %v8919_v15 = vadd.f32 %v8764_v0, %v8590_v47  ;;  %5579 = vpow2.f32 %v3313_v36 }
 0x3aa   :  { %10528 = vst [vmem:[#allocation29_spill] sm:$0xff] %v8915_v56  ;;  %v8925_v58 = vpop.eup %5561  ;;  %v3232_v42 = vmin.f32 %v8896_v51, 20.0  ;;  %v8930_v32 = vadd.f32 %v8766_v37, %v8593_v23  ;;  %v8934_v43 = vadd.f32 %v8770_v2, %v8599_v12  ;;  %5581 = vpow2.f32 %v3317_v4 }
 0x3ab   :  { %10529 = vst [vmem:[#allocation45_spill] sm:$0xff] %v8919_v15  ;;  %v8938_v0 = vpop.eup %5563  ;;  %v3321_v60 = vmul.f32 1.442695, %v3229_v11  ;;  %5583 = vpow2.f32 %v3315_v29  ;;  %v3325_v36 = vmul.f32 1.442695, %v3231_v13  ;;  %v3235_v51 = vmin.f32 %v8919_v15, 20.0 }
 0x3ac   :  { %v8898_v21 = vpop.f32.mrb[56].mxu0  ;;  %10532 = vst [vmem:[#allocation47_spill] sm:$0xff] %v8930_v32  ;;  %10533 = vst [vmem:[#allocation57_spill] sm:$0xff] %v8934_v43  ;;  %5585 = vpow2.f32 %v3319_v61  ;;  %v3234_v2 = vmin.f32 %v8930_v32, 20.0  ;;  %v3236_v4 = vmin.f32 %v8934_v43, 20.0  ;;  %v8952_v11 = vadd.f32 %v8772_v44, %v8587_v1 }
 0x3ad   :  { %v8901_v3 = vpop.f32.mrb[56].mxu1  ;;  %v8903_v26 = vpop.f32.mrb[57].mxu0  ;;  %10535 = vst [vmem:[#allocation16_spill] sm:$0xff] %v8938_v0  ;;  %v8956_v29 = vadd.f32 %v8780_v34, %v8590_v47  ;;  %5587 = vpow2.f32 %v3321_v60  ;;  %v3333_v43 = vmul.f32 1.442695, %v3235_v51  ;;  %vm3146_vm1 = vcmp.gt.f32.partialorder %v8639_v49, 20.0 }
 0x3ae   :  { %v8908_v17 = vpop.f32.mrb[57].mxu1  ;;  %v8910_v54 = vpop.f32.mrb[58].mxu0  ;;  %10537 = vst [vmem:[#allocation30_spill] sm:$0xff] %v8952_v11  ;;  %5589 = vpow2.f32 %v3325_v36  ;;  %v3237_v34 = vmin.f32 %v8952_v11, 20.0  ;;  %v3335_v51 = vmul.f32 1.442695, %v3236_v4 }
 0x3af   :  { %10527 = vst [vmem:[#allocation31_spill] sm:$0xff] %v8910_v54  ;;  %v8921_v50 = vpop.f32.mrb[58].mxu1  ;;  %v8923_v14 = vpop.f32.mrb[59].mxu0  ;;  %v3323_v54 = vmul.f32 1.442695, %v3230_v48  ;;  %10538 = vst [vmem:[#allocation33_spill] sm:$0xff] %v8956_v29  ;;  %v8964_v48 = vadd.f32 %v8790_v46, %v8593_v23 }
 0x3b0   :  { %10530 = vst [vmem:[#allocation48_spill] sm:$0xff] %v8921_v50  ;;  %10531 = vst [vmem:[#allocation44_spill] sm:$0xff] %v8923_v14  ;;  %v8936_v33 = vpop.f32.mrb[59].mxu1  ;;  %v3233_v14 = vmin.f32 %v8915_v56, 20.0  ;;  %v8941_v50 = vpop.eup %5565  ;;  %v3239_v46 = vmin.f32 %v8956_v29, 20.0  ;;  %v3402_v29 = vadd.f32 1.0, %v8695_v57 }
 0x3b1   :  { %10534 = vst [vmem:[#allocation26_spill] sm:$0xff] %v8936_v33  ;;  %10536 = vst [vmem:[#allocation17_spill] sm:$0xff] %v8941_v50  ;;  %v8944_v37 = vpop.eup %5567  ;;  %v3327_v33 = vmul.f32 1.442695, %v3232_v42  ;;  %5591 = vpow2.f32 %v3323_v54  ;;  %v3238_v36 = vmin.f32 %v8964_v48, 20.0  ;;  %v8991_v54 = vadd.f32 %v8792_v22, %v8599_v12 }
 0x3b2   :  { %v8947_v55 = vpop.eup %5569  ;;  %v3329_v61 = vmul.f32 1.442695, %v3233_v14  ;;  %10540 = vst [vmem:[#allocation24_spill] sm:$0xff] %v8964_v48  ;;  %v3331_v14 = vmul.f32 1.442695, %v3234_v2  ;;  %vm3150_vm2 = vcmp.gt.f32.partialorder %v8683_v6, 20.0 }
 0x3b3   :  { %v8960_v15 = vpop.eup %5571  ;;  %5593 = vpow2.f32 %v3327_v33  ;;  %10545 = vst [vmem:[#allocation63_spill] sm:$0xff] %v8991_v54  ;;  %v3341_v33 = vmul.f32 1.442695, %v3239_v46  ;;  %v3339_v48 = vmul.f32 1.442695, %v3238_v36  ;;  %v3240_v22 = vmin.f32 %v8991_v54, 20.0 }
 0x3b4   :  { %v8958_v13 = vpop.f32.mrb[60].mxu0  ;;  %10539 = vst [vmem:[#allocation49_spill] sm:$0xff] %v8960_v15  ;;  %v8970_v44 = vpop.eup %5573  ;;  %5595 = vpow2.f32 %v3329_v61  ;;  %v9002_v61 = vadd.f32 %v8838_v53, %v8587_v1  ;;  %v3405_v46 = vmul.f32 -0.5, %v8695_v57  ;;  %v3420_v53 = vadd.f32 1.0, %v8703_v24 }
 0x3b5   :  { %v8966_v42 = vpop.f32.mrb[60].mxu1  ;;  %v8968_v56 = vpop.f32.mrb[61].mxu0  ;;  %5597 = vpow2.f32 %v3333_v43  ;;  %v9009_v43 = vadd.f32 %v8849_v62, %v8590_v47  ;;  %v3456_v54 = vadd.f32 1.0, %v8726_v19  ;;  %v3343_v62 = vmul.f32 1.442695, %v3240_v22 }
 0x3b6   :  { %10541 = vst [vmem:[#allocation58_spill] sm:$0xff] %v8968_v56  ;;  %v8973_v32 = vpop.f32.mrb[61].mxu1  ;;  %v8975_v50 = vpop.f32.mrb[62].mxu0  ;;  %5599 = vpow2.f32 %v3331_v14  ;;  %10549 = vst [vmem:[#allocation35_spill] sm:$0xff] %v9002_v61  ;;  %v3438_v14 = vadd.f32 1.0, %v8714_v8  ;;  %v9035_v22 = vadd.f32 %v8860_v38, %v8599_v12  ;;  %v9050_v38 = vadd.f32 %v8870_v30, %v8590_v47 }
 0x3b7   :  { %10542 = vst [vmem:[#allocation27_spill] sm:$0xff] %v8975_v50  ;;  %v8977_v60 = vpop.eup %5575  ;;  %v8980_v15 = vpop.f32.mrb[62].mxu1  ;;  %v3337_v50 = vmul.f32 1.442695, %v3237_v34  ;;  %5601 = vpow2.f32 %v3335_v51  ;;  %10551 = vst [vmem:[#allocation38_spill] sm:$0xff] %v9009_v43  ;;  %vm3148_vm5 = vcmp.gt.f32.partialorder %v8652_v27, 20.0 }
 0x3b8   :  { %v8982_v0 = vpop.f32.mrb[63].mxu0  ;;  %v8984_v56 = vpop.eup %5577  ;;  %10558 = vst [vmem:[#allocation64_spill] sm:$0xff] %v9035_v22  ;;  %10562 = vst [vmem:[#allocation68_spill] sm:$0xff] %v9050_v38  ;;  %v3462_v30 = vand.u32 2147483647, %v8726_v19 }
 0x3b9   :  { %10543 = vst [vmem:[#allocation52_spill] sm:$0xff] %v8982_v0  ;;  %v8987_v11 = vpop.f32.mrb[63].mxu1  ;;  %v8993_v2 = vpop.eup %5579  ;;  %5603 = vpow2.f32 %v3337_v50  ;;  %v3241_v50 = vmin.f32 %v9002_v61, 20.0  ;;  %v9031_v61 = vadd.f32 %v8851_v41, %v8593_v23 }
 0x3ba   :  { %10544 = vst [vmem:[#allocation60_spill] sm:$0xff] %v8987_v11  ;;  %10546 = vst [vmem:[#allocation23_spill] sm:$0xff] %v8993_v2  ;;  %v8996_v0 = vpop.eup %5581  ;;  %5605 = vlog2.f32 %v3402_v29  ;;  %v3243_v2 = vmin.f32 %v9009_v43, 20.0  ;;  %v3247_v11 = vmin.f32 %v9050_v38, 20.0  ;;  %vm9092_vm15 = vcmp.lt.f32.partialorder %v3462_v30, 0.0004427343 }
 0x3bb   :  { %10547 = vst [vmem:[#allocation32_spill] sm:$0xff] %v8996_v0  ;;  %v8998_v4 = vpop.eup %5583  ;;  %5607 = vpow2.f32 %v3341_v33  ;;  %v3441_v33 = vmul.f32 -0.5, %v8714_v8  ;;  %10557 = vst [vmem:[#allocation22_spill] sm:$0xff] %v9031_v61  ;;  %v3345_v43 = vmul.f32 1.442695, %v3241_v50 }
 0x3bc   :  { %10548 = vst [vmem:[#allocation34_spill] sm:$0xff] %v8998_v4  ;;  %v9004_v34 = vpop.eup %5585  ;;  %5609 = vpow2.f32 %v3339_v48  ;;  %v3423_v48 = vmul.f32 -0.5, %v8703_v24  ;;  %v3349_v41 = vmul.f32 1.442695, %v3243_v2 }
 0x3bd   :  { %10550 = vst [vmem:[#allocation36_spill] sm:$0xff] %v9004_v34  ;;  %v9013_v51 = vpop.eup %5587  ;;  %5611 = vlog2.f32 %v3438_v14  ;;  %v3406_v34 = vadd.f32 1.0, %v3405_v46  ;;  %v3408_v46 = vand.u32 2147483647, %v8695_v57 }
 0x3be   :  { %10552 = vst [vmem:[#allocation41_spill] sm:$0xff] %v9013_v51  ;;  %v9016_v36 = vpop.eup %5589  ;;  %5613 = vlog2.f32 %v3420_v53  ;;  %v3459_v53 = vmul.f32 -0.5, %v8726_v19 }
 0x3bf   :  { %10553 = vst [vmem:[#allocation43_spill] sm:$0xff] %v9016_v36  ;;  %v9020_v0 = vpop.eup %5591  ;;  %5615 = vlog2.f32 %v3456_v54  ;;  %v3242_v36 = vmin.f32 %v9031_v61, 20.0  ;;  %v3407_v50 = vmul.f32 %v8695_v57, %v3406_v34  ;;  %v3424_v61 = vadd.f32 1.0, %v3423_v48 }
 0x3c0   :  { %10554 = vst [vmem:[#allocation50_spill] sm:$0xff] %v9020_v0  ;;  %v9023_v29 = vpop.eup %5593  ;;  %5617 = vpow2.f32 %v3343_v62  ;;  %v3244_v62 = vmin.f32 %v9035_v22, 20.0  ;;  %vm9068_vm12 = vcmp.lt.f32.partialorder %v3408_v46, 0.0004427343  ;;  %v3460_v34 = vadd.f32 1.0, %v3459_v53 }
 0x3c1   :  { %10555 = vst [vmem:[#allocation11_spill] sm:$0xff] %v9023_v29  ;;  %v9026_v51 = vpop.eup %5595  ;;  %v3444_v29 = vand.u32 2147483647, %v8714_v8  ;;  %5619 = vpow2.f32 %v3345_v43  ;;  %v9085_v53 = vadd.f32 %v8877_v39, %v8599_v12  ;;  %v3510_v43 = vadd.f32 1.0, %v8905_v16 }
 0x3c2   :  { %10556 = vst [vmem:[#allocation12_spill] sm:$0xff] %v9026_v51  ;;  %v9037_v14 = vpop.eup %5597  ;;  %v9043_v51 = vadd.f32 %v8862_v63, %v8587_v1  ;;  %v3442_v63 = vadd.f32 1.0, %v3441_v33  ;;  %5621 = vpow2.f32 %v3349_v41  ;;  %v3351_v46 = vmul.f32 1.442695, %v3244_v62 }
 0x3c3   :  { %10559 = vst [vmem:[#allocation65_spill] sm:$0xff] %v9037_v14  ;;  %v9045_v54 = vpop.eup %5599  ;;  %vm9079_vm13 = vcmp.lt.f32.partialorder %v3444_v29, 0.0004427343  ;;  %v3425_v41 = vmul.f32 %v8703_v24, %v3424_v61  ;;  %v3461_v39 = vmul.f32 %v8726_v19, %v3460_v34  ;;  %v3357_v61 = vmul.f32 1.442695, %v3247_v11 }
 0x3c4   :  { %10560 = vst [vmem:[#allocation66_spill] sm:$0xff] %v9043_v51  ;;  %10561 = vst [vmem:[#allocation67_spill] sm:$0xff] %v9045_v54  ;;  %v9052_v14 = vpop.eup %5601  ;;  %v3426_v54 = vand.u32 2147483647, %v8703_v24  ;;  %v3245_v33 = vmin.f32 %v9043_v51, 20.0  ;;  %v3443_v4 = vmul.f32 %v8714_v8, %v3442_v63  ;;  %v3248_v57 = vmin.f32 %v9085_v53, 20.0 }
 0x3c5   :  { %10563 = vst [vmem:[#allocation69_spill] sm:$0xff] %v9052_v14  ;;  %v9059_v2 = vpop.eup %5603  ;;  %v9065_v14 = vadd.f32 %v8872_v52, %v8593_v23 }
 0x3c6   :  { %10564 = vst [vmem:[#allocation70_spill] sm:$0xff] %v9059_v2  ;;  %v5606_v0 = vpop.eup %5605  ;;  %v3347_v2 = vmul.f32 1.442695, %v3242_v36  ;;  %vm9088_vm14 = vcmp.lt.f32.partialorder %v3426_v54, 0.0004427343  ;;  %v9102_v54 = vadd.f32 %v8898_v21, %v8587_v1 }
 0x3c7   :  { %10565 = vst [vmem:[#allocation71_spill] sm:$0xff] %v9065_v14  ;;  %v9073_v48 = vpop.eup %5607  ;;  %v3404_v22 = vmul.f32 0.6931472, %v5606_v0  ;;  %v3246_v8 = vmin.f32 %v9065_v14, 20.0  ;;  %v3353_v38 = vmul.f32 1.442695, %v3245_v33  ;;  %v10578_v0 = vpack.c.bf16 %v8832_v20, %v8825_v31 }
 0x3c8   :  { %10568 = vst [vmem:[#allocation72_spill] sm:$0xff] %v9073_v48  ;;  %v9076_v52 = vpop.eup %5609  ;;  %5623 = vpow2.f32 %v3347_v2  ;;  %10575 = vst [vmem:[#allocation73_spill] sm:$0xff] %v9102_v54  ;;  %v3249_v34 = vmin.f32 %v9102_v54, 20.0 }
 0x3c9   :  { %v5612_v51 = vpop.eup %5611  ;;  %v3410_v63 = vsel %vm9068_vm12, %v3407_v50, %v3404_v22  ;;  %5625 = vpow2.f32 %v3351_v46 }
 0x3ca   :  { %v5614_v29 = vpop.eup %5613  ;;  %v3440_v62 = vmul.f32 0.6931472, %v5612_v51  ;;  %v3970_v19 = vsel %vm3138_vm9, %v8610_v25, %v3410_v63  ;;  %v3355_v51 = vmul.f32 1.442695, %v3246_v8  ;;  %5627 = vpow2.f32 %v3353_v38 }
 0x3cb   :  { %v5616_v48 = vpop.eup %5615  ;;  %v3422_v24 = vmul.f32 0.6931472, %v5614_v29  ;;  %5629 = vpow2.f32 %v3357_v61  ;;  %v3492_v38 = vadd.f32 1.0, %v8853_v18  ;;  %v3361_v36 = vmul.f32 1.442695, %v3249_v34 }
 0x3cc   :  { %v3446_v30 = vsel %vm9079_vm13, %v3443_v4, %v3440_v62  ;;  %v3458_v14 = vmul.f32 0.6931472, %v5616_v48  ;;  %v9107_v22 = vpop.eup %5617  ;;  %5631 = vpow2.f32 %v3355_v51  ;;  %v9148_v8 = vadd.f32 %v8903_v26, %v8593_v23 }
 0x3cd   :  { %v3974_v11 = vsel %vm3142_vm10, %v8620_v7, %v3446_v30  ;;  %v3428_v21 = vsel %vm9088_vm14, %v3425_v41, %v3422_v24  ;;  %v3474_v7 = vadd.f32 1.0, %v8804_v10  ;;  %v9126_v33 = vpop.eup %5619  ;;  %v3477_v41 = vmul.f32 -0.5, %v8804_v10 }
 0x3ce   :  { %v4034_v4 = vpack.c.bf16 %v3974_v11, %v3970_v19  ;;  %v3464_v50 = vsel %vm9092_vm15, %v3461_v39, %v3458_v14  ;;  %v3972_v2 = vsel %vm3140_vm11, %v8613_v35, %v3428_v21  ;;  %v9129_v46 = vpop.eup %5621  ;;  %v10576_v14 = vpack.c.bf16 %v8814_v45, %v8809_v28  ;;  %10579 = vst [vmem:[#allocation75_spill] sm:$0xff] %v9148_v8 }
 0x3cf   :  { %v3976_v25 = vsel %vm3144_vm0, %v8623_v5, %v3464_v50  ;;  %v3359_v35 = vmul.f32 1.442695, %v3248_v57  ;;  %v9136_v5 = vadd.f32 %v8901_v3, %v8590_v47  ;;  %5633 = vlog2.f32 %v3474_v7 }
 0x3d0   :  { %4360 = vmatprep.mubr.bf16.mxu0 %v4034_v4  ;;  %v4036_v48 = vpack.c.bf16 %v3976_v25, %v3972_v2  ;;  %5635 = vlog2.f32 %v3510_v43  ;;  %v3513_v28 = vmul.f32 -0.5, %v8905_v16  ;;  %v3495_v45 = vmul.f32 -0.5, %v8853_v18 }
 0x3d1   :  { %4361 = vmatmul.mubr.bf16.vlgmr.msra.gmra.mrb[64].mxu0 %v10576_v14  ;;  %10577 = vst [vmem:[#allocation74_spill] sm:$0xff] %v9136_v5  ;;  %5637 = vlog2.f32 %v3492_v38  ;;  %v3528_v3 = vadd.f32 1.0, %v8925_v58  ;;  %v3251_v63 = vmin.f32 %v9136_v5, 20.0  ;;  %v3478_v20 = vadd.f32 1.0, %v3477_v41 }
 0x3d2   :  { %4457 = vmatprep.mubr.bf16.mxu1 %v4036_v48  ;;  %v9150_v29 = vpop.eup %5623  ;;  %5639 = vpow2.f32 %v3359_v35  ;;  %v3480_v62 = vand.u32 2147483647, %v8804_v10  ;;  %v3516_v39 = vand.u32 2147483647, %v8905_v16  ;;  %v3514_v24 = vadd.f32 1.0, %v3513_v28 }
 0x3d3   :  { %4458 = vmatmul.mubr.bf16.vlgmr.msra.gmra.mrb[64].mxu1 %v10578_v0  ;;  %v9153_v31 = vpop.eup %5625  ;;  %5641 = vlog2.f32 %v3528_v3  ;;  %v3498_v61 = vand.u32 2147483647, %v8853_v18  ;;  %v3465_v26 = vadd.f32 1.0, %v8782_v40  ;;  %v3496_v57 = vadd.f32 1.0, %v3495_v45 }
 0x3d4   :  { %5643 = vpow2.f32 %v3361_v36  ;;  %v9159_v30 = vpop.eup %5627  ;;  %v3531_v19 = vmul.f32 -0.5, %v8925_v58  ;;  %v3534_v11 = vand.u32 2147483647, %v8925_v58  ;;  %v3250_v21 = vmin.f32 %v9148_v8, 20.0  ;;  %v10595_v36 = vld [vmem:[#allocation48_spill] sm:$0xff] }
 0x3d5   :  { %v9166_v51 = vmul.f32 1.442695, %v3251_v63  ;;  %v9170_v4 = vadd.f32 %v8908_v17, %v8599_v12  ;;  %5645 = vlog2.f32 %v3465_v26  ;;  %v3501_v50 = vadd.f32 1.0, %v8864_v9  ;;  %v9173_v2 = vpop.eup %5629  ;;  %v10585_v17 = vld [vmem:[#allocation40_spill] sm:$0xff]  ;;  %v10590_v63 = vld [vmem:[#allocation55_spill] sm:$0xff] }
 0x3d6   :  { %v3479_v25 = vmul.f32 %v8804_v10, %v3478_v20  ;;  %vm9176_vm3 = vcmp.lt.f32.partialorder %v3480_v62, 0.0004427343  ;;  %vm9180_vm4 = vcmp.lt.f32.partialorder %v3516_v39, 0.0004427343  ;;  %v3468_v48 = vmul.f32 -0.5, %v8782_v40  ;;  %v9185_v43 = vpop.eup %5631 }
 0x3d7   :  { %10580 = vst [vmem:[#allocation76_spill] sm:$0xff] %v9170_v4  ;;  %vm3152_vm6 = vcmp.gt.f32.partialorder %v10585_v17, 20.0  ;;  %v3515_v14 = vmul.f32 %v8905_v16, %v3514_v24  ;;  %vm9190_vm7 = vcmp.lt.f32.partialorder %v3498_v61, 0.0004427343  ;;  %5647 = vlog2.f32 %v3501_v50  ;;  %v10591_v50 = vld [vmem:[#allocation61_spill] sm:$0xff] }
 0x3d8   :  { %v3483_v35 = vadd.f32 1.0, %v8794_v59  ;;  %v3497_v41 = vmul.f32 %v8853_v18, %v3496_v57  ;;  %v3532_v0 = vadd.f32 1.0, %v3531_v19  ;;  %vm9196_vm8 = vcmp.lt.f32.partialorder %v3534_v11, 0.0004427343 }
 0x3d9   :  { %v5634_v38 = vpop.eup %5633  ;;  %v9200_v28 = vmul.f32 1.442695, %v3250_v21  ;;  %v3252_v16 = vmin.f32 %v9170_v4, 20.0  ;;  %v3519_v20 = vadd.f32 1.0, %v10590_v63  ;;  %v3469_v24 = vadd.f32 1.0, %v3468_v48 }
 0x3da   :  { %v5636_v45 = vpop.eup %5635  ;;  %v3476_v3 = vmul.f32 0.6931472, %v5634_v38  ;;  %5649 = vlog2.f32 %v3483_v35  ;;  %v3471_v61 = vand.u32 2147483647, %v8782_v40  ;;  %v3504_v18 = vmul.f32 -0.5, %v8864_v9  ;;  %v10592_v35 = vld [vmem:[#allocation18_spill] sm:$0xff] }
 0x3db   :  { %v5638_v62 = vpop.eup %5637  ;;  %v3512_v39 = vmul.f32 0.6931472, %v5636_v45  ;;  %v3486_v11 = vmul.f32 -0.5, %v8794_v59  ;;  %5651 = vlog2.f32 %v3519_v20  ;;  %vm3145_vm9 = vcmp.gt.f32.partialorder %v10591_v50, 20.0 }
 0x3dc   :  { %v9206_v26 = vpop.eup %5639  ;;  %v3482_v57 = vsel %vm9176_vm3, %v3479_v25, %v3476_v3  ;;  %v3494_v19 = vmul.f32 0.6931472, %v5638_v62  ;;  %vm3149_vm10 = vcmp.gt.f32.partialorder %v10592_v35, 20.0  ;;  %v3533_v38 = vmul.f32 %v8925_v58, %v3532_v0 }
 0x3dd   :  { %v5642_v21 = vpop.eup %5641  ;;  %v3518_v48 = vsel %vm9180_vm4, %v3515_v14, %v3512_v39  ;;  %v3507_v45 = vand.u32 2147483647, %v8864_v9  ;;  %v3522_v5 = vmul.f32 -0.5, %v10590_v63  ;;  %v3978_v25 = vsel %vm3146_vm1, %v8639_v49, %v3482_v57  ;;  %v10593_v57 = vld [vmem:[#allocation31_spill] sm:$0xff] }
 0x3de   :  { %v9218_v34 = vpop.eup %5643  ;;  %v3982_v3 = vsel %vm3150_vm2, %v8683_v6, %v3518_v48  ;;  %v3500_v7 = vsel %vm9190_vm7, %v3497_v41, %v3494_v19  ;;  %v3530_v14 = vmul.f32 0.6931472, %v5642_v21  ;;  %v3367_v58 = vmul.f32 1.442695, %v3252_v16  ;;  %v10594_v6 = vld [vmem:[#allocation14_spill] sm:$0xff]  ;;  %v10601_v48 = vld [vmem:[#allocation44_spill] sm:$0xff] }
 0x3df   :  { %v4038_v20 = vpack.c.bf16 %v3982_v3, %v3978_v25  ;;  %v3470_v0 = vmul.f32 %v8782_v40, %v3469_v24  ;;  %v3505_v62 = vadd.f32 1.0, %v3504_v18  ;;  %v5646_v39 = vpop.eup %5645  ;;  %v3487_v4 = vadd.f32 1.0, %v3486_v11 }
 0x3e0   :  { %v3536_v54 = vsel %vm9196_vm8, %v3533_v38, %v3530_v14  ;;  %v3489_v49 = vand.u32 2147483647, %v8794_v59  ;;  %v9234_v8 = vadd.f32 %v10593_v57, %v8587_v1  ;;  %vm3147_vm11 = vcmp.gt.f32.partialorder %v10594_v6, 20.0 }
 0x3e1   :  { %4368 = vmatprep.mubr.bf16.mxu0 %v4038_v20  ;;  %v3980_v10 = vsel %vm3148_vm5, %v8652_v27, %v3500_v7  ;;  %v3984_v40 = vsel %vm3152_vm6, %v10585_v17, %v3536_v54  ;;  %v3467_v41 = vmul.f32 0.6931472, %v5646_v39  ;;  %v9245_v16 = vadd.f32 %v10595_v36, %v8590_v47  ;;  %v5648_v24 = vpop.eup %5647  ;;  %v10604_v39 = vld [vmem:[#allocation26_spill] sm:$0xff] }
 0x3e2   :  { %v4040_v18 = vpack.c.bf16 %v3984_v40, %v3980_v10  ;;  %vm9247_vm12 = vcmp.lt.f32.partialorder %v3471_v61, 0.0004427343  ;;  %vm9251_vm13 = vcmp.lt.f32.partialorder %v3507_v45, 0.0004427343  ;;  %v3523_v27 = vadd.f32 1.0, %v3522_v5  ;;  %v10605_v40 = vld [vmem:[#allocation20_spill] sm:$0xff] }
 0x3e3   :  { %10596 = vst [vmem:[#allocation40_spill] sm:$0xff] %v9245_v16  ;;  %v3473_v21 = vsel %vm9247_vm12, %v3470_v0, %v3467_v41  ;;  %v3503_v54 = vmul.f32 0.6931472, %v5648_v24  ;;  %v3506_v17 = vmul.f32 %v8864_v9, %v3505_v62  ;;  %v9260_v38 = vadd.f32 %v10601_v48, %v8593_v23 }
 0x3e4   :  { %v5650_v25 = vpop.eup %5649  ;;  %5653 = vpow2.f32 %v9166_v51  ;;  %4465 = vmatprep.mubr.bf16.mxu1 %v4040_v18  ;;  %vm9263_vm14 = vcmp.lt.f32.partialorder %v3489_v49, 0.0004427343  ;;  %v3525_v5 = vand.u32 2147483647, %v10590_v63  ;;  %v3253_v45 = vmin.f32 %v9234_v8, 20.0 }
 0x3e5   :  { %v3509_v3 = vsel %vm9251_vm13, %v3506_v17, %v3503_v54  ;;  %v3485_v9 = vmul.f32 0.6931472, %v5650_v25  ;;  %v3488_v7 = vmul.f32 %v8794_v59, %v3487_v4  ;;  %v3255_v14 = vmin.f32 %v9245_v16, 20.0  ;;  %v5652_v20 = vpop.eup %5651 }
 0x3e6   :  { %v3977_v51 = vsel %vm3145_vm9, %v10591_v50, %v3473_v21  ;;  %v3981_v0 = vsel %vm3149_vm10, %v10592_v35, %v3509_v3  ;;  %v3524_v62 = vmul.f32 %v10590_v63, %v3523_v27  ;;  %v9282_v49 = vadd.f32 %v10604_v39, %v8599_v12 }
 0x3e7   :  { %v4037_v57 = vpack.c.bf16 %v3981_v0, %v3977_v51  ;;  %v3491_v59 = vsel %vm9263_vm14, %v3488_v7, %v3485_v9  ;;  %v3521_v4 = vmul.f32 0.6931472, %v5652_v20  ;;  %v3254_v10 = vmin.f32 %v9260_v38, 20.0  ;;  %v10608_v7 = vld [vmem:[#allocation58_spill] sm:$0xff]  ;;  %v10610_v20 = vld [vmem:[#allocation16_spill] sm:$0xff]  ;;  %v10611_v0 = vld [vmem:[#allocation21_spill] sm:$0xff] }
 0x3e8   :  { %vm3151_vm15 = vcmp.gt.f32.partialorder %v10605_v40, 20.0  ;;  %5655 = vpow2.f32 %v9200_v28  ;;  %vm3526_vm0 = vcmp.lt.f32.partialorder %v3525_v5, 0.0004427343  ;;  %v3369_v50 = vmul.f32 1.442695, %v3253_v45 }
 0x3e9   :  { %4369 = vmatmul.mubr.bf16.gmra.mrb[68].mxu0 %v4037_v57  ;;  %v3527_v35 = vsel %vm3526_vm0, %v3524_v62, %v3521_v4  ;;  %v3373_v63 = vmul.f32 1.442695, %v3255_v14  ;;  %v9291_v41 = vadd.f32 %v8958_v13, %v8587_v1  ;;  %v3546_v36 = vadd.f32 1.0, %v8944_v37  ;;  %v10612_v62 = vld [vmem:[#allocation39_spill] sm:$0xff] }
 0x3ea   :  { %5657 = vpow2.f32 %v3367_v58  ;;  %v3979_v24 = vsel %vm3147_vm11, %v10594_v6, %v3491_v59  ;;  %v3983_v18 = vsel %vm3151_vm15, %v10605_v40, %v3527_v35  ;;  %v3256_v28 = vmin.f32 %v9282_v49, 20.0 }
 0x3eb   :  { %10606 = vst [vmem:[#allocation55_spill] sm:$0xff] %v9291_v41  ;;  %v4039_v19 = vpack.c.bf16 %v3983_v18, %v3979_v24  ;;  %v3371_v11 = vmul.f32 1.442695, %v3254_v10  ;;  %5659 = vlog2.f32 %v3546_v36  ;;  %v3582_v27 = vadd.f32 1.0, %v8977_v60  ;;  %v10616_v18 = vld [vmem:[#allocation49_spill] sm:$0xff] }
 0x3ec   :  { %5661 = vpow2.f32 %v3369_v50  ;;  %v3257_v13 = vmin.f32 %v9291_v41, 20.0  ;;  %v3564_v58 = vadd.f32 1.0, %v8947_v55  ;;  %v3375_v54 = vmul.f32 1.442695, %v3256_v28 }
 0x3ed   :  { %4466 = vmatmul.mubr.bf16.gmra.mrb[68].mxu1 %v4039_v19  ;;  %5663 = vpow2.f32 %v3373_v63  ;;  %v9306_v6 = vadd.f32 %v8966_v42, %v8590_v47  ;;  %v3549_v17 = vmul.f32 -0.5, %v8944_v37  ;;  %v3585_v48 = vmul.f32 -0.5, %v8977_v60 }
 0x3ee   :  { %v9302_v21 = vpop.eup %5653  ;;  %5665 = vlog2.f32 %v3582_v27  ;;  %v3600_v25 = vadd.f32 1.0, %v8984_v56  ;;  %v3567_v61 = vmul.f32 -0.5, %v8947_v55  ;;  %v3377_v5 = vmul.f32 1.442695, %v3257_v13  ;;  %v10618_v27 = vld [vmem:[#allocation46_spill] sm:$0xff] }
 0x3ef   :  { %10607 = vst [vmem:[#allocation61_spill] sm:$0xff] %v9306_v6  ;;  %5667 = vpow2.f32 %v3371_v11  ;;  %v3552_v45 = vand.u32 2147483647, %v8944_v37  ;;  %v3603_v3 = vmul.f32 -0.5, %v8984_v56  ;;  %v3259_v42 = vmin.f32 %v9306_v6, 20.0  ;;  %v10617_v11 = vld [vmem:[#allocation25_spill] sm:$0xff] }
 0x3f0   :  { %5669 = vlog2.f32 %v3564_v58  ;;  %v9319_v14 = vadd.f32 %v10608_v7, %v8593_v23  ;;  %v3537_v51 = vadd.f32 1.0, %v10610_v20  ;;  %vm3154_vm1 = vcmp.gt.f32.partialorder %v10611_v0, 20.0 }
 0x3f1   :  { %5671 = vlog2.f32 %v3600_v25  ;;  %vm3158_vm2 = vcmp.gt.f32.partialorder %v10612_v62, 20.0  ;;  %v3550_v39 = vadd.f32 1.0, %v3549_v17  ;;  %v3586_v57 = vadd.f32 1.0, %v3585_v48 }
 0x3f2   :  { %v9314_v9 = vpop.eup %5655  ;;  %5673 = vpow2.f32 %v3375_v54  ;;  %10609 = vst [vmem:[#allocation18_spill] sm:$0xff] %v9319_v14  ;;  %v3588_v59 = vand.u32 2147483647, %v8977_v60  ;;  %v3570_v4 = vand.u32 2147483647, %v8947_v55  ;;  %v3568_v40 = vadd.f32 1.0, %v3567_v61 }
 0x3f3   :  { %v3606_v50 = vand.u32 2147483647, %v8984_v56  ;;  %v9331_v35 = vadd.f32 %v8973_v32, %v8599_v12  ;;  %5675 = vlog2.f32 %v3537_v51  ;;  %vm9333_vm3 = vcmp.lt.f32.partialorder %v3552_v45, 0.0004427343  ;;  %v10619_v54 = vld [vmem:[#allocation17_spill] sm:$0xff] }
 0x3f4   :  { %v9326_v10 = vpop.eup %5657  ;;  %5677 = vpow2.f32 %v3377_v5  ;;  %v3604_v24 = vadd.f32 1.0, %v3603_v3  ;;  %v3573_v28 = vadd.f32 1.0, %v10616_v18  ;;  %vm3156_vm4 = vcmp.gt.f32.partialorder %v10617_v11, 20.0  ;;  %v10626_v5 = vld [vmem:[#allocation42_spill] sm:$0xff] }
 0x3f5   :  { %10613 = vst [vmem:[#allocation31_spill] sm:$0xff] %v9331_v35  ;;  %v5660_v63 = vpop.eup %5659  ;;  %vm3160_vm5 = vcmp.gt.f32.partialorder %v10618_v27, 20.0  ;;  %v3258_v32 = vmin.f32 %v9319_v14, 20.0  ;;  %v3540_v58 = vmul.f32 -0.5, %v10610_v20  ;;  %v3555_v17 = vadd.f32 1.0, %v10619_v54 }
 0x3f6   :  { %v9338_v19 = vpop.eup %5661  ;;  %v3548_v13 = vmul.f32 0.6931472, %v5660_v63  ;;  %v3381_v25 = vmul.f32 1.442695, %v3259_v42  ;;  %v3551_v61 = vmul.f32 %v8944_v37, %v3550_v39  ;;  %vm9348_vm6 = vcmp.lt.f32.partialorder %v3588_v59, 0.0004427343 }
 0x3f7   :  { %v9345_v48 = vpop.eup %5663  ;;  %vm9352_vm7 = vcmp.lt.f32.partialorder %v3570_v4, 0.0004427343  ;;  %v3587_v7 = vmul.f32 %v8977_v60, %v3586_v57  ;;  %v3569_v51 = vmul.f32 %v8947_v55, %v3568_v40  ;;  %vm9358_vm8 = vcmp.lt.f32.partialorder %v3606_v50, 0.0004427343 }
 0x3f8   :  { %v5666_v3 = vpop.eup %5665  ;;  %v3260_v42 = vmin.f32 %v9331_v35, 20.0  ;;  %v3554_v39 = vsel %vm9333_vm3, %v3551_v61, %v3548_v13  ;;  %v3605_v4 = vmul.f32 %v8984_v56, %v3604_v24  ;;  %5679 = vlog2.f32 %v3573_v28 }
 0x3f9   :  { %v9363_v37 = vpop.eup %5667  ;;  %v3584_v59 = vmul.f32 0.6931472, %v5666_v3  ;;  %v3379_v41 = vmul.f32 1.442695, %v3258_v32  ;;  %v3541_v60 = vadd.f32 1.0, %v3540_v58  ;;  %5681 = vlog2.f32 %v3555_v17  ;;  %v10627_v3 = vld [vmem:[#allocation28_spill] sm:$0xff] }
 0x3fa   :  { %v5670_v6 = vpop.eup %5669  ;;  %v3543_v55 = vand.u32 2147483647, %v10610_v20  ;;  %v3576_v35 = vmul.f32 -0.5, %v10616_v18  ;;  %v3591_v36 = vadd.f32 1.0, %v8970_v44  ;;  %v3986_v56 = vsel %vm3154_vm1, %v10611_v0, %v3554_v39 }
 0x3fb   :  { %v5672_v57 = vpop.eup %5671  ;;  %v3590_v40 = vsel %vm9348_vm6, %v3587_v7, %v3584_v59  ;;  %v3566_v50 = vmul.f32 0.6931472, %v5670_v6  ;;  %v3383_v32 = vmul.f32 1.442695, %v3260_v42  ;;  %v3558_v17 = vmul.f32 -0.5, %v10619_v54  ;;  %v10628_v42 = vld [vmem:[#allocation27_spill] sm:$0xff] }
 0x3fc   :  { %v9373_v13 = vpop.eup %5673  ;;  %v3990_v24 = vsel %vm3158_vm2, %v10612_v62, %v3590_v40  ;;  %v3602_v28 = vmul.f32 0.6931472, %v5672_v57  ;;  %5683 = vlog2.f32 %v3591_v36  ;;  %vm3153_vm9 = vcmp.gt.f32.partialorder %v10626_v5, 20.0 }
 0x3fd   :  { %v4042_v58 = vpack.c.bf16 %v3990_v24, %v3986_v56  ;;  %v3572_v6 = vsel %vm9352_vm7, %v3569_v51, %v3566_v50  ;;  %v5676_v61 = vpop.eup %5675  ;;  %vm3157_vm10 = vcmp.gt.f32.partialorder %v10627_v3, 20.0  ;;  %v3579_v7 = vand.u32 2147483647, %v10616_v18  ;;  %v10632_v56 = vld [vmem:[#allocation19_spill] sm:$0xff]  ;;  %v10633_v24 = vld [vmem:[#allocation37_spill] sm:$0xff] }
 0x3fe   :  { %v3608_v0 = vsel %vm9358_vm8, %v3605_v4, %v3602_v28  ;;  %v3594_v62 = vmul.f32 -0.5, %v8970_v44  ;;  %v9392_v39 = vadd.f32 %v10628_v42, %v8587_v1  ;;  %v9394_v45 = vpop.eup %5677  ;;  %v3988_v51 = vsel %vm3156_vm4, %v10617_v11, %v3572_v6 }
 0x3ff   :  { %10630 = vst [vmem:[#allocation48_spill] sm:$0xff] %v9394_v45  ;;  %4376 = vmatprep.mubr.bf16.mxu0 %v4042_v58  ;;  %v3992_v63 = vsel %vm3160_vm5, %v10618_v27, %v3608_v0  ;;  %v3577_v59 = vadd.f32 1.0, %v3576_v35  ;;  %v9404_v4 = vadd.f32 %v8980_v15, %v8590_v47  ;;  %5685 = vpow2.f32 %v3381_v25  ;;  %v10636_v27 = vld [vmem:[#allocation34_spill] sm:$0xff] }
 0x400   :  { %10629 = vst [vmem:[#allocation14_spill] sm:$0xff] %v9392_v39  ;;  %v4044_v57 = vpack.c.bf16 %v3992_v63, %v3988_v51  ;;  %v3539_v1 = vmul.f32 0.6931472, %v5676_v61  ;;  %v3561_v40 = vand.u32 2147483647, %v10619_v54  ;;  %5687 = vpow2.f32 %v3379_v41  ;;  %v10641_v61 = vld [vmem:[#allocation52_spill] sm:$0xff] }
 0x401   :  { %10631 = vst [vmem:[#allocation44_spill] sm:$0xff] %v9404_v4  ;;  %v3542_v50 = vmul.f32 %v10610_v20, %v3541_v60  ;;  %v3559_v36 = vadd.f32 1.0, %v3558_v17  ;;  %v3261_v11 = vmin.f32 %v9392_v39, 20.0  ;;  %vm3155_vm11 = vcmp.gt.f32.partialorder %v10632_v56, 20.0  ;;  %v10682_v17 = vld [vmem:[#allocation24_spill] sm:$0xff] }
 0x402   :  { %vm3159_vm12 = vcmp.gt.f32.partialorder %v10633_v24, 20.0  ;;  %4473 = vmatprep.mubr.bf16.mxu1 %v4044_v57  ;;  %vm9411_vm13 = vcmp.lt.f32.partialorder %v3543_v55, 0.0004427343  ;;  %v3595_v47 = vadd.f32 1.0, %v3594_v62  ;;  %v3263_v15 = vmin.f32 %v9404_v4, 20.0  ;;  %v5680_v41 = vpop.eup %5679 }
 0x403   :  { %v3618_v25 = vadd.f32 1.0, %v10636_v27  ;;  %5689 = vpow2.f32 %v3383_v32  ;;  %v3578_v20 = vmul.f32 %v10616_v18, %v3577_v59  ;;  %vm9418_vm14 = vcmp.lt.f32.partialorder %v3579_v7, 0.0004427343  ;;  %v5682_v58 = vpop.eup %5681 }
 0x404   :  { %v3597_v28 = vand.u32 2147483647, %v8970_v44  ;;  %v3545_v55 = vsel %vm9411_vm13, %v3542_v50, %v3539_v1  ;;  %v3575_v6 = vmul.f32 0.6931472, %v5680_v41  ;;  %vm9425_vm15 = vcmp.lt.f32.partialorder %v3561_v40, 0.0004427343 }
 0x405   :  { %v9431_v32 = vadd.f32 %v10641_v61, %v8593_v23  ;;  %v3557_v18 = vmul.f32 0.6931472, %v5682_v58  ;;  %v3560_v0 = vmul.f32 %v10619_v54, %v3559_v36  ;;  %v3385_v7 = vmul.f32 1.442695, %v3261_v11  ;;  %v10644_v1 = vld [vmem:[#allocation60_spill] sm:$0xff] }
 0x406   :  { %v3621_v62 = vmul.f32 -0.5, %v10636_v27  ;;  %v3581_v42 = vsel %vm9418_vm14, %v3578_v20, %v3575_v6  ;;  %v3596_v51 = vmul.f32 %v8970_v44, %v3595_v47  ;;  %v3389_v63 = vmul.f32 1.442695, %v3263_v15  ;;  %v5684_v59 = vpop.eup %5683  ;;  %v10647_v41 = vld [vmem:[#allocation36_spill] sm:$0xff] }
 0x407   :  { %5691 = vlog2.f32 %v3618_v25  ;;  %v3985_v57 = vsel %vm3153_vm9, %v10626_v5, %v3545_v55  ;;  %v3989_v23 = vsel %vm3157_vm10, %v10627_v3, %v3581_v42  ;;  %vm9444_vm0 = vcmp.lt.f32.partialorder %v3597_v28, 0.0004427343  ;;  %v10645_v3 = vld [vmem:[#allocation50_spill] sm:$0xff]  ;;  %v10653_v42 = vld [vmem:[#allocation56_spill] sm:$0xff] }
 0x408   :  { %v9450_v40 = vadd.f32 %v10644_v1, %v8599_v12  ;;  %v4041_v44 = vpack.c.bf16 %v3989_v23, %v3985_v57  ;;  %v3563_v50 = vsel %vm9425_vm15, %v3560_v0, %v3557_v18  ;;  %v3593_v36 = vmul.f32 0.6931472, %v5684_v59  ;;  %v10654_v59 = vld [vmem:[#allocation23_spill] sm:$0xff]  ;;  %v10655_v1 = vld [vmem:[#allocation41_spill] sm:$0xff] }
 0x409   :  { %5693 = vpow2.f32 %v3385_v7  ;;  %v3622_v5 = vadd.f32 1.0, %v3621_v62  ;;  %v3624_v35 = vand.u32 2147483647, %v10636_v27  ;;  %v3654_v47 = vadd.f32 1.0, %v10645_v3  ;;  %v9457_v15 = vpop.eup %5685 }
 0x40a   :  { %10646 = vst [vmem:[#allocation26_spill] sm:$0xff] %v9457_v15  ;;  %4377 = vmatmul.mubr.bf16.gmra.mrb[72].mxu0 %v4041_v44  ;;  %v3599_v12 = vsel %vm9444_vm0, %v3596_v51, %v3593_v36  ;;  %5695 = vpow2.f32 %v3389_v63  ;;  %v3657_v25 = vmul.f32 -0.5, %v10645_v3  ;;  %v3636_v20 = vadd.f32 1.0, %v10647_v41  ;;  %v9463_v60 = vpop.eup %5687  ;;  %v10656_v36 = vld [vmem:[#allocation59_spill] sm:$0xff] }
 0x40b   :  { %10648 = vst [vmem:[#allocation20_spill] sm:$0xff] %v9463_v60  ;;  %v3987_v28 = vsel %vm3155_vm11, %v10632_v56, %v3563_v50  ;;  %v3991_v58 = vsel %vm3159_vm12, %v10633_v24, %v3599_v12  ;;  %5697 = vlog2.f32 %v3654_v47  ;;  %v3639_v55 = vmul.f32 -0.5, %v10647_v41  ;;  %v10652_v56 = vld [vmem:[#allocation11_spill] sm:$0xff] }
 0x40c   :  { %v4043_v6 = vpack.c.bf16 %v3991_v58, %v3987_v28  ;;  %v3660_v61 = vand.u32 2147483647, %v10645_v3  ;;  %5699 = vlog2.f32 %v3636_v20  ;;  %v3623_v0 = vmul.f32 %v10636_v27, %v3622_v5  ;;  %v10671_v15 = vld [vmem:[#allocation51_spill] sm:$0xff]  ;;  %v10678_v5 = vld [vmem:[#allocation54_spill] sm:$0xff] }
 0x40d   :  { %v9474_v18 = vpop.eup %5689  ;;  %vm9477_vm1 = vcmp.lt.f32.partialorder %v3624_v35, 0.0004427343  ;;  %v3672_v62 = vadd.f32 1.0, %v10652_v56  ;;  %v3675_v24 = vmul.f32 -0.5, %v10652_v56  ;;  %vm3162_vm2 = vcmp.gt.f32.partialorder %v10653_v42, 20.0 }
 0x40e   :  { %10649 = vst [vmem:[#allocation58_spill] sm:$0xff] %v9474_v18  ;;  %4474 = vmatmul.mubr.bf16.gmra.mrb[72].mxu1 %v4043_v6  ;;  %v3658_v51 = vadd.f32 1.0, %v3657_v25  ;;  %v3642_v63 = vand.u32 2147483647, %v10647_v41  ;;  %v3609_v57 = vadd.f32 1.0, %v10654_v59  ;;  %v3612_v23 = vmul.f32 -0.5, %v10654_v59 }
 0x40f   :  { %v3640_v54 = vadd.f32 1.0, %v3639_v55  ;;  %5701 = vlog2.f32 %v3672_v62  ;;  %v3678_v27 = vand.u32 2147483647, %v10652_v56  ;;  %v3645_v44 = vadd.f32 1.0, %v10655_v1  ;;  %v10661_v6 = vld [vmem:[#allocation32_spill] sm:$0xff] }
 0x410   :  { %vm3166_vm3 = vcmp.gt.f32.partialorder %v10656_v36, 20.0  ;;  %vm9490_vm4 = vcmp.lt.f32.partialorder %v3660_v61, 0.0004427343  ;;  %5703 = vlog2.f32 %v3609_v57  ;;  %v3615_v35 = vand.u32 2147483647, %v10654_v59 }
 0x411   :  { %v5692_v50 = vpop.eup %5691  ;;  %v3648_v47 = vmul.f32 -0.5, %v10655_v1  ;;  %v3676_v25 = vadd.f32 1.0, %v3675_v24  ;;  %v3613_v20 = vadd.f32 1.0, %v3612_v23  ;;  %5705 = vlog2.f32 %v3645_v44  ;;  %v10665_v23 = vld [vmem:[#allocation43_spill] sm:$0xff]  ;;  %v10668_v44 = vld [vmem:[#allocation13_spill] sm:$0xff] }
 0x412   :  { %v3620_v12 = vmul.f32 0.6931472, %v5692_v50  ;;  %v3659_v28 = vmul.f32 %v10645_v3, %v3658_v51  ;;  %vm9497_vm5 = vcmp.lt.f32.partialorder %v3642_v63, 0.0004427343  ;;  %v3651_v55 = vand.u32 2147483647, %v10655_v1 }
 0x413   :  { %v3627_v61 = vadd.f32 1.0, %v10661_v6  ;;  %v9503_v62 = vpop.eup %5693  ;;  %v3641_v57 = vmul.f32 %v10647_v41, %v3640_v54  ;;  %vm9506_vm6 = vcmp.lt.f32.partialorder %v3678_v27, 0.0004427343  ;;  %v3630_v24 = vmul.f32 -0.5, %v10661_v6  ;;  %v10667_v63 = vld [vmem:[#allocation53_spill] sm:$0xff] }
 0x414   :  { %10662 = vst [vmem:[#allocation16_spill] sm:$0xff] %v9503_v62  ;;  %v3663_v3 = vadd.f32 1.0, %v10665_v23  ;;  %v9512_v51 = vpop.eup %5695  ;;  %vm3164_vm7 = vcmp.gt.f32.partialorder %v10667_v63, 20.0  ;;  %vm3168_vm8 = vcmp.gt.f32.partialorder %v10668_v44, 20.0  ;;  %v3626_v50 = vsel %vm9477_vm1, %v3623_v0, %v3620_v12  ;;  %v10672_v62 = vld [vmem:[#allocation62_spill] sm:$0xff] }
 0x415   :  { %10666 = vst [vmem:[#allocation21_spill] sm:$0xff] %v9512_v51  ;;  %vm9518_vm9 = vcmp.lt.f32.partialorder %v3615_v35, 0.0004427343  ;;  %v3649_v41 = vadd.f32 1.0, %v3648_v47  ;;  %5707 = vlog2.f32 %v3627_v61  ;;  %v5698_v54 = vpop.eup %5697  ;;  %v3677_v27 = vmul.f32 %v10652_v56, %v3676_v25  ;;  %v10675_v47 = vld [vmem:[#allocation67_spill] sm:$0xff] }
 0x416   :  { %v3614_v4 = vmul.f32 %v10654_v59, %v3613_v20  ;;  %v3633_v39 = vand.u32 2147483647, %v10661_v6  ;;  %5709 = vlog2.f32 %v3663_v3  ;;  %v5700_v51 = vpop.eup %5699  ;;  %vm3161_vm10 = vcmp.gt.f32.partialorder %v10671_v15, 20.0 }
 0x417   :  { %vm3165_vm11 = vcmp.gt.f32.partialorder %v10672_v62, 20.0  ;;  %v3656_v0 = vmul.f32 0.6931472, %v5698_v54  ;;  %vm9527_vm12 = vcmp.lt.f32.partialorder %v3651_v55, 0.0004427343  ;;  %v3666_v35 = vmul.f32 -0.5, %v10665_v23 }
 0x418   :  { %v3690_v12 = vadd.f32 1.0, %v10675_v47  ;;  %v3994_v56 = vsel %vm3162_vm2, %v10653_v42, %v3626_v50  ;;  %v3638_v59 = vmul.f32 0.6931472, %v5700_v51  ;;  %v3631_v25 = vadd.f32 1.0, %v3630_v24 }
 0x419   :  { %v3726_v20 = vadd.f32 1.0, %v9076_v52  ;;  %v3662_v61 = vsel %vm9490_vm4, %v3659_v28, %v3656_v0  ;;  %v3650_v55 = vmul.f32 %v10655_v1, %v3649_v41  ;;  %v3693_v3 = vmul.f32 -0.5, %v10675_v47  ;;  %v5702_v54 = vpop.eup %5701  ;;  %v10679_v28 = vld [vmem:[#allocation15_spill] sm:$0xff] }
 0x41a   :  { %5711 = vlog2.f32 %v3690_v12  ;;  %v3998_v45 = vsel %vm3166_vm3, %v10656_v36, %v3662_v61  ;;  %vm9544_vm13 = vcmp.lt.f32.partialorder %v3633_v39, 0.0004427343  ;;  %v3669_v42 = vand.u32 2147483647, %v10665_v23  ;;  %v5704_v24 = vpop.eup %5703  ;;  %v10680_v61 = vld [vmem:[#allocation69_spill] sm:$0xff] }
 0x41b   :  { %5713 = vlog2.f32 %v3726_v20  ;;  %vm3163_vm14 = vcmp.gt.f32.partialorder %v10678_v5, 20.0  ;;  %vm3167_vm15 = vcmp.gt.f32.partialorder %v10679_v28, 20.0  ;;  %v4046_v1 = vpack.c.bf16 %v3998_v45, %v3994_v56  ;;  %v5706_v0 = vpop.eup %5705  ;;  %v10681_v56 = vld [vmem:[#allocation47_spill] sm:$0xff] }
 0x41c   :  { %v3644_v51 = vsel %vm9497_vm5, %v3641_v57, %v3638_v59  ;;  %v3674_v50 = vmul.f32 0.6931472, %v5702_v54  ;;  %v3667_v41 = vadd.f32 1.0, %v3666_v35  ;;  %v3611_v36 = vmul.f32 0.6931472, %v5704_v24 }
 0x41d   :  { %v3632_v39 = vmul.f32 %v10661_v6, %v3631_v25  ;;  %v3729_v12 = vmul.f32 -0.5, %v9076_v52  ;;  %v3708_v18 = vadd.f32 1.0, %v10680_v61  ;;  %4384 = vmatprep.mubr.bf16.mxu0 %v4046_v1  ;;  %v3647_v16 = vmul.f32 0.6931472, %v5706_v0 }
 0x41e   :  { %v3680_v20 = vsel %vm9506_vm6, %v3677_v27, %v3674_v50  ;;  %v3694_v60 = vadd.f32 1.0, %v3693_v3  ;;  %v3696_v45 = vand.u32 2147483647, %v10675_v47  ;;  %v3996_v58 = vsel %vm3164_vm7, %v10667_v63, %v3644_v51 }
 0x41f   :  { %v4000_v6 = vsel %vm3168_vm8, %v10668_v44, %v3680_v20  ;;  %v3617_v57 = vsel %vm9518_vm9, %v3614_v4, %v3611_v36  ;;  %5715 = vlog2.f32 %v3708_v18  ;;  %v5708_v35 = vpop.eup %5707  ;;  %vm3170_vm0 = vcmp.gt.f32.partialorder %v10681_v56, 20.0  ;;  %v10688_v20 = vld [vmem:[#allocation12_spill] sm:$0xff] }
 0x420   :  { %vm3174_vm1 = vcmp.gt.f32.partialorder %v10682_v17, 20.0  ;;  %v4048_v27 = vpack.c.bf16 %v4000_v6, %v3996_v58  ;;  %v3653_v59 = vsel %vm9527_vm12, %v3650_v55, %v3647_v16  ;;  %v3668_v25 = vmul.f32 %v10665_v23, %v3667_v41  ;;  %v5710_v3 = vpop.eup %5709 }
 0x421   :  { %v3732_v63 = vand.u32 2147483647, %v9076_v52  ;;  %v3993_v11 = vsel %vm3161_vm10, %v10671_v15, %v3617_v57  ;;  %v3997_v4 = vsel %vm3165_vm11, %v10672_v62, %v3653_v59  ;;  %v3629_v18 = vmul.f32 0.6931472, %v5708_v35 }
 0x422   :  { %v3730_v44 = vadd.f32 1.0, %v3729_v12  ;;  %4481 = vmatprep.mubr.bf16.mxu1 %v4048_v27  ;;  %v4045_v54 = vpack.c.bf16 %v3997_v4, %v3993_v11  ;;  %v3665_v24 = vmul.f32 0.6931472, %v5710_v3  ;;  %v3711_v16 = vmul.f32 -0.5, %v10680_v61  ;;  %v10690_v27 = vld [vmem:[#allocation57_spill] sm:$0xff] }
 0x423   :  { %v3744_v23 = vadd.f32 1.0, %v9107_v22  ;;  %v10683_v7 = vmin.f32 %v9431_v32, 20.0  ;;  %v3635_v1 = vsel %vm9544_vm13, %v3632_v39, %v3629_v18  ;;  %vm3670_vm2 = vcmp.lt.f32.partialorder %v3669_v42, 0.0004427343 }
 0x424   :  { %v3695_v15 = vmul.f32 %v10675_v47, %v3694_v60  ;;  %v5712_v51 = vpop.eup %5711  ;;  %4385 = vmatmul.mubr.bf16.gmra.mrb[76].mxu0 %v4045_v54  ;;  %v3671_v62 = vsel %vm3670_vm2, %v3668_v25, %v3665_v24  ;;  %vm9586_vm3 = vcmp.lt.f32.partialorder %v3696_v45, 0.0004427343  ;;  %vm9590_vm4 = vcmp.lt.f32.partialorder %v3732_v63, 0.0004427343  ;;  %v10691_v63 = vld [vmem:[#allocation63_spill] sm:$0xff] }
 0x425   :  { %v3387_v55 = vmul.f32 1.442695, %v10683_v7  ;;  %5717 = vlog2.f32 %v3744_v23  ;;  %v5714_v0 = vpop.eup %5713  ;;  %v3995_v14 = vsel %vm3163_vm14, %v10678_v5, %v3635_v1  ;;  %v3999_v60 = vsel %vm3167_vm15, %v10679_v28, %v3671_v62  ;;  %v10689_v5 = vld [vmem:[#allocation70_spill] sm:$0xff]  ;;  %v10694_v62 = vld [vmem:[#allocation72_spill] sm:$0xff] }
 0x426   :  { %v3692_v47 = vmul.f32 0.6931472, %v5712_v51  ;;  %v3731_v42 = vmul.f32 %v9076_v52, %v3730_v44  ;;  %v4047_v36 = vpack.c.bf16 %v3999_v60, %v3995_v14  ;;  %v3728_v39 = vmul.f32 0.6931472, %v5714_v0  ;;  %v10701_v14 = vld [vmem:[#allocation29_spill] sm:$0xff]  ;;  %v10702_v60 = vld [vmem:[#allocation30_spill] sm:$0xff] }
 0x427   :  { %v3712_v12 = vadd.f32 1.0, %v3711_v16  ;;  %v3681_v45 = vadd.f32 1.0, %v10688_v20  ;;  %v3714_v6 = vand.u32 2147483647, %v10680_v61  ;;  %v3747_v57 = vmul.f32 -0.5, %v9107_v22 }
 0x428   :  { %v3698_v58 = vsel %vm9586_vm3, %v3695_v15, %v3692_v47  ;;  %v3717_v35 = vadd.f32 1.0, %v10689_v5  ;;  %vm3172_vm5 = vcmp.gt.f32.partialorder %v10690_v27, 20.0  ;;  %4482 = vmatmul.mubr.bf16.gmra.mrb[76].mxu1 %v4047_v36  ;;  %v3734_v52 = vsel %vm9590_vm4, %v3731_v42, %v3728_v39 }
 0x429   :  { %v3750_v28 = vand.u32 2147483647, %v9107_v22  ;;  %5719 = vlog2.f32 %v3681_v45  ;;  %v3684_v59 = vmul.f32 -0.5, %v10688_v20  ;;  %v5716_v25 = vpop.eup %5715  ;;  %vm3176_vm6 = vcmp.gt.f32.partialorder %v10691_v63, 20.0 }
 0x42a   :  { %v4002_v3 = vsel %vm3170_vm0, %v10681_v56, %v3698_v58  ;;  %v4006_v11 = vsel %vm3174_vm1, %v10682_v17, %v3734_v52  ;;  %v3687_v4 = vand.u32 2147483647, %v10688_v20  ;;  %5721 = vlog2.f32 %v3717_v35  ;;  %v10693_v56 = vld [vmem:[#allocation65_spill] sm:$0xff] }
 0x42b   :  { %v10692_v18 = vmin.f32 %v9450_v40, 20.0  ;;  %v4050_v54 = vpack.c.bf16 %v4006_v11, %v4002_v3  ;;  %v3710_v24 = vmul.f32 0.6931472, %v5716_v25  ;;  %v3720_v16 = vmul.f32 -0.5, %v10689_v5 }
 0x42c   :  { %5723 = vpow2.f32 %v3387_v55  ;;  %v3713_v23 = vmul.f32 %v10680_v61, %v3712_v12  ;;  %v3748_v7 = vadd.f32 1.0, %v3747_v57  ;;  %v3699_v1 = vadd.f32 1.0, %v10693_v56 }
 0x42d   :  { %v9622_v44 = vmul.f32 1.442695, %v10692_v18  ;;  %4392 = vmatprep.mubr.bf16.mxu0 %v4050_v54  ;;  %v3685_v15 = vadd.f32 1.0, %v3684_v59  ;;  %v3723_v17 = vand.u32 2147483647, %v10689_v5  ;;  %v3702_v51 = vmul.f32 -0.5, %v10693_v56 }
 0x42e   :  { %v3735_v50 = vadd.f32 1.0, %v10694_v62  ;;  %vm9630_vm7 = vcmp.lt.f32.partialorder %v3714_v6, 0.0004427343  ;;  %vm9634_vm8 = vcmp.lt.f32.partialorder %v3750_v28, 0.0004427343  ;;  %5725 = vlog2.f32 %v3699_v1  ;;  %v10705_v18 = vld [vmem:[#allocation45_spill] sm:$0xff] }
 0x42f   :  { %vm9638_vm9 = vcmp.lt.f32.partialorder %v3687_v4, 0.0004427343  ;;  %v5718_v55 = vpop.eup %5717  ;;  %vm3169_vm10 = vcmp.gt.f32.partialorder %v10701_v14, 20.0  ;;  %vm3173_vm11 = vcmp.gt.f32.partialorder %v10702_v60, 20.0  ;;  %v3716_v47 = vsel %vm9630_vm7, %v3713_v23, %v3710_v24  ;;  %v10706_v54 = vld [vmem:[#allocation33_spill] sm:$0xff] }
 0x430   :  { %v3721_v42 = vadd.f32 1.0, %v3720_v16  ;;  %5727 = vlog2.f32 %v3735_v50  ;;  %v3738_v36 = vmul.f32 -0.5, %v10694_v62  ;;  %v3746_v39 = vmul.f32 0.6931472, %v5718_v55 }
 0x431   :  { %v3749_v12 = vmul.f32 %v9107_v22, %v3748_v7  ;;  %v3705_v45 = vand.u32 2147483647, %v10693_v56  ;;  %v3762_v58 = vadd.f32 1.0, %v9150_v29  ;;  %v3686_v6 = vmul.f32 %v10688_v20, %v3685_v15 }
 0x432   :  { %vm9651_vm12 = vcmp.lt.f32.partialorder %v3723_v17, 0.0004427343  ;;  %v3703_v35 = vadd.f32 1.0, %v3702_v51  ;;  %v3798_v52 = vadd.f32 1.0, %v9185_v43  ;;  %v4004_v22 = vsel %vm3172_vm5, %v10690_v27, %v3716_v47 }
 0x433   :  { %v3752_v28 = vsel %vm9634_vm8, %v3749_v12, %v3746_v39  ;;  %5729 = vlog2.f32 %v3762_v58  ;;  %v3765_v59 = vmul.f32 -0.5, %v9150_v29  ;;  %v5720_v25 = vpop.eup %5719  ;;  %v3722_v3 = vmul.f32 %v10689_v5, %v3721_v42  ;;  %v10709_v42 = vld [vmem:[#allocation22_spill] sm:$0xff] }
 0x434   :  { %v4008_v20 = vsel %vm3176_vm6, %v10691_v63, %v3752_v28  ;;  %v3739_v11 = vadd.f32 1.0, %v3738_v36  ;;  %5731 = vlog2.f32 %v3798_v52  ;;  %v5722_v4 = vpop.eup %5721  ;;  %vm3171_vm13 = vcmp.gt.f32.partialorder %v10705_v18, 20.0  ;;  %v10710_v36 = vld [vmem:[#allocation71_spill] sm:$0xff] }
 0x435   :  { %vm3175_vm14 = vcmp.gt.f32.partialorder %v10706_v54, 20.0  ;;  %v4052_v24 = vpack.c.bf16 %v4008_v20, %v4004_v22  ;;  %v3683_v16 = vmul.f32 0.6931472, %v5720_v25  ;;  %vm9668_vm15 = vcmp.lt.f32.partialorder %v3705_v45, 0.0004427343 }
 0x436   :  { %v3801_v23 = vmul.f32 -0.5, %v9185_v43  ;;  %v3719_v7 = vmul.f32 0.6931472, %v5722_v4  ;;  %v3704_v63 = vmul.f32 %v10693_v56, %v3703_v35  ;;  %v3741_v5 = vand.u32 2147483647, %v10694_v62  ;;  %v9676_v15 = vpop.eup %5723 }
 0x437   :  { %v3780_v1 = vadd.f32 1.0, %v9153_v31  ;;  %4489 = vmatprep.mubr.bf16.mxu1 %v4052_v24  ;;  %v3689_v17 = vsel %vm9638_vm9, %v3686_v6, %v3683_v16  ;;  %v3766_v51 = vadd.f32 1.0, %v3765_v59  ;;  %v3768_v50 = vand.u32 2147483647, %v9150_v29  ;;  %v10717_v24 = vld [vmem:[#allocation64_spill] sm:$0xff] }
 0x438   :  { %v3816_v41 = vadd.f32 1.0, %v9206_v26  ;;  %v3725_v0 = vsel %vm9651_vm12, %v3722_v3, %v3719_v7  ;;  %v3740_v56 = vmul.f32 %v10694_v62, %v3739_v11  ;;  %v3804_v55 = vand.u32 2147483647, %v9185_v43  ;;  %v5726_v47 = vpop.eup %5725 }
 0x439   :  { %5733 = vlog2.f32 %v3780_v1  ;;  %vm3178_vm0 = vcmp.gt.f32.partialorder %v10709_v42, 20.0  ;;  %vm3182_vm1 = vcmp.gt.f32.partialorder %v10710_v36, 20.0  ;;  %v4001_v61 = vsel %vm3169_vm10, %v10701_v14, %v3689_v17 }
 0x43a   :  { %v4005_v39 = vsel %vm3173_vm11, %v10702_v60, %v3725_v0  ;;  %v3802_v12 = vadd.f32 1.0, %v3801_v23  ;;  %5735 = vlog2.f32 %v3816_v41  ;;  %v5728_v45 = vpop.eup %5727  ;;  %v3701_v58 = vmul.f32 0.6931472, %v5726_v47 }
 0x43b   :  { %v4049_v62 = vpack.c.bf16 %v4005_v39, %v4001_v61  ;;  %vm9694_vm2 = vcmp.lt.f32.partialorder %v3741_v5, 0.0004427343  ;;  %v3783_v57 = vmul.f32 -0.5, %v9153_v31  ;;  %v3737_v35 = vmul.f32 0.6931472, %v5728_v45 }
 0x43c   :  { %v3767_v52 = vmul.f32 %v9150_v29, %v3766_v51  ;;  %vm9700_vm3 = vcmp.lt.f32.partialorder %v3768_v50, 0.0004427343  ;;  %v3753_v60 = vadd.f32 1.0, %v9126_v33  ;;  %v3707_v28 = vsel %vm9668_vm15, %v3704_v63, %v3701_v58  ;;  %v10723_v58 = vld [vmem:[#allocation66_spill] sm:$0xff] }
 0x43d   :  { %4393 = vmatmul.mubr.bf16.gmra.mrb[80].mxu0 %v4049_v62  ;;  %vm9707_vm4 = vcmp.lt.f32.partialorder %v3804_v55, 0.0004427343  ;;  %v3819_v59 = vmul.f32 -0.5, %v9206_v26  ;;  %v3789_v25 = vadd.f32 1.0, %v9159_v30  ;;  %v5730_v20 = vpop.eup %5729  ;;  %v3743_v29 = vsel %vm9694_vm2, %v3740_v56, %v3737_v35  ;;  %v10722_v62 = vld [vmem:[#allocation35_spill] sm:$0xff] }
 0x43e   :  { %v3803_v3 = vmul.f32 %v9185_v43, %v3802_v12  ;;  %v3786_v11 = vand.u32 2147483647, %v9153_v31  ;;  %5737 = vlog2.f32 %v3753_v60  ;;  %v5732_v4 = vpop.eup %5731  ;;  %vm3180_vm5 = vcmp.gt.f32.partialorder %v10717_v24, 20.0 }
 0x43f   :  { %v4003_v16 = vsel %vm3171_vm13, %v10705_v18, %v3707_v28  ;;  %v4007_v27 = vsel %vm3175_vm14, %v10706_v54, %v3743_v29  ;;  %v3764_v23 = vmul.f32 0.6931472, %v5730_v20  ;;  %v3784_v7 = vadd.f32 1.0, %v3783_v57 }
 0x440   :  { %v4051_v63 = vpack.c.bf16 %v4007_v27, %v4003_v16  ;;  %v3800_v5 = vmul.f32 0.6931472, %v5732_v4  ;;  %v3822_v43 = vand.u32 2147483647, %v9206_v26  ;;  %5739 = vlog2.f32 %v3789_v25 }
 0x441   :  { %v3770_v1 = vsel %vm9700_vm3, %v3767_v52, %v3764_v23  ;;  %v3820_v17 = vadd.f32 1.0, %v3819_v59  ;;  %v3756_v51 = vmul.f32 -0.5, %v9126_v33  ;;  %v3771_v50 = vadd.f32 1.0, %v9129_v46 }
 0x442   :  { %5741 = vpow2.f32 %v9622_v44  ;;  %4490 = vmatmul.mubr.bf16.gmra.mrb[80].mxu1 %v4051_v63  ;;  %v3806_v18 = vsel %vm9707_vm4, %v3803_v3, %v3800_v5  ;;  %vm9732_vm6 = vcmp.lt.f32.partialorder %v3786_v11, 0.0004427343  ;;  %v3792_v41 = vmul.f32 -0.5, %v9159_v30 }
 0x443   :  { %v5734_v0 = vpop.eup %5733  ;;  %v4010_v56 = vsel %vm3178_vm0, %v10709_v42, %v3770_v1  ;;  %v4014_v55 = vsel %vm3182_vm1, %v10710_v36, %v3806_v18  ;;  %v3785_v44 = vmul.f32 %v9153_v31, %v3784_v7  ;;  %5743 = vlog2.f32 %v3771_v50  ;;  %v10727_v1 = vld [vmem:[#allocation68_spill] sm:$0xff] }
 0x444   :  { %v5736_v47 = vpop.eup %5735  ;;  %v4054_v61 = vpack.c.bf16 %v4014_v55, %v4010_v56  ;;  %v3782_v39 = vmul.f32 0.6931472, %v5734_v0  ;;  %vm9744_vm7 = vcmp.lt.f32.partialorder %v3822_v43, 0.0004427343  ;;  %v3759_v45 = vand.u32 2147483647, %v9126_v33 }
 0x445   :  { %vm3177_vm8 = vcmp.gt.f32.partialorder %v10722_v62, 20.0  ;;  %vm3181_vm9 = vcmp.gt.f32.partialorder %v10723_v58, 20.0  ;;  %v3818_v42 = vmul.f32 0.6931472, %v5736_v47  ;;  %v3821_v6 = vmul.f32 %v9206_v26, %v3820_v17  ;;  %v10726_v43 = vld [vmem:[#allocation38_spill] sm:$0xff] }
 0x446   :  { %v3757_v36 = vadd.f32 1.0, %v3756_v51  ;;  %v3807_v31 = vadd.f32 1.0, %v9173_v2  ;;  %4400 = vmatprep.mubr.bf16.mxu0 %v4054_v61  ;;  %v3788_v57 = vsel %vm9732_vm6, %v3785_v44, %v3782_v39  ;;  %v3793_v35 = vadd.f32 1.0, %v3792_v41 }
 0x447   :  { %v3774_v52 = vmul.f32 -0.5, %v9129_v46  ;;  %v3834_v14 = vadd.f32 1.0, %v9314_v9  ;;  %vm3184_vm10 = vcmp.gt.f32.partialorder %v9085_v53, 20.0  ;;  %v3824_v60 = vsel %vm9744_vm7, %v3821_v6, %v3818_v42  ;;  %v10732_v6 = vld [vmem:[#allocation75_spill] sm:$0xff] }
 0x448   :  { %v3795_v28 = vand.u32 2147483647, %v9159_v30  ;;  %5745 = vlog2.f32 %v3807_v31  ;;  %v5738_v26 = vpop.eup %5737  ;;  %v4012_v22 = vsel %vm3180_vm5, %v10717_v24, %v3788_v57  ;;  %v4016_v59 = vsel %vm3184_vm10, %v9085_v53, %v3824_v60 }
 0x449   :  { %v3810_v25 = vmul.f32 -0.5, %v9173_v2  ;;  %5747 = vlog2.f32 %v3834_v14  ;;  %v4056_v20 = vpack.c.bf16 %v4016_v59, %v4012_v22  ;;  %v3755_v29 = vmul.f32 0.6931472, %v5738_v26 }
 0x44a   :  { %v3758_v3 = vmul.f32 %v9126_v33, %v3757_v36  ;;  %vm9767_vm11 = vcmp.lt.f32.partialorder %v3759_v45, 0.0004427343  ;;  %v5740_v4 = vpop.eup %5739  ;;  %v3794_v16 = vmul.f32 %v9159_v30, %v3793_v35  ;;  %v3775_v27 = vadd.f32 1.0, %v3774_v52 }
 0x44b   :  { %v3777_v23 = vand.u32 2147483647, %v9129_v46  ;;  %v3870_v24 = vadd.f32 1.0, %v9363_v37  ;;  %4497 = vmatprep.mubr.bf16.mxu1 %v4056_v20  ;;  %v3791_v7 = vmul.f32 0.6931472, %v5740_v4  ;;  %v3837_v63 = vmul.f32 -0.5, %v9314_v9 }
 0x44c   :  { %v3761_v53 = vsel %vm9767_vm11, %v3758_v3, %v3755_v29  ;;  %v3852_v33 = vadd.f32 1.0, %v9326_v10  ;;  %v9778_v5 = vpop.eup %5741  ;;  %vm3179_vm12 = vcmp.gt.f32.partialorder %v10726_v43, 20.0  ;;  %vm3183_vm13 = vcmp.gt.f32.partialorder %v10727_v1, 20.0  ;;  %v10737_v4 = vld [vmem:[#allocation76_spill] sm:$0xff] }
 0x44d   :  { %vm3796_vm14 = vcmp.lt.f32.partialorder %v3795_v28, 0.0004427343  ;;  %v3811_v30 = vadd.f32 1.0, %v3810_v25  ;;  %v3813_v17 = vand.u32 2147483647, %v9173_v2  ;;  %5749 = vlog2.f32 %v3870_v24  ;;  %v5744_v51 = vpop.eup %5743 }
 0x44e   :  { %v3797_v50 = vsel %vm3796_vm14, %v3794_v16, %v3791_v7  ;;  %v3840_v18 = vand.u32 2147483647, %v9314_v9  ;;  %v3873_v54 = vmul.f32 -0.5, %v9363_v37  ;;  %5751 = vlog2.f32 %v3852_v33 }
 0x44f   :  { %v4009_v41 = vsel %vm3177_vm8, %v10722_v62, %v3761_v53  ;;  %v4013_v0 = vsel %vm3181_vm9, %v10723_v58, %v3797_v50  ;;  %v3773_v56 = vmul.f32 0.6931472, %v5744_v51  ;;  %vm9791_vm15 = vcmp.lt.f32.partialorder %v3777_v23, 0.0004427343 }
 0x450   :  { %v4053_v44 = vpack.c.bf16 %v4013_v0, %v4009_v41  ;;  %v3776_v47 = vmul.f32 %v9129_v46, %v3775_v27  ;;  %v3838_v61 = vadd.f32 1.0, %v3837_v63  ;;  %v3888_v39 = vadd.f32 1.0, %v9373_v13 }
 0x451   :  { %vm9797_vm0 = vcmp.lt.f32.partialorder %v3813_v17, 0.0004427343  ;;  %v3876_v45 = vand.u32 2147483647, %v9363_v37  ;;  %v3855_v62 = vmul.f32 -0.5, %v9326_v10  ;;  %v3825_v58 = vadd.f32 1.0, %v9218_v34 }
 0x452   :  { %v5746_v42 = vpop.eup %5745  ;;  %vm3186_vm1 = vcmp.gt.f32.partialorder %v10732_v6, 20.0  ;;  %vm3190_vm2 = vcmp.gt.f32.partialorder %v9260_v38, 20.0  ;;  %4401 = vmatmul.mubr.bf16.gmra.mrb[84].mxu0 %v4053_v44  ;;  %v3812_v46 = vmul.f32 %v9173_v2, %v3811_v30  ;;  %vm9807_vm3 = vcmp.lt.f32.partialorder %v3840_v18, 0.0004427343 }
 0x453   :  { %v3874_v31 = vadd.f32 1.0, %v3873_v54  ;;  %5753 = vlog2.f32 %v3888_v39  ;;  %v5748_v57 = vpop.eup %5747  ;;  %v3779_v35 = vsel %vm9791_vm15, %v3776_v47, %v3773_v56  ;;  %v3809_v52 = vmul.f32 0.6931472, %v5746_v42  ;;  %v10742_v54 = vld [vmem:[#allocation73_spill] sm:$0xff] }
 0x454   :  { %v3858_v14 = vand.u32 2147483647, %v9326_v10  ;;  %5755 = vlog2.f32 %v3825_v58  ;;  %v3836_v60 = vmul.f32 0.6931472, %v5748_v57  ;;  %v3839_v28 = vmul.f32 %v9314_v9, %v3838_v61 }
 0x455   :  { %v3891_v26 = vmul.f32 -0.5, %v9373_v13  ;;  %v3861_v2 = vadd.f32 1.0, %v9338_v19  ;;  %v3815_v22 = vsel %vm9797_vm0, %v3812_v46, %v3809_v52  ;;  %vm9819_vm4 = vcmp.lt.f32.partialorder %v3876_v45, 0.0004427343  ;;  %v10746_v52 = vld [vmem:[#allocation74_spill] sm:$0xff] }
 0x456   :  { %v3856_v25 = vadd.f32 1.0, %v3855_v62  ;;  %v3894_v20 = vand.u32 2147483647, %v9373_v13  ;;  %v4011_v29 = vsel %vm3179_vm12, %v10726_v43, %v3779_v35  ;;  %v4015_v9 = vsel %vm3183_vm13, %v10727_v1, %v3815_v22 }
 0x457   :  { %v3828_v3 = vmul.f32 -0.5, %v9218_v34  ;;  %5757 = vlog2.f32 %v3861_v2  ;;  %v5750_v11 = vpop.eup %5749  ;;  %vm3188_vm5 = vcmp.gt.f32.partialorder %v10737_v4, 20.0  ;;  %vm3192_vm6 = vcmp.gt.f32.partialorder %v9282_v49, 20.0 }
 0x458   :  { %v4055_v16 = vpack.c.bf16 %v4015_v9, %v4011_v29  ;;  %v3875_v27 = vmul.f32 %v9363_v37, %v3874_v31  ;;  %vm9834_vm7 = vcmp.lt.f32.partialorder %v3858_v14, 0.0004427343  ;;  %v3864_v24 = vmul.f32 -0.5, %v9338_v19  ;;  %v5752_v53 = vpop.eup %5751  ;;  %v10747_v14 = vld [vmem:[#allocation40_spill] sm:$0xff] }
 0x459   :  { %v3842_v7 = vsel %vm9807_vm3, %v3839_v28, %v3836_v60  ;;  %v3872_v63 = vmul.f32 0.6931472, %v5750_v11  ;;  %v3892_v33 = vadd.f32 1.0, %v3891_v26  ;;  %v3843_v43 = vadd.f32 1.0, %v9302_v21 }
 0x45a   :  { %4498 = vmatmul.mubr.bf16.gmra.mrb[84].mxu1 %v4055_v16  ;;  %v3854_v1 = vmul.f32 0.6931472, %v5752_v53  ;;  %v3857_v30 = vmul.f32 %v9326_v10, %v3856_v25  ;;  %v3831_v37 = vand.u32 2147483647, %v9218_v34  ;;  %v3879_v17 = vadd.f32 1.0, %v9345_v48  ;;  %v10751_v53 = vld [vmem:[#allocation18_spill] sm:$0xff] }
 0x45b   :  { %v3878_v51 = vsel %vm9819_vm4, %v3875_v27, %v3872_v63  ;;  %vm9847_vm8 = vcmp.lt.f32.partialorder %v3894_v20, 0.0004427343  ;;  %v3829_v18 = vadd.f32 1.0, %v3828_v3  ;;  %5759 = vlog2.f32 %v3843_v43  ;;  %v10750_v20 = vld [vmem:[#allocation58_spill] sm:$0xff] }
 0x45c   :  { %vm3185_vm9 = vcmp.gt.f32.partialorder %v10742_v54, 20.0  ;;  %vm3189_vm10 = vcmp.gt.f32.partialorder %v9234_v8, 20.0  ;;  %v4018_v10 = vsel %vm3186_vm1, %v10732_v6, %v3842_v7  ;;  %v4022_v41 = vsel %vm3190_vm2, %v9260_v38, %v3878_v51  ;;  %v10745_v38 = vld [vmem:[#allocation20_spill] sm:$0xff] }
 0x45d   :  { %v3865_v0 = vadd.f32 1.0, %v3864_v24  ;;  %5761 = vlog2.f32 %v3879_v17  ;;  %v5754_v56 = vpop.eup %5753  ;;  %v4058_v55 = vpack.c.bf16 %v4022_v41, %v4018_v10  ;;  %v3893_v44 = vmul.f32 %v9373_v13, %v3892_v33  ;;  %v10752_v51 = vld [vmem:[#allocation48_spill] sm:$0xff] }
 0x45e   :  { %v3867_v47 = vand.u32 2147483647, %v9338_v19  ;;  %v3846_v61 = vmul.f32 -0.5, %v9302_v21  ;;  %v5756_v39 = vpop.eup %5755  ;;  %v3860_v12 = vsel %vm9834_vm7, %v3857_v30, %v3854_v1  ;;  %v3890_v45 = vmul.f32 0.6931472, %v5754_v56 }
 0x45f   :  { %vm9864_vm11 = vcmp.lt.f32.partialorder %v3831_v37, 0.0004427343  ;;  %v3906_v58 = vadd.f32 1.0, %v10745_v38  ;;  %4408 = vmatprep.mubr.bf16.mxu0 %v4058_v55  ;;  %v3827_v42 = vmul.f32 0.6931472, %v5756_v39  ;;  %v3882_v13 = vmul.f32 -0.5, %v9345_v48 }
 0x460   :  { %v3849_v6 = vand.u32 2147483647, %v9302_v21  ;;  %v3942_v46 = vadd.f32 1.0, %v9676_v15  ;;  %v3896_v36 = vsel %vm9847_vm8, %v3893_v44, %v3890_v45  ;;  %v3830_v31 = vmul.f32 %v9218_v34, %v3829_v18  ;;  %v10755_v39 = vld [vmem:[#allocation16_spill] sm:$0xff] }
 0x461   :  { %v3866_v57 = vmul.f32 %v9338_v19, %v3865_v0  ;;  %5763 = vlog2.f32 %v3906_v58  ;;  %v5758_v35 = vpop.eup %5757  ;;  %vm3187_vm12 = vcmp.gt.f32.partialorder %v10746_v52, 20.0  ;;  %vm3191_vm13 = vcmp.gt.f32.partialorder %v10747_v14, 20.0 }
 0x462   :  { %v4020_v60 = vsel %vm3188_vm5, %v10737_v4, %v3860_v12  ;;  %v4024_v28 = vsel %vm3192_vm6, %v9282_v49, %v3896_v36  ;;  %v3847_v26 = vadd.f32 1.0, %v3846_v61  ;;  %5765 = vlog2.f32 %v3942_v46 }
 0x463   :  { %v4060_v2 = vpack.c.bf16 %v4024_v28, %v4020_v60  ;;  %v3833_v34 = vsel %vm9864_vm11, %v3830_v31, %v3827_v42  ;;  %v3863_v19 = vmul.f32 0.6931472, %v5758_v35  ;;  %v3909_v22 = vmul.f32 -0.5, %v10745_v38  ;;  %v10756_v42 = vld [vmem:[#allocation26_spill] sm:$0xff] }
 0x464   :  { %vm3868_vm14 = vcmp.lt.f32.partialorder %v3867_v47, 0.0004427343  ;;  %vm9887_vm15 = vcmp.lt.f32.partialorder %v3849_v6, 0.0004427343  ;;  %v3883_v25 = vadd.f32 1.0, %v3882_v13  ;;  %v3924_v29 = vadd.f32 1.0, %v10750_v20 }
 0x465   :  { %4505 = vmatprep.mubr.bf16.mxu1 %v4060_v2  ;;  %v3869_v9 = vsel %vm3868_vm14, %v3866_v57, %v3863_v19  ;;  %v3885_v49 = vand.u32 2147483647, %v9345_v48  ;;  %v3945_v3 = vmul.f32 -0.5, %v9676_v15  ;;  %v3960_v11 = vadd.f32 1.0, %v9778_v5  ;;  %v5760_v4 = vpop.eup %5759 }
 0x466   :  { %v4017_v16 = vsel %vm3185_vm9, %v10742_v54, %v3833_v34  ;;  %v4021_v27 = vsel %vm3189_vm10, %v9234_v8, %v3869_v9  ;;  %v3912_v23 = vand.u32 2147483647, %v10745_v38  ;;  %5767 = vlog2.f32 %v3924_v29 }
 0x467   :  { %v5762_v24 = vpop.eup %5761  ;;  %vm3194_vm0 = vcmp.gt.f32.partialorder %v10751_v53, 20.0  ;;  %v4057_v7 = vpack.c.bf16 %v4021_v27, %v4017_v16  ;;  %v3845_v63 = vmul.f32 0.6931472, %v5760_v4  ;;  %v3848_v33 = vmul.f32 %v9302_v21, %v3847_v26  ;;  %v10757_v26 = vld [vmem:[#allocation21_spill] sm:$0xff] }
 0x468   :  { %v3910_v43 = vadd.f32 1.0, %v3909_v22  ;;  %v3881_v1 = vmul.f32 0.6931472, %v5762_v24  ;;  %v3884_v30 = vmul.f32 %v9345_v48, %v3883_v25  ;;  %v3927_v37 = vmul.f32 -0.5, %v10750_v20 }
 0x469   :  { %5769 = vlog2.f32 %v3960_v11  ;;  %4409 = vmatmul.mubr.bf16.gmra.mrb[88].mxu0 %v4057_v7  ;;  %v3851_v8 = vsel %vm9887_vm15, %v3848_v33, %v3845_v63  ;;  %vm3886_vm1 = vcmp.lt.f32.partialorder %v3885_v49, 0.0004427343  ;;  %v3946_v17 = vadd.f32 1.0, %v3945_v3 }
 0x46a   :  { %v3897_v50 = vadd.f32 1.0, %v10752_v51  ;;  %v3887_v18 = vsel %vm3886_vm1, %v3884_v30, %v3881_v1  ;;  %vm9909_vm2 = vcmp.lt.f32.partialorder %v3912_v23, 0.0004427343  ;;  %v3948_v21 = vand.u32 2147483647, %v9676_v15 }
 0x46b   :  { %v3963_v48 = vmul.f32 -0.5, %v9778_v5  ;;  %v5764_v10 = vpop.eup %5763  ;;  %v4019_v41 = vsel %vm3187_vm12, %v10746_v52, %v3851_v8  ;;  %v4023_v0 = vsel %vm3191_vm13, %v10747_v14, %v3887_v18  ;;  %v3911_v56 = vmul.f32 %v10745_v38, %v3910_v43 }
 0x46c   :  { %5771 = vlog2.f32 %v3897_v50  ;;  %v5766_v55 = vpop.eup %5765  ;;  %v4059_v44 = vpack.c.bf16 %v4023_v0, %v4019_v41  ;;  %v3908_v47 = vmul.f32 0.6931472, %v5764_v10  ;;  %v3928_v61 = vadd.f32 1.0, %v3927_v37  ;;  %v10764_v50 = vld [vmem:[#allocation14_spill] sm:$0xff] }
 0x46d   :  { %v3933_v12 = vadd.f32 1.0, %v10755_v39  ;;  %v3944_v45 = vmul.f32 0.6931472, %v5766_v55  ;;  %v3947_v62 = vmul.f32 %v9676_v15, %v3946_v17  ;;  %v3930_v58 = vand.u32 2147483647, %v10750_v20 }
 0x46e   :  { %v3915_v6 = vadd.f32 1.0, %v10756_v42  ;;  %4506 = vmatmul.mubr.bf16.gmra.mrb[88].mxu1 %v4059_v44  ;;  %v3914_v13 = vsel %vm9909_vm2, %v3911_v56, %v3908_v47  ;;  %vm3949_vm3 = vcmp.lt.f32.partialorder %v3948_v21, 0.0004427343  ;;  %v3964_v38 = vadd.f32 1.0, %v3963_v48  ;;  %v10765_v47 = vld [vmem:[#allocation61_spill] sm:$0xff] }
 0x46f   :  { %5773 = vlog2.f32 %v3933_v12  ;;  %vm3198_vm4 = vcmp.gt.f32.partialorder %v9431_v32, 20.0  ;;  %v3950_v46 = vsel %vm3949_vm3, %v3947_v62, %v3944_v45  ;;  %v3900_v36 = vmul.f32 -0.5, %v10752_v51 }
 0x470   :  { %5775 = vlog2.f32 %v3915_v6  ;;  %v5768_v31 = vpop.eup %5767  ;;  %v4026_v15 = vsel %vm3194_vm0, %v10751_v53, %v3914_v13  ;;  %v4030_v57 = vsel %vm3198_vm4, %v9431_v32, %v3950_v46  ;;  %v3929_v35 = vmul.f32 %v10750_v20, %v3928_v61  ;;  %v10760_v20 = vld [vmem:[#allocation31_spill] sm:$0xff]  ;;  %v10766_v61 = vld [vmem:[#allocation44_spill] sm:$0xff] }
 0x471   :  { %v3966_v52 = vand.u32 2147483647, %v9778_v5  ;;  %v4062_v14 = vpack.c.bf16 %v4030_v57, %v4026_v15  ;;  %v3926_v60 = vmul.f32 0.6931472, %v5768_v31  ;;  %v3936_v28 = vmul.f32 -0.5, %v10755_v39 }
 0x472   :  { %v3951_v2 = vadd.f32 1.0, %v10757_v26  ;;  %vm9938_vm5 = vcmp.lt.f32.partialorder %v3930_v58, 0.0004427343  ;;  %v3965_v22 = vmul.f32 %v9778_v5, %v3964_v38  ;;  %v3901_v25 = vadd.f32 1.0, %v3900_v36 }
 0x473   :  { %v5770_v34 = vpop.eup %5769  ;;  %4416 = vmatprep.mubr.bf16.mxu0 %v4062_v14  ;;  %v3932_v32 = vsel %vm9938_vm5, %v3929_v35, %v3926_v60  ;;  %vm3196_vm6 = vcmp.gt.f32.partialorder %v10760_v20, 20.0  ;;  %vm3967_vm7 = vcmp.lt.f32.partialorder %v3966_v52, 0.0004427343  ;;  %v3903_v29 = vand.u32 2147483647, %v10752_v51 }
 0x474   :  { %v3962_v59 = vmul.f32 0.6931472, %v5770_v34  ;;  %5777 = vlog2.f32 %v3951_v2  ;;  %v3918_v9 = vmul.f32 -0.5, %v10756_v42  ;;  %vm3200_vm8 = vcmp.gt.f32.partialorder %v9450_v40, 20.0 }
 0x475   :  { %v3937_v11 = vadd.f32 1.0, %v3936_v28  ;;  %v3939_v5 = vand.u32 2147483647, %v10755_v39  ;;  %v4028_v4 = vsel %vm3196_vm6, %v10760_v20, %v3932_v32  ;;  %v3954_v23 = vmul.f32 -0.5, %v10757_v26 }
 0x476   :  { %v5772_v49 = vpop.eup %5771  ;;  %v3968_v3 = vsel %vm3967_vm7, %v3965_v22, %v3962_v59  ;;  %v3902_v53 = vmul.f32 %v10752_v51, %v3901_v25  ;;  %vm9954_vm9 = vcmp.lt.f32.partialorder %v3903_v29, 0.0004427343  ;;  %v3919_v33 = vadd.f32 1.0, %v3918_v9  ;;  %v10763_v51 = vld [vmem:[#allocation55_spill] sm:$0xff] }
 0x477   :  { %v4032_v16 = vsel %vm3200_vm8, %v9450_v40, %v3968_v3  ;;  %v3899_v27 = vmul.f32 0.6931472, %v5772_v49  ;;  %v3938_v40 = vmul.f32 %v10755_v39, %v3937_v11  ;;  %v3921_v37 = vand.u32 2147483647, %v10756_v42 }
 0x478   :  { %v4064_v24 = vpack.c.bf16 %v4032_v16, %v4028_v4  ;;  %vm3940_vm10 = vcmp.lt.f32.partialorder %v3939_v5, 0.0004427343  ;;  %v3955_v17 = vadd.f32 1.0, %v3954_v23  ;;  %vm3193_vm11 = vcmp.gt.f32.partialorder %v10763_v51, 20.0 }
 0x479   :  { %v5774_v7 = vpop.eup %5773  ;;  %v3905_v1 = vsel %vm9954_vm9, %v3902_v53, %v3899_v27  ;;  %vm3197_vm12 = vcmp.gt.f32.partialorder %v10764_v50, 20.0  ;;  %v3957_v54 = vand.u32 2147483647, %v10757_v26  ;;  %v3920_v10 = vmul.f32 %v10756_v42, %v3919_v33  ;;  %v9976_v42 = vld [vmem:[%s10014_s8] ss:$0 sm:$0xff]  ;;  %s5890_s8 = smov [#allocation7]  }
 0x47a   :  { %v5776_v43 = vpop.eup %5775  ;;  %4513 = vmatprep.mubr.bf16.mxu1 %v4064_v24  ;;  %v3935_v30 = vmul.f32 0.6931472, %v5774_v7  ;;  %v4025_v21 = vsel %vm3193_vm11, %v10763_v51, %v3905_v1  ;;  %vm3922_vm13 = vcmp.lt.f32.partialorder %v3921_v37, 0.0004427343  ;;  %v3956_v44 = vmul.f32 %v10757_v26, %v3955_v17  ;;  %s4559_s7 = sshll.u32 %s5890_s8, 4  ;;  %s4560_s7 = int_to_ptr.vmem [resolvable:$true] %s4559_s7 }
 0x47b   :  { %v3917_v8 = vmul.f32 0.6931472, %v5776_v43  ;;  %vm3958_vm14 = vcmp.lt.f32.partialorder %v3957_v54, 0.0004427343  ;;  %vm3195_vm15 = vcmp.gt.f32.partialorder %v10765_v47, 20.0  ;;  %vm3199_vm0 = vcmp.gt.f32.partialorder %v10766_v61, 20.0  ;;  %p5860_p3 = scmp.lt.s32.totalorder %s4560_s7, %s4560_s7 }
 0x47c   :  { %v3941_v18 = vsel %vm3940_vm10, %v3938_v40, %v3935_v30  ;;  %s5855_s20 = scalar_lea.vmem %s4560_s7, 2048 }
 0x47d   :  { %v4029_v48 = vsel %vm3197_vm12, %v10764_v50, %v3941_v18  ;;  %v3923_v56 = vsel %vm3922_vm13, %v3920_v10, %v3917_v8  ;;  %p5856_p2 = scmp.ne.s32.totalorder %s4560_s7, %s5855_s20  ;;  %p5861_p4 = scmp.lt.s32.totalorder %s5855_s20, %s5855_s20 }
 0x47e   :  { %v5778_v41 = vpop.eup %5777  ;;  %v4061_v0 = vpack.c.bf16 %v4029_v48, %v4025_v21  ;;  %v4027_v12 = vsel %vm3195_vm15, %v10765_v47, %v3923_v56 }
 0x47f   :  { %v3953_v55 = vmul.f32 0.6931472, %v5778_v41  ;;  %p5862_p5 = por %p5861_p4, %p5860_p3 }
 0x480   :  { %4417 = vmatmul.mubr.bf16.gmra.mrb[92].mxu0 %v4061_v0 }
 0x481   :  { %v3959_v39 = vsel %vm3958_vm14, %v3956_v44, %v3953_v55  ;;  %p5863_p6 = pnand %p5862_p5, %p5856_p2 }
 0x482   :  { %v4031_v45 = vsel %vm3199_vm0, %v10766_v61, %v3959_v39 }
 0x483   :  { %v4063_v62 = vpack.c.bf16 %v4031_v45, %v4027_v12 }
 0x485   :  { %4514 = vmatmul.mubr.bf16.gmra.mrb[92].mxu1 %v4063_v62 }
 0x4a4   :  { %v4773_v58 = vpop.f32.mrb[64].mxu0 }
 0x4a5   :  { %v4774_v6 = vpop.f32.mrb[65].mxu0 }
 0x4a6   :  { %v4837_v13 = vpop.f32.mrb[64].mxu1  ;;  %v4775_v38 = vadd.f32 %v4774_v6, %v4773_v58  ;;  %v4776_v46 = vpop.f32.mrb[66].mxu0 }
 0x4a7   :  { %v4838_v36 = vpop.f32.mrb[65].mxu1  ;;  %v4777_v31 = vpop.f32.mrb[67].mxu0 }
 0x4a8   :  { %v4363_v15 = vadd.f32 %v4775_v38, %v9976_v42  ;;  %v4839_v57 = vadd.f32 %v4838_v36, %v4837_v13  ;;  %v4840_v35 = vpop.f32.mrb[66].mxu1  ;;  %v4778_v52 = vadd.f32 %v4777_v31, %v4776_v46 }
 0x4a9   :  { %v4841_v14 = vpop.f32.mrb[67].mxu1 }
 0x4aa   :  { %v4460_v60 = vadd.f32 %v4839_v57, %v4363_v15  ;;  %v4366_v28 = vadd.f32 %v4778_v52, %v9976_v42  ;;  %v4842_v26 = vadd.f32 %v4841_v14, %v4840_v35 }
 0x4ac   :  { %5779 = vtanh.f32 %v4460_v60  ;;  %v4463_v2 = vadd.f32 %v4842_v26, %v4366_v28 }
 0x4ae   :  { %5781 = vtanh.f32 %v4463_v2 }
 0x4b6   :  { %v5780_v34 = vpop.eup %5779 }
 0x4b7   :  { %4538 = vst [vmem:[#allocation7] sm:$0xff] %v5780_v34 }
 0x4b8   :  { %v5782_v19 = vpop.eup %5781 }
 0x4b9   :  { %4539 = vst [vmem:[#allocation7 + $0x8] sm:$0xff] %v5782_v19 }
 0x4bc   :  { %v4779_v22 = vpop.f32.mrb[68].mxu0 }
 0x4bd   :  { %v4780_v32 = vpop.f32.mrb[69].mxu0 }
 0x4be   :  { %v4781_v59 = vadd.f32 %v4780_v32, %v4779_v22  ;;  %v4782_v25 = vpop.f32.mrb[70].mxu0 }
 0x4bf   :  { %v4783_v20 = vpop.f32.mrb[71].mxu0 }
 0x4c0   :  { %v4843_v29 = vpop.f32.mrb[68].mxu1  ;;  %v4371_v9 = vadd.f32 %v4781_v59, %v9976_v42  ;;  %v4784_v49 = vadd.f32 %v4783_v20, %v4782_v25 }
 0x4c1   :  { %v4844_v3 = vpop.f32.mrb[69].mxu1 }
 0x4c2   :  { %v4845_v11 = vadd.f32 %v4844_v3, %v4843_v29  ;;  %v4846_v5 = vpop.f32.mrb[70].mxu1  ;;  %v4374_v4 = vadd.f32 %v4784_v49, %v9976_v42 }
 0x4c3   :  { %v4847_v16 = vpop.f32.mrb[71].mxu1 }
 0x4c4   :  { %v4468_v27 = vadd.f32 %v4845_v11, %v4371_v9  ;;  %v4848_v23 = vadd.f32 %v4847_v16, %v4846_v5 }
 0x4c6   :  { %5783 = vtanh.f32 %v4468_v27  ;;  %v4471_v24 = vadd.f32 %v4848_v23, %v4374_v4 }
 0x4c8   :  { %5785 = vtanh.f32 %v4471_v24 }
 0x4d0   :  { %v5784_v53 = vpop.eup %5783 }
 0x4d1   :  { %4540 = vst [vmem:[#allocation7 + $0x10] sm:$0xff] %v5784_v53 }
 0x4d2   :  { %v5786_v7 = vpop.eup %5785 }
 0x4d3   :  { %4541 = vst [vmem:[#allocation7 + $0x18] sm:$0xff] %v5786_v7 }
 0x4dd   :  { %v4785_v63 = vpop.f32.mrb[72].mxu0 }
 0x4de   :  { %v4786_v33 = vpop.f32.mrb[73].mxu0 }
 0x4df   :  { %v4787_v43 = vadd.f32 %v4786_v33, %v4785_v63  ;;  %v4788_v1 = vpop.f32.mrb[74].mxu0 }
 0x4e0   :  { %v4789_v30 = vpop.f32.mrb[75].mxu0 }
 0x4e1   :  { %v4849_v40 = vpop.f32.mrb[72].mxu1  ;;  %v4379_v37 = vadd.f32 %v4787_v43, %v9976_v42  ;;  %v4790_v8 = vadd.f32 %v4789_v30, %v4788_v1 }
 0x4e2   :  { %v4850_v17 = vpop.f32.mrb[73].mxu1 }
 0x4e3   :  { %v4851_v51 = vadd.f32 %v4850_v17, %v4849_v40  ;;  %v4852_v50 = vpop.f32.mrb[74].mxu1  ;;  %v4382_v18 = vadd.f32 %v4790_v8, %v9976_v42 }
 0x4e4   :  { %v4853_v54 = vpop.f32.mrb[75].mxu1 }
 0x4e5   :  { %v4476_v21 = vadd.f32 %v4851_v51, %v4379_v37  ;;  %v4854_v48 = vadd.f32 %v4853_v54, %v4852_v50 }
 0x4e7   :  { %5787 = vtanh.f32 %v4476_v21  ;;  %v4479_v10 = vadd.f32 %v4854_v48, %v4382_v18 }
 0x4e9   :  { %5789 = vtanh.f32 %v4479_v10 }
 0x4f1   :  { %v5788_v41 = vpop.eup %5787 }
 0x4f2   :  { %4542 = vst [vmem:[#allocation7 + $0x20] sm:$0xff] %v5788_v41 }
 0x4f3   :  { %v5790_v0 = vpop.eup %5789 }
 0x4f4   :  { %4543 = vst [vmem:[#allocation7 + $0x28] sm:$0xff] %v5790_v0 }
 0x4f7   :  { %v4791_v56 = vpop.f32.mrb[76].mxu0 }
 0x4f8   :  { %v4792_v55 = vpop.f32.mrb[77].mxu0 }
 0x4f9   :  { %v4793_v44 = vadd.f32 %v4792_v55, %v4791_v56  ;;  %v4794_v47 = vpop.f32.mrb[78].mxu0 }
 0x4fa   :  { %v4795_v61 = vpop.f32.mrb[79].mxu0 }
 0x4fb   :  { %v4855_v39 = vpop.f32.mrb[76].mxu1  ;;  %v4387_v12 = vadd.f32 %v4793_v44, %v9976_v42  ;;  %v4796_v45 = vadd.f32 %v4795_v61, %v4794_v47 }
 0x4fc   :  { %v4856_v62 = vpop.f32.mrb[77].mxu1 }
 0x4fd   :  { %v4857_v58 = vadd.f32 %v4856_v62, %v4855_v39  ;;  %v4858_v6 = vpop.f32.mrb[78].mxu1  ;;  %v4390_v13 = vadd.f32 %v4796_v45, %v9976_v42 }
 0x4fe   :  { %v4859_v38 = vpop.f32.mrb[79].mxu1 }
 0x4ff   :  { %v4484_v46 = vadd.f32 %v4857_v58, %v4387_v12  ;;  %v4860_v36 = vadd.f32 %v4859_v38, %v4858_v6 }
 0x501   :  { %5791 = vtanh.f32 %v4484_v46  ;;  %v4487_v31 = vadd.f32 %v4860_v36, %v4390_v13 }
 0x503   :  { %5793 = vtanh.f32 %v4487_v31 }
 0x50b   :  { %v5792_v15 = vpop.eup %5791 }
 0x50c   :  { %4544 = vst [vmem:[#allocation7 + $0x30] sm:$0xff] %v5792_v15 }
 0x50d   :  { %v5794_v57 = vpop.eup %5793 }
 0x50e   :  { %4545 = vst [vmem:[#allocation7 + $0x38] sm:$0xff] %v5794_v57 }
 0x510   :  { %v4797_v35 = vpop.f32.mrb[80].mxu0 }
 0x511   :  { %v4798_v52 = vpop.f32.mrb[81].mxu0 }
 0x512   :  { %v4799_v14 = vadd.f32 %v4798_v52, %v4797_v35  ;;  %v4800_v60 = vpop.f32.mrb[82].mxu0 }
 0x513   :  { %v4801_v28 = vpop.f32.mrb[83].mxu0 }
 0x514   :  { %v4802_v26 = vadd.f32 %v4801_v28, %v4800_v60  ;;  %v4395_v34 = vadd.f32 %v4799_v14, %v9976_v42 }
 0x515   :  { %v4861_v2 = vpop.f32.mrb[80].mxu1 }
 0x516   :  { %v4862_v19 = vpop.f32.mrb[81].mxu1  ;;  %v4398_v59 = vadd.f32 %v4802_v26, %v9976_v42 }
 0x517   :  { %v4863_v22 = vadd.f32 %v4862_v19, %v4861_v2  ;;  %v4864_v32 = vpop.f32.mrb[82].mxu1 }
 0x518   :  { %v4865_v25 = vpop.f32.mrb[83].mxu1 }
 0x519   :  { %v4492_v20 = vadd.f32 %v4863_v22, %v4395_v34  ;;  %v4866_v29 = vadd.f32 %v4865_v25, %v4864_v32 }
 0x51b   :  { %5795 = vtanh.f32 %v4492_v20  ;;  %v4495_v9 = vadd.f32 %v4866_v29, %v4398_v59 }
 0x51d   :  { %5797 = vtanh.f32 %v4495_v9 }
 0x525   :  { %v4803_v49 = vpop.f32.mrb[84].mxu0  ;;  %v5796_v3 = vpop.eup %5795 }
 0x526   :  { %v4804_v11 = vpop.f32.mrb[85].mxu0  ;;  %4546 = vst [vmem:[#allocation7 + $0x40] sm:$0xff] %v5796_v3 }
 0x527   :  { %v4805_v5 = vadd.f32 %v4804_v11, %v4803_v49  ;;  %v4806_v4 = vpop.f32.mrb[86].mxu0  ;;  %v5798_v16 = vpop.eup %5797 }
 0x528   :  { %v4807_v27 = vpop.f32.mrb[87].mxu0  ;;  %4547 = vst [vmem:[#allocation7 + $0x48] sm:$0xff] %v5798_v16 }
 0x529   :  { %v4808_v23 = vadd.f32 %v4807_v27, %v4806_v4  ;;  %v4403_v53 = vadd.f32 %v4805_v5, %v9976_v42 }
 0x52b   :  { %v4406_v43 = vadd.f32 %v4808_v23, %v9976_v42 }
 0x52d   :  { %v4867_v24 = vpop.f32.mrb[84].mxu1 }
 0x52e   :  { %v4868_v7 = vpop.f32.mrb[85].mxu1 }
 0x52f   :  { %v4869_v63 = vadd.f32 %v4868_v7, %v4867_v24  ;;  %v4870_v33 = vpop.f32.mrb[86].mxu1 }
 0x530   :  { %v4871_v1 = vpop.f32.mrb[87].mxu1 }
 0x531   :  { %v4500_v30 = vadd.f32 %v4869_v63, %v4403_v53  ;;  %v4872_v40 = vadd.f32 %v4871_v1, %v4870_v33 }
 0x533   :  { %5799 = vtanh.f32 %v4500_v30  ;;  %v4503_v37 = vadd.f32 %v4872_v40, %v4406_v43 }
 0x535   :  { %5801 = vtanh.f32 %v4503_v37 }
 0x53c   :  { %v4809_v8 = vpop.f32.mrb[88].mxu0 }
 0x53d   :  { %v4810_v17 = vpop.f32.mrb[89].mxu0  ;;  %v5800_v51 = vpop.eup %5799 }
 0x53e   :  { %v4811_v50 = vadd.f32 %v4810_v17, %v4809_v8  ;;  %v4812_v18 = vpop.f32.mrb[90].mxu0  ;;  %4548 = vst [vmem:[#allocation7 + $0x50] sm:$0xff] %v5800_v51 }
 0x53f   :  { %v4813_v54 = vpop.f32.mrb[91].mxu0  ;;  %v5802_v21 = vpop.eup %5801 }
 0x540   :  { %v4814_v48 = vadd.f32 %v4813_v54, %v4812_v18  ;;  %4549 = vst [vmem:[#allocation7 + $0x58] sm:$0xff] %v5802_v21  ;;  %v4411_v41 = vadd.f32 %v4811_v50, %v9976_v42 }
 0x541   :  { %v4873_v10 = vpop.f32.mrb[88].mxu1 }
 0x542   :  { %v4874_v0 = vpop.f32.mrb[89].mxu1  ;;  %v4414_v44 = vadd.f32 %v4814_v48, %v9976_v42 }
 0x543   :  { %v4875_v56 = vadd.f32 %v4874_v0, %v4873_v10  ;;  %v4876_v55 = vpop.f32.mrb[90].mxu1 }
 0x544   :  { %v4877_v47 = vpop.f32.mrb[91].mxu1 }
 0x545   :  { %v4508_v61 = vadd.f32 %v4875_v56, %v4411_v41  ;;  %v4878_v39 = vadd.f32 %v4877_v47, %v4876_v55 }
 0x547   :  { %5803 = vtanh.f32 %v4508_v61  ;;  %v4511_v12 = vadd.f32 %v4878_v39, %v4414_v44 }
 0x549   :  { %5805 = vtanh.f32 %v4511_v12 }
 0x551   :  { %v5804_v45 = vpop.eup %5803 }
 0x552   :  { %4550 = vst [vmem:[#allocation7 + $0x60] sm:$0xff] %v5804_v45 }
 0x553   :  { %v4815_v62 = vpop.f32.mrb[92].mxu0  ;;  %v5806_v58 = vpop.eup %5805 }
 0x554   :  { %v4816_v6 = vpop.f32.mrb[93].mxu0  ;;  %4551 = vst [vmem:[#allocation7 + $0x68] sm:$0xff] %v5806_v58 }
 0x555   :  { %v4817_v13 = vadd.f32 %v4816_v6, %v4815_v62  ;;  %v4818_v38 = vpop.f32.mrb[94].mxu0 }
 0x556   :  { %v4819_v46 = vpop.f32.mrb[95].mxu0 }
 0x557   :  { %v4820_v36 = vadd.f32 %v4819_v46, %v4818_v38  ;;  %v4419_v15 = vadd.f32 %v4817_v13, %v9976_v42 }
 0x558   :  { %v4879_v31 = vpop.f32.mrb[92].mxu1 }
 0x559   :  { %v4880_v57 = vpop.f32.mrb[93].mxu1  ;;  %v4422_v14 = vadd.f32 %v4820_v36, %v9976_v42 }
 0x55a   :  { %v4881_v35 = vadd.f32 %v4880_v57, %v4879_v31  ;;  %v4882_v52 = vpop.f32.mrb[94].mxu1 }
 0x55b   :  { %v4883_v60 = vpop.f32.mrb[95].mxu1 }
 0x55c   :  { %v4516_v28 = vadd.f32 %v4881_v35, %v4419_v15  ;;  %v4884_v26 = vadd.f32 %v4883_v60, %v4882_v52 }
 0x55e   :  { %5807 = vtanh.f32 %v4516_v28  ;;  %v4519_v2 = vadd.f32 %v4884_v26, %v4422_v14 }
 0x560   :  { %5809 = vtanh.f32 %v4519_v2 }
 0x568   :  { %v5808_v34 = vpop.eup %5807 }
 0x569   :  { %4552 = vst [vmem:[#allocation7 + $0x70] sm:$0xff] %v5808_v34 }
 0x56a   :  { %v5810_v19 = vpop.eup %5809 }
 0x56b   :  { %4553 = vst [vmem:[#allocation7 + $0x78] sm:$0xff] %v5810_v19 }
 0x56c   :  { %5866 = shalt.err (!%p5863_p6)
}
 0x56d   :  { %s5867_s23 = scalar_lea.hbm %s10015_s9, 2048 }
 0x56e   :  { %p5868_p7 = scmp.ne.s32.totalorder %s10015_s9, %s5867_s23  ;;  %p5871_p8 = scmp.lt.u32.totalorder %s5867_s23, %s10015_s9 }
 0x570   :  { %p5873_p9 = pnand %p5871_p8, %p5868_p7 }
 0x572   :  { %5876 = shalt.err (!%p5873_p9)
}
 0x573   :  { %s5891_s28 = smov 128   ;;  %s5892_s29 = smov 8  }
 0x574   :  { %4565 = dma.vmem_to_hbm [thread:$0]  %s4560_s7, 2048, %s10015_s9, [#allocation4], %s5891_s28, %s5891_s28, %s5892_s29  }
 0x575   :  { %5881 = dma.done.wait [#allocation4], 2048  }
 0x576   :  { %5882 = vsyncadd [#allocation4], 4294965248 }
 0x577   :  { %4569 = vsyncpa [#allocation3], 1 }
 0x578   :  { %4570 = vsyncpa [#allocation6], 1 }
 0x579   :  { %4571 = vsyncpa [#allocation4], 1 }

</bundles_post_ra>
